<compile_context>
chip_gen: v6e
topology: v6e:2x2x1
jax: 0.10.0
libtpu: 0.0.40
codegen_flags: <defaults>
</compile_context>

<pallas_src>
import functools
import math

import numpy as np

import jax
import jax.numpy as jnp
from jax import lax
from jax.experimental import pallas as pl
from jax.experimental.pallas import tpu as pltpu


_TILE_M = 2048                     # conv row tile (bf16 2048x1056 ~ 4.3 MiB)
_TILE_B = 1024                     # tail row tile
_VMEM_LIMIT = 32 * 1024 * 1024     # safe on v5e (128 MiB) .. v7x (64 MiB)


def _round_up(x, m):
    return ((x + m - 1) // m) * m


# ----------------------------- Pallas kernels ------------------------------

def _matmul_bias_prelu_kernel(x_ref, w_ref, ba_ref, o_ref):
    """o = PReLU(x @ w + bias); x/w bf16, f32 accumulation and epilogue.

    ba_ref packs [bias; alpha] as a (2, N) f32 block.
    """
    y = jnp.dot(x_ref[...], w_ref[...], preferred_element_type=jnp.float32)
    y = y + ba_ref[0:1, :]
    o_ref[...] = jnp.where(y > 0.0, y, y * ba_ref[1:2, :]).astype(o_ref.dtype)


def _tail_kernel(f_ref, *refs, na, n_hidden):
    """Fused tail: [conv4+PReLU4] -> fc5+PReLU5 -> merged heads -> softmax.

    refs = (w_1, ba_1, ..., w_nh, ba_nh, w_heads, b_heads, out_ref).
    Output columns [0, na) hold softmax(head a); [na, :) hold raw head b.
    """
    o_ref = refs[-1]
    h = f_ref[...]
    for l in range(n_hidden):
        w_ref = refs[2 * l]
        ba_ref = refs[2 * l + 1]
        y = jnp.dot(h.astype(w_ref.dtype), w_ref[...],
                    preferred_element_type=jnp.float32)
        y = y + ba_ref[0:1, :]
        h = jnp.where(y > 0.0, y, y * ba_ref[1:2, :])
    # drop5: Dropout(0.25) is identity at inference.
    wh_ref = refs[2 * n_hidden]
    bh_ref = refs[2 * n_hidden + 1]
    z = jnp.dot(h.astype(wh_ref.dtype), wh_ref[...],
                preferred_element_type=jnp.float32) + bh_ref[...]
    # Branch-free softmax over the first `na` lanes; other lanes pass through.
    col = lax.broadcasted_iota(jnp.int32, z.shape, 1)
    is_cls = col < na
    m = jnp.max(jnp.where(is_cls, z, -jnp.inf), axis=1, keepdims=True)
    e = jnp.where(is_cls, jnp.exp(z - m), 0.0)
    denom = jnp.sum(e, axis=1, keepdims=True)
    o_ref[...] = jnp.where(is_cls, e / denom, z)


# ------------------------------ layer wrappers ------------------------------

def _fused_matmul(x2d, w, ba, out_dtype=jnp.bfloat16, tile_m=_TILE_M):
    """Row-tiled fused matmul + bias + PReLU (ragged grid, no pad copies)."""
    m, kdim = x2d.shape
    n = w.shape[1]
    tm = min(tile_m, _round_up(m, 16))
    return pl.pallas_call(
        _matmul_bias_prelu_kernel,
        out_shape=jax.ShapeDtypeStruct((m, n), out_dtype),
        grid=(pl.cdiv(m, tm),),
        in_specs=[
            pl.BlockSpec((tm, kdim), lambda i: (i, 0)),   # row tile of patches
            pl.BlockSpec((kdim, n), lambda i: (0, 0)),    # weights resident
            pl.BlockSpec((2, n), lambda i: (0, 0)),       # packed bias/alpha
        ],
        out_specs=pl.BlockSpec((tm, n), lambda i: (i, 0)),
        compiler_params=pltpu.CompilerParams(
            dimension_semantics=("parallel",),
            vmem_limit_bytes=_VMEM_LIMIT),
    )(x2d.astype(jnp.bfloat16), w.astype(jnp.bfloat16), ba.astype(jnp.float32))


def _banded_weight(w, width):
    """Build the (k*W*Cin, Wo*Cout) banded matrix folding the (dj, Cin) contraction.

    big[di*W*Cin + wj*Cin + ci, wo*Cout + co] = w[di, wj - wo, ci, co]
    for 0 <= wj - wo < k, else 0.
    """
    k, _, cin, cout = w.shape
    wo = width - k + 1
    sel = np.zeros((k, width, wo), np.float32)
    for dj in range(k):
        for o in range(wo):
            sel[dj, o + dj, o] = 1.0
    sel = jnp.asarray(sel, dtype=w.dtype)
    big = jnp.einsum('jab,djio->daibo', sel, w)        # (k, W, Cin, Wo, Cout)
    return big.reshape(k * width * cin, wo * cout)


def conv2d_prelu(x, w, b, alpha):
    """'valid' conv, stride 1, then PReLU. x:(B,H,W,Cin) bf16, w:(k,k,Cin,Cout) HWIO."""
    k = w.shape[0]
    B, H, W, Cin = x.shape
    Cout = w.shape[3]
    Ho, Wo = H - k + 1, W - k + 1

    if k == 1:
        p = x.reshape(B * H * W, Cin)
        out = _fused_matmul(p, w.reshape(Cin, Cout), jnp.stack([b, alpha]))
        return out.reshape(B, H, W, Cout)

    # Reduced im2col: only k row-shifted copies, (dj, Cin) folded into the weight.
    x3 = x.reshape(B, H, W * Cin)
    p = jnp.concatenate([x3[:, di:di + Ho, :] for di in range(k)], axis=-1)
    p = p.reshape(B * Ho, k * W * Cin)

    wbig = _banded_weight(w, W)                         # (k*W*Cin, Wo*Cout)
    ba = jnp.stack([jnp.tile(b, Wo), jnp.tile(alpha, Wo)])   # (2, Wo*Cout)

    out = _fused_matmul(p, wbig, ba)                    # (B*Ho, Wo*Cout), lane-dense
    return out.reshape(B, Ho, Wo, Cout)


def maxpool2d_ceil(x, k, s):
    """PyTorch MaxPool2d(k, stride=s, padding=0, ceil_mode=True) semantics."""
    B, H, W, C = x.shape

    def out_size(n):
        o = -(-(n - k) // s) + 1           # ceil((n - k) / s) + 1
        if (o - 1) * s >= n:               # windows may not start past the input
            o -= 1
        return o

    Ho, Wo = out_size(H), out_size(W)
    Hp, Wp = (Ho - 1) * s + k, (Wo - 1) * s + k
    init = jnp.asarray(-jnp.inf, dtype=x.dtype)
    return lax.reduce_window(
        x, init, lax.max,
        window_dimensions=(1, k, k, 1),
        window_strides=(1, s, s, 1),
        padding=((0, 0), (0, Hp - H), (0, Wp - W), (0, 0)))


def _tail(feat, hidden_layers, wh, bh, na, tile_b=_TILE_B):
    """Fused hidden layers + merged heads + softmax, row-tiled over the batch."""
    Bn, kin = feat.shape
    nout = wh.shape[1]
    tb = min(tile_b, _round_up(Bn, 16))

    in_specs = [pl.BlockSpec((tb, kin), lambda i: (i, 0))]
    args = [feat.astype(jnp.bfloat16)]
    for (w, ba) in hidden_layers:
        n = w.shape[1]
        in_specs += [pl.BlockSpec(w.shape, lambda i: (0, 0)),
                     pl.BlockSpec((2, n), lambda i: (0, 0))]
        args += [w.astype(jnp.bfloat16), ba.astype(jnp.float32)]
    in_specs += [pl.BlockSpec(wh.shape, lambda i: (0, 0)),
                 pl.BlockSpec((1, nout), lambda i: (0, 0))]
    args += [wh.astype(jnp.bfloat16), bh.reshape(1, nout).astype(jnp.float32)]

    kernel = functools.partial(_tail_kernel, na=na, n_hidden=len(hidden_layers))
    out = pl.pallas_call(
        kernel,
        out_shape=jax.ShapeDtypeStruct((Bn, nout), jnp.float32),
        grid=(pl.cdiv(Bn, tb),),
        in_specs=in_specs,
        out_specs=pl.BlockSpec((tb, nout), lambda i: (i, 0)),
        compiler_params=pltpu.CompilerParams(
            dimension_semantics=("parallel",),
            vmem_limit_bytes=_VMEM_LIMIT),
    )(*args)
    return out[:, na:], out[:, :na]        # (b, a) -- softmax already applied to a


# --------------------------------- ONet -------------------------------------

def onet_forward(params, x_nchw):
    """Returns (b, a) like ONet.forward with is_train=False (eval mode)."""
    x = jnp.transpose(x_nchw, (0, 2, 3, 1)).astype(jnp.bfloat16)   # NCHW -> NHWC

    x = conv2d_prelu(x, params["conv1_w"], params["conv1_b"], params["prelu1"])
    x = maxpool2d_ceil(x, 3, 2)
    x = conv2d_prelu(x, params["conv2_w"], params["conv2_b"], params["prelu2"])
    x = maxpool2d_ceil(x, 3, 2)
    x = conv2d_prelu(x, params["conv3_w"], params["conv3_b"], params["prelu3"])
    x = maxpool2d_ceil(x, 2, 2)

    B, H, W, C = x.shape
    na = params["fc61_w"].shape[1]                         # cls_num + 1
    wh = jnp.concatenate([params["fc61_w"], params["fc62_w"]], axis=1)
    bh = jnp.concatenate([params["fc61_b"], params["fc62_b"]])
    ba5 = jnp.stack([params["fc5_b"], params["prelu5"]])

    if H == 1 and W == 1:
        # Standard ONet (24x24 input, linear=1): conv4(1x1) is a plain matmul
        # and the NCHW flatten is trivial, so fuse everything into the tail.
        feat = x.reshape(B, C)
        hidden = [(params["conv4_w"].reshape(C, -1),
                   jnp.stack([params["conv4_b"], params["prelu4"]])),
                  (params["fc5_w"], ba5)]
    else:
        # General `linear != 1` path: conv4 as a separate 1x1-conv kernel, then
        # PyTorch's channel-major (NCHW) flatten.
        x = conv2d_prelu(x, params["conv4_w"], params["conv4_b"], params["prelu4"])
        B, H, W, C = x.shape
        feat = jnp.transpose(x, (0, 3, 1, 2)).reshape(B, C * H * W)
        hidden = [(params["fc5_w"], ba5)]

    b_out, a_out = _tail(feat, hidden, wh, bh, na)
    return b_out, a_out


def init_params(key, linear=1, cls_num=1):
    keys = iter(jax.random.split(key, 32))

    def w(shape):
        fan_in = math.prod(shape[:-1])
        s = 1.0 / math.sqrt(fan_in)
        return jax.random.uniform(next(keys), shape, jnp.float32, -s, s)

    def b(n, fan_in):
        s = 1.0 / math.sqrt(fan_in)
        return jax.random.uniform(next(keys), (n,), jnp.float32, -s, s)

    p = {}
    p["conv1_w"] = w((3, 3, 3, 32));    p["conv1_b"] = b(32, 27)
    p["prelu1"] = jnp.full((32,), 0.25, jnp.float32)
    p["conv2_w"] = w((3, 3, 32, 64));   p["conv2_b"] = b(64, 288)
    p["prelu2"] = jnp.full((64,), 0.25, jnp.float32)
    p["conv3_w"] = w((3, 3, 64, 64));   p["conv3_b"] = b(64, 576)
    p["prelu3"] = jnp.full((64,), 0.25, jnp.float32)
    p["conv4_w"] = w((1, 1, 64, 128));  p["conv4_b"] = b(128, 64)
    p["prelu4"] = jnp.full((128,), 0.25, jnp.float32)
    p["fc5_w"] = w((128 * linear, 256)); p["fc5_b"] = b(256, 128 * linear)
    p["prelu5"] = jnp.full((256,), 0.25, jnp.float32)
    p["fc61_w"] = w((256, cls_num + 1)); p["fc61_b"] = b(cls_num + 1, 256)
    p["fc62_w"] = w((256, 4));           p["fc62_b"] = b(4, 256)
    return p


if __name__ == "__main__":
    key = jax.random.PRNGKey(0)
    pkey, xkey = jax.random.split(key)

    # 3x24x24 input -> 1x1x128 feature map after pool3/conv4, so linear=1;
    # cls_num=1 gives a:[B,2], b:[B,4] as in the module docstring.
    params = init_params(pkey, linear=1, cls_num=1)
    x = jax.random.normal(xkey, (2, 3, 24, 24), jnp.float32)

    b_out, a_out = jax.jit(onet_forward)(params, x)
    jax.block_until_ready((b_out, a_out))

    assert b_out.shape == (2, 4), b_out.shape
    assert a_out.shape == (2, 2), a_out.shape
    assert bool(jnp.all(jnp.isfinite(b_out))) and bool(jnp.all(jnp.isfinite(a_out)))
    assert bool(jnp.allclose(jnp.sum(a_out, axis=1), 1.0, atol=1e-4))
    print("KERNEL_OK")
</pallas_src>

<mosaic_0001>
module attributes {stable_mosaic.version = 11 : i64} {
  func.func @_matmul_bias_prelu_kernel(%arg0: i32, %arg1: memref<48x216xbf16, #tpu.memory_space<vmem>>, %arg2: memref<216x704xbf16, #tpu.memory_space<vmem>>, %arg3: memref<2x704xf32, #tpu.memory_space<vmem>>, %arg4: memref<48x704xbf16, #tpu.memory_space<vmem>>) attributes {dimension_semantics = [#tpu.dimension_semantics<parallel>], iteration_bounds = array<i64: 1>, scalar_prefetch = 0 : i64, scratch_operands = 0 : i64, tpu.core_type = #tpu.core_type<tc>, window_params = [{transform_indices = @transform_0, window_bounds = array<i64: 48, 216>}, {pipeline_mode = #tpu.pipeline_mode<synchronous>, transform_indices = @transform_1, window_bounds = array<i64: 216, 704>}, {pipeline_mode = #tpu.pipeline_mode<synchronous>, transform_indices = @transform_2, window_bounds = array<i64: 2, 704>}, {transform_indices = @transform_3, window_bounds = array<i64: 48, 704>}]} {
    %c0 = arith.constant 0 : index
    %c0_0 = arith.constant 0 : index
    %0 = vector.load %arg1[%c0, %c0_0] : memref<48x216xbf16, #tpu.memory_space<vmem>>, vector<48x216xbf16>
    %c0_1 = arith.constant 0 : index
    %c0_2 = arith.constant 0 : index
    %1 = vector.load %arg2[%c0_1, %c0_2] : memref<216x704xbf16, #tpu.memory_space<vmem>>, vector<216x704xbf16>
    %cst = arith.constant dense<0.000000e+00> : vector<48x704xf32>
    %2 = tpu.matmul %0, %1, %cst {dimension_numbers = #tpu.dot_dimension_numbers<[1], [0], [0], [1], [0, 0, 1, 1], [], []>} : vector<48x216xbf16>, vector<216x704xbf16>, vector<48x704xf32> -> vector<48x704xf32>
    %c0_3 = arith.constant 0 : index
    %c0_4 = arith.constant 0 : index
    %3 = vector.load %arg3[%c0_3, %c0_4] : memref<2x704xf32, #tpu.memory_space<vmem>>, vector<1x704xf32>
    %4 = vector.broadcast %3 : vector<1x704xf32> to vector<48x704xf32>
    %5 = arith.addf %2, %4 : vector<48x704xf32>
    %cst_5 = arith.constant 0.000000e+00 : f32
    %6 = vector.broadcast %cst_5 : f32 to vector<48x704xf32>
    %7 = arith.cmpf ogt, %5, %6 : vector<48x704xf32>
    %c1 = arith.constant 1 : index
    %c0_6 = arith.constant 0 : index
    %8 = vector.load %arg3[%c1, %c0_6] : memref<2x704xf32, #tpu.memory_space<vmem>>, vector<1x704xf32>
    %9 = vector.broadcast %8 : vector<1x704xf32> to vector<48x704xf32>
    %10 = arith.mulf %5, %9 : vector<48x704xf32>
    %11 = arith.select %7, %5, %10 : vector<48x704xi1>, vector<48x704xf32>
    %12 = arith.truncf %11 : vector<48x704xf32> to vector<48x704xbf16>
    %c0_7 = arith.constant 0 : index
    %c0_8 = arith.constant 0 : index
    %13 = vector.load %arg4[%c0_7, %c0_8] : memref<48x704xbf16, #tpu.memory_space<vmem>>, vector<48x704xbf16>
    tpu.vector_store %arg4[%c0_7, %c0_8], %12 {strides = array<i32>} : memref<48x704xbf16, #tpu.memory_space<vmem>>, vector<48x704xbf16>,
    return
  }
  func.func @transform_0(%arg0: i32) -> (i32, i32) {
    %c0_i32 = arith.constant 0 : i32
    %c0_i32_0 = arith.constant 0 : i32
    return %arg0, %c0_i32 : i32, i32
  }
  func.func @transform_1(%arg0: i32) -> (i32, i32) {
    %c0_i32 = arith.constant 0 : i32
    %c0_i32_0 = arith.constant 0 : i32
    %c0_i32_1 = arith.constant 0 : i32
    return %c0_i32, %c0_i32_0 : i32, i32
  }
  func.func @transform_2(%arg0: i32) -> (i32, i32) {
    %c0_i32 = arith.constant 0 : i32
    %c0_i32_0 = arith.constant 0 : i32
    %c0_i32_1 = arith.constant 0 : i32
    return %c0_i32, %c0_i32_0 : i32, i32
  }
  func.func @transform_3(%arg0: i32) -> (i32, i32) {
    %c0_i32 = arith.constant 0 : i32
    %c0_i32_0 = arith.constant 0 : i32
    return %arg0, %c0_i32 : i32, i32
  }
}

module attributes {stable_mosaic.version = 11 : i64} {
  func.func @_matmul_bias_prelu_kernel(%arg0: i32, %arg1: memref<32x1056xbf16, #tpu.memory_space<vmem>>, %arg2: memref<1056x576xbf16, #tpu.memory_space<vmem>>, %arg3: memref<2x576xf32, #tpu.memory_space<vmem>>, %arg4: memref<32x576xbf16, #tpu.memory_space<vmem>>) attributes {dimension_semantics = [#tpu.dimension_semantics<parallel>], iteration_bounds = array<i64: 1>, scalar_prefetch = 0 : i64, scratch_operands = 0 : i64, tpu.core_type = #tpu.core_type<tc>, window_params = [{transform_indices = @transform_0, window_bounds = array<i64: 32, 1056>}, {pipeline_mode = #tpu.pipeline_mode<synchronous>, transform_indices = @transform_1, window_bounds = array<i64: 1056, 576>}, {pipeline_mode = #tpu.pipeline_mode<synchronous>, transform_indices = @transform_2, window_bounds = array<i64: 2, 576>}, {transform_indices = @transform_3, window_bounds = array<i64: 32, 576>}]} {
    %c0 = arith.constant 0 : index
    %c0_0 = arith.constant 0 : index
    %0 = vector.load %arg1[%c0, %c0_0] : memref<32x1056xbf16, #tpu.memory_space<vmem>>, vector<32x1056xbf16>
    %c0_1 = arith.constant 0 : index
    %c0_2 = arith.constant 0 : index
    %1 = vector.load %arg2[%c0_1, %c0_2] : memref<1056x576xbf16, #tpu.memory_space<vmem>>, vector<1056x576xbf16>
    %cst = arith.constant dense<0.000000e+00> : vector<32x576xf32>
    %2 = tpu.matmul %0, %1, %cst {dimension_numbers = #tpu.dot_dimension_numbers<[1], [0], [0], [1], [0, 0, 1, 1], [], []>} : vector<32x1056xbf16>, vector<1056x576xbf16>, vector<32x576xf32> -> vector<32x576xf32>
    %c0_3 = arith.constant 0 : index
    %c0_4 = arith.constant 0 : index
    %3 = vector.load %arg3[%c0_3, %c0_4] : memref<2x576xf32, #tpu.memory_space<vmem>>, vector<1x576xf32>
    %4 = vector.broadcast %3 : vector<1x576xf32> to vector<32x576xf32>
    %5 = arith.addf %2, %4 : vector<32x576xf32>
    %cst_5 = arith.constant 0.000000e+00 : f32
    %6 = vector.broadcast %cst_5 : f32 to vector<32x576xf32>
    %7 = arith.cmpf ogt, %5, %6 : vector<32x576xf32>
    %c1 = arith.constant 1 : index
    %c0_6 = arith.constant 0 : index
    %8 = vector.load %arg3[%c1, %c0_6] : memref<2x576xf32, #tpu.memory_space<vmem>>, vector<1x576xf32>
    %9 = vector.broadcast %8 : vector<1x576xf32> to vector<32x576xf32>
    %10 = arith.mulf %5, %9 : vector<32x576xf32>
    %11 = arith.select %7, %5, %10 : vector<32x576xi1>, vector<32x576xf32>
    %12 = arith.truncf %11 : vector<32x576xf32> to vector<32x576xbf16>
    %c0_7 = arith.constant 0 : index
    %c0_8 = arith.constant 0 : index
    %13 = vector.load %arg4[%c0_7, %c0_8] : memref<32x576xbf16, #tpu.memory_space<vmem>>, vector<32x576xbf16>
    tpu.vector_store %arg4[%c0_7, %c0_8], %12 {strides = array<i32>} : memref<32x576xbf16, #tpu.memory_space<vmem>>, vector<32x576xbf16>,
    return
  }
  func.func @transform_0(%arg0: i32) -> (i32, i32) {
    %c0_i32 = arith.constant 0 : i32
    %c0_i32_0 = arith.constant 0 : i32
    return %arg0, %c0_i32 : i32, i32
  }
  func.func @transform_1(%arg0: i32) -> (i32, i32) {
    %c0_i32 = arith.constant 0 : i32
    %c0_i32_0 = arith.constant 0 : i32
    %c0_i32_1 = arith.constant 0 : i32
    return %c0_i32, %c0_i32_0 : i32, i32
  }
  func.func @transform_2(%arg0: i32) -> (i32, i32) {
    %c0_i32 = arith.constant 0 : i32
    %c0_i32_0 = arith.constant 0 : i32
    %c0_i32_1 = arith.constant 0 : i32
    return %c0_i32, %c0_i32_0 : i32, i32
  }
  func.func @transform_3(%arg0: i32) -> (i32, i32) {
    %c0_i32 = arith.constant 0 : i32
    %c0_i32_0 = arith.constant 0 : i32
    return %arg0, %c0_i32 : i32, i32
  }
}

module attributes {stable_mosaic.version = 11 : i64} {
  func.func @_matmul_bias_prelu_kernel(%arg0: i32, %arg1: memref<16x768xbf16, #tpu.memory_space<vmem>>, %arg2: memref<768x128xbf16, #tpu.memory_space<vmem>>, %arg3: memref<2x128xf32, #tpu.memory_space<vmem>>, %arg4: memref<16x128xbf16, #tpu.memory_space<vmem>>) attributes {dimension_semantics = [#tpu.dimension_semantics<parallel>], iteration_bounds = array<i64: 1>, scalar_prefetch = 0 : i64, scratch_operands = 0 : i64, tpu.core_type = #tpu.core_type<tc>, window_params = [{transform_indices = @transform_0, window_bounds = array<i64: 16, 768>}, {pipeline_mode = #tpu.pipeline_mode<synchronous>, transform_indices = @transform_1, window_bounds = array<i64: 768, 128>}, {pipeline_mode = #tpu.pipeline_mode<synchronous>, transform_indices = @transform_2, window_bounds = array<i64: 2, 128>}, {transform_indices = @transform_3, window_bounds = array<i64: 16, 128>}]} {
    %c0 = arith.constant 0 : index
    %c0_0 = arith.constant 0 : index
    %0 = vector.load %arg1[%c0, %c0_0] : memref<16x768xbf16, #tpu.memory_space<vmem>>, vector<16x768xbf16>
    %c0_1 = arith.constant 0 : index
    %c0_2 = arith.constant 0 : index
    %1 = vector.load %arg2[%c0_1, %c0_2] : memref<768x128xbf16, #tpu.memory_space<vmem>>, vector<768x128xbf16>
    %cst = arith.constant dense<0.000000e+00> : vector<16x128xf32>
    %2 = tpu.matmul %0, %1, %cst {dimension_numbers = #tpu.dot_dimension_numbers<[1], [0], [0], [1], [0, 0, 1, 1], [], []>} : vector<16x768xbf16>, vector<768x128xbf16>, vector<16x128xf32> -> vector<16x128xf32>
    %c0_3 = arith.constant 0 : index
    %c0_4 = arith.constant 0 : index
    %3 = vector.load %arg3[%c0_3, %c0_4] : memref<2x128xf32, #tpu.memory_space<vmem>>, vector<1x128xf32>
    %4 = vector.broadcast %3 : vector<1x128xf32> to vector<16x128xf32>
    %5 = arith.addf %2, %4 : vector<16x128xf32>
    %cst_5 = arith.constant 0.000000e+00 : f32
    %6 = vector.broadcast %cst_5 : f32 to vector<16x128xf32>
    %7 = arith.cmpf ogt, %5, %6 : vector<16x128xf32>
    %c1 = arith.constant 1 : index
    %c0_6 = arith.constant 0 : index
    %8 = vector.load %arg3[%c1, %c0_6] : memref<2x128xf32, #tpu.memory_space<vmem>>, vector<1x128xf32>
    %9 = vector.broadcast %8 : vector<1x128xf32> to vector<16x128xf32>
    %10 = arith.mulf %5, %9 : vector<16x128xf32>
    %11 = arith.select %7, %5, %10 : vector<16x128xi1>, vector<16x128xf32>
    %12 = arith.truncf %11 : vector<16x128xf32> to vector<16x128xbf16>
    %c0_7 = arith.constant 0 : index
    %c0_8 = arith.constant 0 : index
    %13 = vector.load %arg4[%c0_7, %c0_8] : memref<16x128xbf16, #tpu.memory_space<vmem>>, vector<16x128xbf16>
    tpu.vector_store %arg4[%c0_7, %c0_8], %12 {strides = array<i32>} : memref<16x128xbf16, #tpu.memory_space<vmem>>, vector<16x128xbf16>,
    return
  }
  func.func @transform_0(%arg0: i32) -> (i32, i32) {
    %c0_i32 = arith.constant 0 : i32
    %c0_i32_0 = arith.constant 0 : i32
    return %arg0, %c0_i32 : i32, i32
  }
  func.func @transform_1(%arg0: i32) -> (i32, i32) {
    %c0_i32 = arith.constant 0 : i32
    %c0_i32_0 = arith.constant 0 : i32
    %c0_i32_1 = arith.constant 0 : i32
    return %c0_i32, %c0_i32_0 : i32, i32
  }
  func.func @transform_2(%arg0: i32) -> (i32, i32) {
    %c0_i32 = arith.constant 0 : i32
    %c0_i32_0 = arith.constant 0 : i32
    %c0_i32_1 = arith.constant 0 : i32
    return %c0_i32, %c0_i32_0 : i32, i32
  }
  func.func @transform_3(%arg0: i32) -> (i32, i32) {
    %c0_i32 = arith.constant 0 : i32
    %c0_i32_0 = arith.constant 0 : i32
    return %arg0, %c0_i32 : i32, i32
  }
}

module attributes {stable_mosaic.version = 11 : i64} {
  func.func @_tail_kernel(%arg0: i32, %arg1: memref<16x64xbf16, #tpu.memory_space<vmem>>, %arg2: memref<64x128xbf16, #tpu.memory_space<vmem>>, %arg3: memref<2x128xf32, #tpu.memory_space<vmem>>, %arg4: memref<128x256xbf16, #tpu.memory_space<vmem>>, %arg5: memref<2x256xf32, #tpu.memory_space<vmem>>, %arg6: memref<256x6xbf16, #tpu.memory_space<vmem>>, %arg7: memref<1x6xf32, #tpu.memory_space<vmem>>, %arg8: memref<16x6xf32, #tpu.memory_space<vmem>>) attributes {dimension_semantics = [#tpu.dimension_semantics<parallel>], iteration_bounds = array<i64: 1>, scalar_prefetch = 0 : i64, scratch_operands = 0 : i64, tpu.core_type = #tpu.core_type<tc>, window_params = [{transform_indices = @transform_0, window_bounds = array<i64: 16, 64>}, {pipeline_mode = #tpu.pipeline_mode<synchronous>, transform_indices = @transform_1, window_bounds = array<i64: 64, 128>}, {pipeline_mode = #tpu.pipeline_mode<synchronous>, transform_indices = @transform_2, window_bounds = array<i64: 2, 128>}, {pipeline_mode = #tpu.pipeline_mode<synchronous>, transform_indices = @transform_3, window_bounds = array<i64: 128, 256>}, {pipeline_mode = #tpu.pipeline_mode<synchronous>, transform_indices = @transform_4, window_bounds = array<i64: 2, 256>}, {pipeline_mode = #tpu.pipeline_mode<synchronous>, transform_indices = @transform_5, window_bounds = array<i64: 256, 6>}, {pipeline_mode = #tpu.pipeline_mode<synchronous>, transform_indices = @transform_6, window_bounds = array<i64: 1, 6>}, {transform_indices = @transform_7, window_bounds = array<i64: 16, 6>}]} {
    %c0 = arith.constant 0 : index
    %c0_0 = arith.constant 0 : index
    %0 = vector.load %arg1[%c0, %c0_0] : memref<16x64xbf16, #tpu.memory_space<vmem>>, vector<16x64xbf16>
    %c0_1 = arith.constant 0 : index
    %c0_2 = arith.constant 0 : index
    %1 = vector.load %arg2[%c0_1, %c0_2] : memref<64x128xbf16, #tpu.memory_space<vmem>>, vector<64x128xbf16>
    %cst = arith.constant dense<0.000000e+00> : vector<16x128xf32>
    %2 = tpu.matmul %0, %1, %cst {dimension_numbers = #tpu.dot_dimension_numbers<[1], [0], [0], [1], [0, 0, 1, 1], [], []>} : vector<16x64xbf16>, vector<64x128xbf16>, vector<16x128xf32> -> vector<16x128xf32>
    %c0_3 = arith.constant 0 : index
    %c0_4 = arith.constant 0 : index
    %3 = vector.load %arg3[%c0_3, %c0_4] : memref<2x128xf32, #tpu.memory_space<vmem>>, vector<1x128xf32>
    %4 = vector.broadcast %3 : vector<1x128xf32> to vector<16x128xf32>
    %5 = arith.addf %2, %4 : vector<16x128xf32>
    %cst_5 = arith.constant 0.000000e+00 : f32
    %6 = vector.broadcast %cst_5 : f32 to vector<16x128xf32>
    %7 = arith.cmpf ogt, %5, %6 : vector<16x128xf32>
    %c1 = arith.constant 1 : index
    %c0_6 = arith.constant 0 : index
    %8 = vector.load %arg3[%c1, %c0_6] : memref<2x128xf32, #tpu.memory_space<vmem>>, vector<1x128xf32>
    %9 = vector.broadcast %8 : vector<1x128xf32> to vector<16x128xf32>
    %10 = arith.mulf %5, %9 : vector<16x128xf32>
    %11 = arith.select %7, %5, %10 : vector<16x128xi1>, vector<16x128xf32>
    %12 = arith.truncf %11 : vector<16x128xf32> to vector<16x128xbf16>
    %c0_7 = arith.constant 0 : index
    %c0_8 = arith.constant 0 : index
    %13 = vector.load %arg4[%c0_7, %c0_8] : memref<128x256xbf16, #tpu.memory_space<vmem>>, vector<128x256xbf16>
    %cst_9 = arith.constant dense<0.000000e+00> : vector<16x256xf32>
    %14 = tpu.matmul %12, %13, %cst_9 {dimension_numbers = #tpu.dot_dimension_numbers<[1], [0], [0], [1], [0, 0, 1, 1], [], []>} : vector<16x128xbf16>, vector<128x256xbf16>, vector<16x256xf32> -> vector<16x256xf32>
    %c0_10 = arith.constant 0 : index
    %c0_11 = arith.constant 0 : index
    %15 = vector.load %arg5[%c0_10, %c0_11] : memref<2x256xf32, #tpu.memory_space<vmem>>, vector<1x256xf32>
    %16 = vector.broadcast %15 : vector<1x256xf32> to vector<16x256xf32>
    %17 = arith.addf %14, %16 : vector<16x256xf32>
    %cst_12 = arith.constant 0.000000e+00 : f32
    %18 = vector.broadcast %cst_12 : f32 to vector<16x256xf32>
    %19 = arith.cmpf ogt, %17, %18 : vector<16x256xf32>
    %c1_13 = arith.constant 1 : index
    %c0_14 = arith.constant 0 : index
    %20 = vector.load %arg5[%c1_13, %c0_14] : memref<2x256xf32, #tpu.memory_space<vmem>>, vector<1x256xf32>
    %21 = vector.broadcast %20 : vector<1x256xf32> to vector<16x256xf32>
    %22 = arith.mulf %17, %21 : vector<16x256xf32>
    %23 = arith.select %19, %17, %22 : vector<16x256xi1>, vector<16x256xf32>
    %24 = arith.truncf %23 : vector<16x256xf32> to vector<16x256xbf16>
    %c0_15 = arith.constant 0 : index
    %c0_16 = arith.constant 0 : index
    %25 = vector.load %arg6[%c0_15, %c0_16] : memref<256x6xbf16, #tpu.memory_space<vmem>>, vector<256x6xbf16>
    %cst_17 = arith.constant dense<0.000000e+00> : vector<16x6xf32>
    %26 = tpu.matmul %24, %25, %cst_17 {dimension_numbers = #tpu.dot_dimension_numbers<[1], [0], [0], [1], [0, 0, 1, 1], [], []>} : vector<16x256xbf16>, vector<256x6xbf16>, vector<16x6xf32> -> vector<16x6xf32>
    %c0_18 = arith.constant 0 : index
    %c0_19 = arith.constant 0 : index
    %27 = vector.load %arg7[%c0_18, %c0_19] : memref<1x6xf32, #tpu.memory_space<vmem>>, vector<1x6xf32>
    %28 = vector.broadcast %27 : vector<1x6xf32> to vector<16x6xf32>
    %29 = arith.addf %26, %28 : vector<16x6xf32>
    %30 = tpu.iota {dimensions = array<i32: 1>} : vector<16x6xi32>
    %c2_i32 = arith.constant 2 : i32
    %31 = vector.broadcast %c2_i32 : i32 to vector<16x6xi32>
    %32 = arith.cmpi slt, %30, %31 : vector<16x6xi32>
    %cst_20 = arith.constant 0xFF800000 : f32
    %33 = vector.broadcast %cst_20 : f32 to vector<16x6xf32>
    %34 = arith.select %32, %29, %33 : vector<16x6xi1>, vector<16x6xf32>
    %cst_21 = arith.constant dense<0xFF800000> : vector<16xf32>
    %35 = vector.multi_reduction <maximumf>, %34, %cst_21 [1] : vector<16x6xf32> to vector<16xf32>
    %36 = vector.shape_cast %35 : vector<16xf32> to vector<16x1xf32>
    %37 = vector.broadcast %36 : vector<16x1xf32> to vector<16x6xf32>
    %38 = arith.subf %29, %37 : vector<16x6xf32>
    %39 = math.exp %38 : vector<16x6xf32>
    %cst_22 = arith.constant 0.000000e+00 : f32
    %40 = vector.broadcast %cst_22 : f32 to vector<16x6xf32>
    %41 = arith.select %32, %39, %40 : vector<16x6xi1>, vector<16x6xf32>
    %cst_23 = arith.constant dense<0.000000e+00> : vector<16xf32>
    %42 = vector.multi_reduction <add>, %41, %cst_23 [1] : vector<16x6xf32> to vector<16xf32>
    %43 = vector.shape_cast %42 : vector<16xf32> to vector<16x1xf32>
    %44 = vector.broadcast %43 : vector<16x1xf32> to vector<16x6xf32>
    %45 = arith.divf %41, %44 : vector<16x6xf32>
    %46 = arith.select %32, %45, %29 : vector<16x6xi1>, vector<16x6xf32>
    %c0_24 = arith.constant 0 : index
    %c0_25 = arith.constant 0 : index
    %47 = vector.load %arg8[%c0_24, %c0_25] : memref<16x6xf32, #tpu.memory_space<vmem>>, vector<16x6xf32>
    tpu.vector_store %arg8[%c0_24, %c0_25], %46 {strides = array<i32>} : memref<16x6xf32, #tpu.memory_space<vmem>>, vector<16x6xf32>,
    return
  }
  func.func @transform_0(%arg0: i32) -> (i32, i32) {
    %c0_i32 = arith.constant 0 : i32
    %c0_i32_0 = arith.constant 0 : i32
    return %arg0, %c0_i32 : i32, i32
  }
  func.func @transform_1(%arg0: i32) -> (i32, i32) {
    %c0_i32 = arith.constant 0 : i32
    %c0_i32_0 = arith.constant 0 : i32
    %c0_i32_1 = arith.constant 0 : i32
    return %c0_i32, %c0_i32_0 : i32, i32
  }
  func.func @transform_2(%arg0: i32) -> (i32, i32) {
    %c0_i32 = arith.constant 0 : i32
    %c0_i32_0 = arith.constant 0 : i32
    %c0_i32_1 = arith.constant 0 : i32
    return %c0_i32, %c0_i32_0 : i32, i32
  }
  func.func @transform_3(%arg0: i32) -> (i32, i32) {
    %c0_i32 = arith.constant 0 : i32
    %c0_i32_0 = arith.constant 0 : i32
    %c0_i32_1 = arith.constant 0 : i32
    return %c0_i32, %c0_i32_0 : i32, i32
  }
  func.func @transform_4(%arg0: i32) -> (i32, i32) {
    %c0_i32 = arith.constant 0 : i32
    %c0_i32_0 = arith.constant 0 : i32
    %c0_i32_1 = arith.constant 0 : i32
    return %c0_i32, %c0_i32_0 : i32, i32
  }
  func.func @transform_5(%arg0: i32) -> (i32, i32) {
    %c0_i32 = arith.constant 0 : i32
    %c0_i32_0 = arith.constant 0 : i32
    %c0_i32_1 = arith.constant 0 : i32
    return %c0_i32, %c0_i32_0 : i32, i32
  }
  func.func @transform_6(%arg0: i32) -> (i32, i32) {
    %c0_i32 = arith.constant 0 : i32
    %c0_i32_0 = arith.constant 0 : i32
    %c0_i32_1 = arith.constant 0 : i32
    return %c0_i32, %c0_i32_0 : i32, i32
  }
  func.func @transform_7(%arg0: i32) -> (i32, i32) {
    %c0_i32 = arith.constant 0 : i32
    %c0_i32_0 = arith.constant 0 : i32
    return %arg0, %c0_i32 : i32, i32
  }
}

</mosaic_0001>

<bundles_post_ra>
// kernel: tile.33
= control target key start
LH: loop header
LB: loop body
LE: loop exit
PB: predicated region body
PF: predicated region fallthrough
CT: control target
= control target key end

     0   :  { %s34_s0 = inlined_call_operand.vmem [shape: f32[32], index: 0, kind: input, shape index: {}]   ;;  %s35_s1 = inlined_call_operand.vmem [shape: f32[22,32], index: 1, kind: output, shape index: {}]  }
   0x1   :  { %v4_v0 = vld [vmem:[%s34_s0] ss:$0 sm:$0xff] }
   0x2   :  { %5 = vst [vmem:[%s35_s1] sm:$0xff] %v4_v0  ;;  %10 = vst [vmem:[%s35_s1 + $0x8] sm:$0xff] %v4_v0 }
   0x3   :  { %11 = vst [vmem:[%s35_s1 + $0x10] sm:$0xff] %v4_v0 }

// kernel: tile.38
= control target key start
LH: loop header
LB: loop body
LE: loop exit
PB: predicated region body
PF: predicated region fallthrough
CT: control target
= control target key end

     0   :  { %s86_s8 = smov 96   ;;  %vm3_vm0 = vcmask 261120   ;;  %s88_s15 = smov 64   ;;  %vm10_vm1 = vcmask 1048320   ;;  %vm18_vm2 = vcmask 785920   ;;  %vm26_vm3 = vcmask 523520   ;;  %s129_s0 = inlined_call_operand.vmem [shape: f32[22,32], index: 0, kind: input, shape index: {}]   ;;  %s130_s1 = inlined_call_operand.vmem [shape: f32[1,704], index: 1, kind: output, shape index: {}]  }
   0x1   :  { %v75_v0 = vld [vmem:[%s129_s0 + $0x3] ss:$4 sm:$0x1f]   ;;  %v76_v1 = vld [vmem:[%s129_s0 + $0x2] ss:$4 sm:$0x1f]  }
   0x2   :  { %8 = vrot.lane.b32.xlu0 %v75_v0, %s86_s8  ;;  %v77_v2 = vld [vmem:[%s129_s0 + $0x1] ss:$4 sm:$0x3f]   ;;  %v2_v3 = vld [vmem:[%s129_s0] ss:$4 sm:$0x3f]  }
   0x3   :  { %s87_s0 = smov 32   ;;  %4 = vst.msk [vmem:[#allocation0] ss:$8 sm:$0xf] %vm3_vm0, %v2_v3  }
   0x4   :  { %24 = vrot.lane.b32.xlu1 %v77_v2, %s87_s0  ;;  %5 = vst.msk [vmem:[#allocation0] ss:$8 sm:$0x30] %vm3_vm0, %v2_v3  }
   0x6   :  { %16 = vrot.lane.b32.xlu0 %v76_v1, %s88_s15 }
  0x74   :  { %v9_v4 = vpop.permute.xlu0 %8  }
  0x75   :  { %11 = vst.msk [vmem:[#allocation0] ss:$8 sm:$0xf] %vm10_vm1, %v9_v4   ;;  %13 = vst.msk [vmem:[#allocation0 + $0x1c] sm:$0x10] %vm10_vm1, %v9_v4  }
  0x76   :  { %v25_v5 = vpop.permute.xlu1 %24  }
  0x78   :  { %v17_v6 = vpop.permute.xlu0 %16  }
  0x79   :  { %19 = vst.msk [vmem:[#allocation0] ss:$8 sm:$0xf] %vm18_vm2, %v17_v6   ;;  %21 = vst.msk [vmem:[#allocation0 + $0x1c] sm:$0x10] %vm18_vm2, %v17_v6  }
  0x7a   :  { %27 = vst.msk [vmem:[#allocation0] ss:$8 sm:$0xf] %vm26_vm3, %v25_v5   ;;  %28 = vst.msk [vmem:[#allocation0] ss:$8 sm:$0x30] %vm26_vm3, %v25_v5  }
  0x81   :  { %v33_v7 = vld [vmem:[#allocation0] sm:$0x1]  ;;  %v38_v8 = vld [vmem:[#allocation0 + $0x8] sm:$0x1]  ;;  %v44_v9 = vld [vmem:[#allocation0 + $0x10] sm:$0x1] }
  0x82   :  { %36 = vst [vmem:[%s130_s1] sm:$0x1] %v33_v7  ;;  %78 = vst [vmem:[%s130_s1 + $0x1] sm:$0x1] %v38_v8  ;;  %v51_v10 = vld [vmem:[#allocation0 + $0x18] sm:$0x1] }
  0x83   :  { %79 = vst [vmem:[%s130_s1 + $0x2] sm:$0x1] %v44_v9  ;;  %v58_v11 = vld [vmem:[#allocation0 + $0x20] sm:$0x1]  ;;  %v65_v12 = vld [vmem:[#allocation0 + $0x28] sm:$0x1] }
  0x84   :  { %80 = vst [vmem:[%s130_s1 + $0x3] sm:$0x1] %v51_v10  ;;  %81 = vst [vmem:[%s130_s1 + $0x4] sm:$0x1] %v58_v11 }
  0x85   :  { %82 = vst [vmem:[%s130_s1 + $0x5] sm:$0x1] %v65_v12 }

// kernel: onet_forward.4
= control target key start
LH: loop header
LB: loop body
LE: loop exit
PB: predicated region body
PF: predicated region fallthrough
CT: control target
= control target key end

     0   :  { %vm576_vm0 = vcmask 1043456   ;;  %vm566_vm1 = vcmask 719872   ;;  %s1860_s1 = inlined_call_operand.vmem [shape: bf16[216,704], index: 1, kind: input, shape index: {}]   ;;  %s1861_s0 = inlined_call_operand.vmem [shape: bf16[44,216], index: 0, kind: input, shape index: {}]   ;;  %s1862_s2 = inlined_call_operand.vmem [shape: f32[2,704], index: 2, kind: input, shape index: {}]   ;;  %s1863_s3 = inlined_call_operand.vmem [shape: bf16[44,704], index: 3, kind: output, shape index: {}]  }
   0x1   :  { %v1224_v0 = vld [vmem:[%s1860_s1 + $0x154] ss:$24 sps:$4 sm:$0xff]   ;;  %v1228_v2 = vld [vmem:[%s1860_s1 + $0x150] ss:$24 sps:$4 sm:$0xff]   ;;  %v1230_v4 = vld [vmem:[%s1860_s1 + $0x124] ss:$24 sps:$4 sm:$0xff]  }
   0x2   :  { %v1226_v1 = vld [vmem:[%s1860_s1 + $0x15c] ss:$24 sps:$4 sm:$0xff]   ;;  %595 = vmatprep.subr.bf16.mxu0 %v1224_v0  ;;  %v1229_v3 = vld [vmem:[%s1860_s1 + $0x158] ss:$24 sps:$4 sm:$0xff]   ;;  %v1232_v5 = vld [vmem:[%s1860_s1 + $0x12c] ss:$24 sps:$4 sm:$0xff]  }
   0x3   :  { %658 = vmatprep.subr.bf16.mxu1 %v1226_v1  ;;  %596 = vmatpush1.bf16.msra.mxu0 %v1228_v2  ;;  %v1234_v6 = vld [vmem:[%s1860_s1 + $0x120] ss:$24 sps:$4 sm:$0xff]   ;;  %v1236_v8 = vld [vmem:[%s1860_s1 + $0xf4] ss:$24 sps:$4 sm:$0xff]   ;;  %v1240_v10 = vld [vmem:[%s1860_s1 + $0xf0] ss:$24 sps:$4 sm:$0xff]  }
   0x4   :  { %659 = vmatpush1.bf16.msra.mxu1 %v1229_v3  ;;  %597 = vmatprep.subr.bf16.mxu0 %v1230_v4  ;;  %v1235_v7 = vld [vmem:[%s1860_s1 + $0x128] ss:$24 sps:$4 sm:$0xff]   ;;  %v1238_v9 = vld [vmem:[%s1860_s1 + $0xfc] ss:$24 sps:$4 sm:$0xff]   ;;  %v1241_v11 = vld [vmem:[%s1860_s1 + $0xf8] ss:$24 sps:$4 sm:$0xff]  }
   0x5   :  { %660 = vmatprep.subr.bf16.mxu1 %v1232_v5  ;;  %v1242_v12 = vld [vmem:[%s1860_s1 + $0xc4] ss:$24 sps:$4 sm:$0xff]   ;;  %v1246_v14 = vld [vmem:[%s1860_s1 + $0xc0] ss:$24 sps:$4 sm:$0xff]   ;;  %v1248_v16 = vld [vmem:[%s1860_s1 + $0x94] ss:$24 sps:$4 sm:$0xff]  }
   0x6   :  { %v1244_v13 = vld [vmem:[%s1860_s1 + $0xcc] ss:$24 sps:$4 sm:$0xff]   ;;  %v1247_v15 = vld [vmem:[%s1860_s1 + $0xc8] ss:$24 sps:$4 sm:$0xff]   ;;  %v1250_v17 = vld [vmem:[%s1860_s1 + $0x9c] ss:$24 sps:$4 sm:$0xff]  }
   0x7   :  { %598 = vmatpush1.bf16.msra.mxu0 %v1234_v6  ;;  %v1252_v18 = vld [vmem:[%s1860_s1 + $0x90] ss:$24 sps:$4 sm:$0xff]   ;;  %v1254_v20 = vld [vmem:[%s1860_s1 + $0x64] ss:$24 sps:$4 sm:$0xff]   ;;  %v1258_v22 = vld [vmem:[%s1860_s1 + $0x60] ss:$24 sps:$4 sm:$0xff]  }
   0x8   :  { %661 = vmatpush1.bf16.msra.mxu1 %v1235_v7  ;;  %599 = vmatprep.subr.bf16.mxu0 %v1236_v8  ;;  %v1253_v19 = vld [vmem:[%s1860_s1 + $0x98] ss:$24 sps:$4 sm:$0xff]   ;;  %v1256_v21 = vld [vmem:[%s1860_s1 + $0x6c] ss:$24 sps:$4 sm:$0xff]   ;;  %v1259_v23 = vld [vmem:[%s1860_s1 + $0x68] ss:$24 sps:$4 sm:$0xff]  }
   0x9   :  { %662 = vmatprep.subr.bf16.mxu1 %v1238_v9  ;;  %v1260_v24 = vld [vmem:[%s1860_s1 + $0x34] ss:$24 sps:$4 sm:$0xff]   ;;  %v1264_v26 = vld [vmem:[%s1860_s1 + $0x30] ss:$24 sps:$4 sm:$0xff]   ;;  %v1266_v28 = vld [vmem:[%s1860_s1 + $0x4] ss:$24 sps:$4 sm:$0xff]  }
   0xa   :  { %v1262_v25 = vld [vmem:[%s1860_s1 + $0x3c] ss:$24 sps:$4 sm:$0xff]   ;;  %v1265_v27 = vld [vmem:[%s1860_s1 + $0x38] ss:$24 sps:$4 sm:$0xff]   ;;  %v1268_v29 = vld [vmem:[%s1860_s1 + $0xc] ss:$24 sps:$4 sm:$0xff]  }
   0xb   :  { %600 = vmatpush1.bf16.msra.mxu0 %v1240_v10  ;;  %v99_v30 = vld [vmem:[%s1860_s1 + $0x270] sm:$0xff]  ;;  %v100_v31 = vld [vmem:[%s1860_s1 + $0x278] sm:$0xff]  ;;  %v1271_v33 = vld [vmem:[%s1860_s1 + $0x8] ss:$24 sps:$4 sm:$0xff]  }
   0xc   :  { %663 = vmatpush1.bf16.msra.mxu1 %v1241_v11  ;;  %601 = vmatprep.subr.bf16.mxu0 %v1242_v12  ;;  %v1270_v32 = vld [vmem:[%s1860_s1] ss:$24 sps:$4 sm:$0xff]   ;;  %v1142_v34 = vcombine.high %v99_v30, %v99_v30  ;;  %v1144_v35 = vcombine.high %v100_v31, %v100_v31  ;;  %v1141_v36 = vcombine.low %v99_v30, %v99_v30  ;;  %v1276_v38 = vld [vmem:[%s1860_s1 + $0x244] ss:$24 sps:$4 sm:$0xff]   ;;  %v1282_v44 = vld [vmem:[%s1860_s1 + $0x214] ss:$24 sps:$4 sm:$0xff]  }
   0xd   :  { %664 = vmatprep.subr.bf16.mxu1 %v1244_v13  ;;  %v1143_v37 = vcombine.low %v100_v31, %v100_v31  ;;  %v1278_v41 = vld [vmem:[%s1860_s1 + $0x24c] ss:$24 sps:$4 sm:$0xff]   ;;  %v1280_v42 = vld [vmem:[%s1860_s1 + $0x240] ss:$24 sps:$4 sm:$0xff]   ;;  %v1284_v46 = vld [vmem:[%s1860_s1 + $0x21c] ss:$24 sps:$4 sm:$0xff]  }
   0xe   :  { %v578_v39 = vsel %vm576_vm0, %v1141_v36, 0  ;;  %v1281_v43 = vld [vmem:[%s1860_s1 + $0x248] ss:$24 sps:$4 sm:$0xff]   ;;  %v1500_v45 = vld [vmem:[%s1861_s0 + $0x4] ss:$8 sps:$4 sm:$0xff]  }
   0xf   :  { %602 = vmatpush1.bf16.msra.mxu0 %v1246_v14  ;;  %v584_v40 = vsel %vm576_vm0, %v1143_v37, 0  ;;  %1152 = vmatprep.mubr.msk.bf16.mxu1 %vm566_vm1, %v1500_v45  ;;  %v1286_v47 = vld [vmem:[%s1860_s1 + $0x210] ss:$24 sps:$4 sm:$0xff]   ;;  %v1288_v49 = vld [vmem:[%s1860_s1 + $0x1e4] ss:$24 sps:$4 sm:$0xff]  }
  0x10   :  { %665 = vmatpush1.bf16.msra.mxu1 %v1247_v15  ;;  %603 = vmatprep.subr.bf16.mxu0 %v1248_v16  ;;  %v1287_v48 = vld [vmem:[%s1860_s1 + $0x218] ss:$24 sps:$4 sm:$0xff]   ;;  %v1290_v50 = vld [vmem:[%s1860_s1 + $0x1ec] ss:$24 sps:$4 sm:$0xff]   ;;  %v1293_v52 = vld [vmem:[%s1860_s1 + $0x1e8] ss:$24 sps:$4 sm:$0xff]  }
  0x11   :  { %666 = vmatprep.subr.bf16.mxu1 %v1250_v17  ;;  %1148 = vmatprep.mubr.msk.bf16.mxu0 %vm566_vm1, %v1500_v45  ;;  %v1292_v51 = vld [vmem:[%s1860_s1 + $0x1e0] ss:$24 sps:$4 sm:$0xff]   ;;  %v1294_v53 = vld [vmem:[%s1860_s1 + $0x1b4] ss:$24 sps:$4 sm:$0xff]   ;;  %v1298_v55 = vld [vmem:[%s1860_s1 + $0x1b0] ss:$24 sps:$4 sm:$0xff]  }
  0x12   :  { %v1296_v54 = vld [vmem:[%s1860_s1 + $0x1bc] ss:$24 sps:$4 sm:$0xff]   ;;  %v1299_v56 = vld [vmem:[%s1860_s1 + $0x1b8] ss:$24 sps:$4 sm:$0xff]   ;;  %v1302_v58 = vld [vmem:[%s1860_s1 + $0x18c] ss:$24 sps:$4 sm:$0xff]  }
  0x13   :  { %604 = vmatpush1.bf16.msra.mxu0 %v1252_v18  ;;  %v1300_v57 = vld [vmem:[%s1860_s1 + $0x184] ss:$24 sps:$4 sm:$0xff]   ;;  %v1304_v59 = vld [vmem:[%s1860_s1 + $0x180] ss:$24 sps:$4 sm:$0xff]   ;;  %v1314_v0 = vld [vmem:[%s1860_s1 + $0x134] ss:$24 sps:$4 sm:$0xff]  }
  0x14   :  { %667 = vmatpush1.bf16.msra.mxu1 %v1253_v19  ;;  %605 = vmatprep.subr.bf16.mxu0 %v1254_v20  ;;  %v1305_v60 = vld [vmem:[%s1860_s1 + $0x188] ss:$24 sps:$4 sm:$0xff]   ;;  %v1311_v61 = vld [vmem:[%s1860_s1 + $0x164] ss:$24 sps:$4 sm:$0xff]   ;;  %v1581_v4 = vld [vmem:[%s1861_s0 + $0x10] ss:$8 sps:$4 sm:$0xff]  }
  0x15   :  { %668 = vmatprep.subr.bf16.mxu1 %v1256_v21  ;;  %v1557_v62 = vld [vmem:[%s1861_s0] ss:$8 sps:$4 sm:$0xff]   ;;  %v1333_v1 = vld [vmem:[%s1861_s0 + $0x14] ss:$8 sps:$4 sm:$0xff]   ;;  %v1592_v7 = vld [vmem:[%s1861_s0 + $0x24] ss:$8 sps:$4 sm:$0xff]  }
  0x16   :  { %v1309_v63 = vld [vmem:[%s1860_s1 + $0x160] ss:$24 sps:$4 sm:$0xff]   ;;  %v1312_v2 = vld [vmem:[%s1860_s1 + $0x130] ss:$24 sps:$4 sm:$0xff]   ;;  %v1317_v3 = vld [vmem:[%s1860_s1 + $0x104] ss:$24 sps:$4 sm:$0xff]  }
  0x17   :  { %606 = vmatpush1.bf16.msra.mxu0 %v1258_v22  ;;  %v1315_v5 = vld [vmem:[%s1860_s1 + $0x100] ss:$24 sps:$4 sm:$0xff]   ;;  %v1320_v6 = vld [vmem:[%s1860_s1 + $0xd4] ss:$24 sps:$4 sm:$0xff]   ;;  %v1318_v8 = vld [vmem:[%s1860_s1 + $0xd0] ss:$24 sps:$4 sm:$0xff]  }
  0x18   :  { %669 = vmatpush1.bf16.msra.mxu1 %v1259_v23  ;;  %607 = vmatprep.subr.bf16.mxu0 %v1260_v24  ;;  %v1323_v9 = vld [vmem:[%s1860_s1 + $0xa4] ss:$24 sps:$4 sm:$0xff]   ;;  %v1609_v10 = vld [vmem:[%s1861_s0 + $0x20] ss:$8 sps:$4 sm:$0xff]   ;;  %v1326_v12 = vld [vmem:[%s1860_s1 + $0x74] ss:$24 sps:$4 sm:$0xff]  }
  0x19   :  { %670 = vmatprep.subr.bf16.mxu1 %v1262_v25  ;;  %v1321_v11 = vld [vmem:[%s1860_s1 + $0xa0] ss:$24 sps:$4 sm:$0xff]   ;;  %v1324_v13 = vld [vmem:[%s1860_s1 + $0x70] ss:$24 sps:$4 sm:$0xff]   ;;  %v1329_v14 = vld [vmem:[%s1860_s1 + $0x44] ss:$24 sps:$4 sm:$0xff]  }
  0x1a   :  { %v1327_v15 = vld [vmem:[%s1860_s1 + $0x40] ss:$24 sps:$4 sm:$0xff]   ;;  %v1332_v16 = vld [vmem:[%s1860_s1 + $0x14] ss:$24 sps:$4 sm:$0xff]   ;;  %v1330_v18 = vld [vmem:[%s1860_s1 + $0x10] ss:$24 sps:$4 sm:$0xff]  }
  0x1b   :  { %608 = vmatpush1.bf16.msra.mxu0 %v1264_v26  ;;  %v101_v17 = vld [vmem:[%s1860_s1 + $0x280] sm:$0xff]  ;;  %v1340_v22 = vld [vmem:[%s1860_s1 + $0x254] ss:$24 sps:$4 sm:$0xff]   ;;  %v1338_v23 = vld [vmem:[%s1860_s1 + $0x250] ss:$24 sps:$4 sm:$0xff]  }
  0x1c   :  { %671 = vmatpush1.bf16.msra.mxu1 %v1265_v27  ;;  %609 = vmatprep.subr.bf16.mxu0 %v1266_v28  ;;  %v1146_v19 = vcombine.high %v101_v17, %v101_v17  ;;  %v1145_v20 = vcombine.low %v101_v17, %v101_v17  ;;  %v1346_v24 = vld [vmem:[%s1860_s1 + $0x224] ss:$24 sps:$4 sm:$0xff]   ;;  %v1344_v25 = vld [vmem:[%s1860_s1 + $0x220] ss:$24 sps:$4 sm:$0xff]   ;;  %v1349_v26 = vld [vmem:[%s1860_s1 + $0x1f4] ss:$24 sps:$4 sm:$0xff]  }
  0x1d   :  { %672 = vmatprep.subr.bf16.mxu1 %v1268_v29  ;;  %v1347_v27 = vld [vmem:[%s1860_s1 + $0x1f0] ss:$24 sps:$4 sm:$0xff]   ;;  %v1352_v28 = vld [vmem:[%s1860_s1 + $0x1c4] ss:$24 sps:$4 sm:$0xff]   ;;  %v1350_v29 = vld [vmem:[%s1860_s1 + $0x1c0] ss:$24 sps:$4 sm:$0xff]  }
  0x1e   :  { %v590_v21 = vsel %vm576_vm0, %v1145_v20, 0  ;;  %v1355_v30 = vld [vmem:[%s1860_s1 + $0x194] ss:$24 sps:$4 sm:$0xff]   ;;  %v1353_v31 = vld [vmem:[%s1860_s1 + $0x190] ss:$24 sps:$4 sm:$0xff]  }
  0x1f   :  { %610 = vmatpush1.bf16.msra.mxu0 %v1270_v32  ;;  %v104_v32 = vlaneseq  ;;  %v1685_v36 = vld [vmem:[%s1862_s2] ss:$2 sm:$0x3f]  ;;  %v1690_v37 = vld [vmem:[%s1862_s2 + $0x1] ss:$2 sm:$0x3f] }
  0x20   :  { %673 = vmatpush1.bf16.msra.mxu1 %v1271_v33  ;;  %1147 = vmatprep.subr.msk.bf16.mxu0 %vm576_vm0, %v1142_v34 }
  0x21   :  { %1151 = vmatprep.subr.msk.bf16.mxu1 %vm576_vm0, %v1144_v35  ;;  %v1678_v33 = vshrl.u32 %v104_v32, 7 }
  0x23   :  { %616 = vmatpush2.bf16.msra.mxu0 %v578_v39  ;;  %v114_v34 = vsub.s32 2, %v1678_v33  ;;  %v106_v35 = vsub.s32 0, %v1678_v33  ;;  %v110_v39 = vsub.s32 1, %v1678_v33 }
  0x24   :  { %679 = vmatpush2.bf16.msra.mxu1 %v584_v40  ;;  %617 = vmatprep.subr.bf16.mxu0 %v1276_v38  ;;  %v118_v38 = vsub.s32 3, %v1678_v33 }
  0x25   :  { %680 = vmatprep.subr.bf16.mxu1 %v1278_v41  ;;  %v1695_v40 = vrot.slane %v1685_v36, %v114_v34  ;;  %v1698_v41 = vrot.slane %v1685_v36, %v106_v35 }
  0x27   :  { %618 = vmatpush2.bf16.msra.mxu0 %v1280_v42  ;;  %v1701_v42 = vrot.slane %v1690_v37, %v114_v34 }
  0x28   :  { %681 = vmatpush2.bf16.msra.mxu1 %v1281_v43  ;;  %619 = vmatprep.subr.bf16.mxu0 %v1282_v44  ;;  %v1704_v43 = vrot.slane %v1690_v37, %v106_v35 }
  0x29   :  { %682 = vmatprep.subr.bf16.mxu1 %v1284_v46  ;;  %v1707_v46 = vrot.slane %v1685_v36, %v118_v38 }
  0x2b   :  { %620 = vmatpush2.bf16.msra.mxu0 %v1286_v47  ;;  %v1710_v47 = vrot.slane %v1685_v36, %v110_v39 }
  0x2c   :  { %683 = vmatpush2.bf16.msra.mxu1 %v1287_v48  ;;  %621 = vmatprep.subr.bf16.mxu0 %v1288_v49 }
  0x2d   :  { %684 = vmatprep.subr.bf16.mxu1 %v1290_v50 }
  0x2f   :  { %622 = vmatpush2.bf16.msra.mxu0 %v1292_v51  ;;  %v1715_v51 = vrot.slane %v1690_v37, %v118_v38 }
  0x30   :  { %685 = vmatpush2.bf16.msra.mxu1 %v1293_v52  ;;  %623 = vmatprep.subr.bf16.mxu0 %v1294_v53  ;;  %v1718_v53 = vrot.slane %v1690_v37, %v110_v39 }
  0x31   :  { %686 = vmatprep.subr.bf16.mxu1 %v1296_v54 }
  0x33   :  { %624 = vmatpush2.bf16.msra.mxu0 %v1298_v55 }
  0x34   :  { %687 = vmatpush2.bf16.msra.mxu1 %v1299_v56  ;;  %625 = vmatprep.subr.bf16.mxu0 %v1300_v57 }
  0x35   :  { %688 = vmatprep.subr.bf16.mxu1 %v1302_v58 }
  0x37   :  { %626 = vmatpush2.bf16.msra.mxu0 %v1304_v59 }
  0x38   :  { %689 = vmatpush2.bf16.msra.mxu1 %v1305_v60  ;;  %721 = vmatprep.subr.bf16.mxu0 %v1311_v61 }
  0x39   :  { %1196 = vmatprep.subr.bf16.mxu1 %v1311_v61 }
  0x3a   :  { %628 = vmatmul.mubr.bf16.vlgmr.msra.gmra.mxu0 %v1557_v62 }
  0x3b   :  { %691 = vmatmul.mubr.bf16.vlgmr.msra.gmra.mxu1 %v1557_v62  ;;  %722 = vmatpush1.bf16.msra.mxu0 %v1309_v63 }
  0x3c   :  { %1210 = vmatpush1.bf16.msra.mxu1 %v1309_v63  ;;  %723 = vmatprep.subr.bf16.mxu0 %v1314_v0 }
  0x3d   :  { %1197 = vmatprep.subr.bf16.mxu1 %v1314_v0  ;;  %1153 = vmatprep.mubr.msk.bf16.mxu1 %vm566_vm1, %v1333_v1 }
  0x3e   :  { %1149 = vmatprep.mubr.msk.bf16.mxu0 %vm566_vm1, %v1333_v1 }
  0x3f   :  { %724 = vmatpush1.bf16.msra.mxu0 %v1312_v2 }
  0x40   :  { %1211 = vmatpush1.bf16.msra.mxu1 %v1312_v2  ;;  %725 = vmatprep.subr.bf16.mxu0 %v1317_v3 }
  0x41   :  { %1198 = vmatprep.subr.bf16.mxu1 %v1317_v3 }
  0x42   :  { %638 = vmatmul.mubr.bf16.gmra.mxu0 %v1581_v4 }
  0x43   :  { %701 = vmatmul.mubr.bf16.gmra.mxu1 %v1581_v4  ;;  %726 = vmatpush1.bf16.msra.mxu0 %v1315_v5 }
  0x44   :  { %1212 = vmatpush1.bf16.msra.mxu1 %v1315_v5  ;;  %727 = vmatprep.subr.bf16.mxu0 %v1320_v6 }
  0x45   :  { %1199 = vmatprep.subr.bf16.mxu1 %v1320_v6  ;;  %1154 = vmatprep.mubr.msk.bf16.mxu1 %vm566_vm1, %v1592_v7 }
  0x46   :  { %1150 = vmatprep.mubr.msk.bf16.mxu0 %vm566_vm1, %v1592_v7 }
  0x47   :  { %728 = vmatpush1.bf16.msra.mxu0 %v1318_v8 }
  0x48   :  { %1213 = vmatpush1.bf16.msra.mxu1 %v1318_v8  ;;  %729 = vmatprep.subr.bf16.mxu0 %v1323_v9 }
  0x49   :  { %1200 = vmatprep.subr.bf16.mxu1 %v1323_v9 }
  0x4a   :  { %648 = vmatmul.mubr.bf16.gmra.mxu0 %v1609_v10 }
  0x4b   :  { %711 = vmatmul.mubr.bf16.gmra.mxu1 %v1609_v10  ;;  %730 = vmatpush1.bf16.msra.mxu0 %v1321_v11 }
  0x4c   :  { %1214 = vmatpush1.bf16.msra.mxu1 %v1321_v11  ;;  %731 = vmatprep.subr.bf16.mxu0 %v1326_v12 }
  0x4d   :  { %1201 = vmatprep.subr.bf16.mxu1 %v1326_v12  ;;  %1156 = vmatprep.mubr.msk.bf16.mxu0 %vm566_vm1, %v1500_v45 }
  0x4e   :  { %1157 = vmatprep.mubr.msk.bf16.mxu1 %vm566_vm1, %v1333_v1 }
  0x4f   :  { %732 = vmatpush1.bf16.msra.mxu0 %v1324_v13 }
  0x50   :  { %1215 = vmatpush1.bf16.msra.mxu1 %v1324_v13  ;;  %733 = vmatprep.subr.bf16.mxu0 %v1329_v14 }
  0x51   :  { %1202 = vmatprep.subr.bf16.mxu1 %v1329_v14 }
  0x53   :  { %734 = vmatpush1.bf16.msra.mxu0 %v1327_v15 }
  0x54   :  { %1216 = vmatpush1.bf16.msra.mxu1 %v1327_v15  ;;  %735 = vmatprep.subr.bf16.mxu0 %v1332_v16 }
  0x55   :  { %1203 = vmatprep.subr.bf16.mxu1 %v1332_v16 }
  0x57   :  { %736 = vmatpush1.bf16.msra.mxu0 %v1330_v18 }
  0x58   :  { %1217 = vmatpush1.bf16.msra.mxu1 %v1330_v18  ;;  %1155 = vmatprep.subr.msk.bf16.mxu0 %vm576_vm0, %v1146_v19 }
  0x59   :  { %1204 = vmatprep.subr.msk.bf16.mxu1 %vm576_vm0, %v1146_v19 }
  0x5b   :  { %742 = vmatpush2.bf16.msra.mxu0 %v590_v21 }
  0x5c   :  { %1218 = vmatpush2.bf16.msra.mxu1 %v590_v21  ;;  %743 = vmatprep.subr.bf16.mxu0 %v1340_v22 }
  0x5d   :  { %1205 = vmatprep.subr.bf16.mxu1 %v1340_v22 }
  0x5f   :  { %744 = vmatpush2.bf16.msra.mxu0 %v1338_v23 }
  0x60   :  { %1219 = vmatpush2.bf16.msra.mxu1 %v1338_v23  ;;  %745 = vmatprep.subr.bf16.mxu0 %v1346_v24 }
  0x61   :  { %1206 = vmatprep.subr.bf16.mxu1 %v1346_v24 }
  0x63   :  { %746 = vmatpush2.bf16.msra.mxu0 %v1344_v25 }
  0x64   :  { %1220 = vmatpush2.bf16.msra.mxu1 %v1344_v25  ;;  %747 = vmatprep.subr.bf16.mxu0 %v1349_v26 }
  0x65   :  { %1207 = vmatprep.subr.bf16.mxu1 %v1349_v26 }
  0x67   :  { %748 = vmatpush2.bf16.msra.mxu0 %v1347_v27 }
  0x68   :  { %1221 = vmatpush2.bf16.msra.mxu1 %v1347_v27  ;;  %749 = vmatprep.subr.bf16.mxu0 %v1352_v28 }
  0x69   :  { %1208 = vmatprep.subr.bf16.mxu1 %v1352_v28 }
  0x6b   :  { %750 = vmatpush2.bf16.msra.mxu0 %v1350_v29 }
  0x6c   :  { %1222 = vmatpush2.bf16.msra.mxu1 %v1350_v29  ;;  %751 = vmatprep.subr.bf16.mxu0 %v1355_v30 }
  0x6d   :  { %1209 = vmatprep.subr.bf16.mxu1 %v1355_v30 }
  0x6f   :  { %752 = vmatpush2.bf16.msra.mxu0 %v1353_v31 }
  0x70   :  { %1223 = vmatpush2.bf16.msra.mxu1 %v1353_v31 }
  0x72   :  { %754 = vmatmul.mubr.bf16.vlgmr.msra.gmra.mxu0 %v1557_v62 }
  0x73   :  { %764 = vmatmul.mubr.bf16.vlgmr.msra.gmra.mxu1 %v1581_v4 }
  0x74   :  { %1158 = vmatprep.mubr.msk.bf16.mxu1 %vm566_vm1, %v1592_v7 }
  0x7b   :  { %774 = vmatmul.mubr.bf16.gmra.mxu1 %v1609_v10 }
  0xfa   :  { %v629_v45 = vpop.f32.mrf.mxu0 }
  0xfb   :  { %v692_v44 = vpop.f32.mrf.mxu1  ;;  %v630_v49 = vadd.f32 %v629_v45, %v1698_v41 }
  0xfc   :  { %v693_v48 = vadd.f32 %v692_v44, %v1695_v40  ;;  %v631_v52 = vpop.f32.mrf.mxu0 }
  0xfd   :  { %v694_v50 = vpop.f32.mrf.mxu1  ;;  %vm784_vm2 = vcmp.gt.f32.partialorder %v630_v49, 0.0  ;;  %v853_v55 = vmul.f32 %v1704_v43, %v630_v49  ;;  %v632_v57 = vadd.f32 %v631_v52, %v1710_v47 }
  0xfe   :  { %v855_v54 = vmul.f32 %v1701_v42, %v693_v48  ;;  %vm786_vm3 = vcmp.gt.f32.partialorder %v693_v48, 0.0  ;;  %v695_v56 = vadd.f32 %v694_v50, %v1707_v46  ;;  %v633_v59 = vpop.f32.mrf.mxu0 }
  0xff   :  { %v696_v58 = vpop.f32.mrf.mxu1  ;;  %v889_v60 = vsel %vm784_vm2, %v630_v49, %v853_v55  ;;  %v634_v62 = vadd.f32 %v633_v59, %v1698_v41  ;;  %vm785_vm5 = vcmp.gt.f32.partialorder %v632_v57, 0.0  ;;  %v854_v0 = vmul.f32 %v1718_v53, %v632_v57 }
 0x100   :  { %v697_v61 = vadd.f32 %v696_v58, %v1695_v40  ;;  %vm787_vm4 = vcmp.gt.f32.partialorder %v695_v56, 0.0  ;;  %v856_v63 = vmul.f32 %v1715_v51, %v695_v56  ;;  %v635_v2 = vpop.f32.mrf.mxu0  ;;  %v891_v3 = vsel %vm786_vm3, %v693_v48, %v855_v54 }
 0x101   :  { %v698_v1 = vpop.f32.mrf.mxu1  ;;  %vm790_vm6 = vcmp.gt.f32.partialorder %v634_v62, 0.0  ;;  %v859_v5 = vmul.f32 %v1704_v43, %v634_v62  ;;  %v890_v7 = vsel %vm785_vm5, %v632_v57, %v854_v0  ;;  %v636_v9 = vadd.f32 %v635_v2, %v1710_v47 }
 0x102   :  { %v861_v4 = vmul.f32 %v1701_v42, %v697_v61  ;;  %v892_v6 = vsel %vm787_vm4, %v695_v56, %v856_v63  ;;  %v699_v8 = vadd.f32 %v698_v1, %v1707_v46  ;;  %v639_v11 = vpop.f32.mrf.mxu0  ;;  %v1178_v13 = vpack.c.bf16 %v890_v7, %v889_v60 }
 0x103   :  { %v702_v10 = vpop.f32.mrf.mxu1  ;;  %v1179_v12 = vpack.c.bf16 %v892_v6, %v891_v3  ;;  %vm792_vm7 = vcmp.gt.f32.partialorder %v697_v61, 0.0  ;;  %v895_v14 = vsel %vm790_vm6, %v634_v62, %v859_v5  ;;  %vm791_vm9 = vcmp.gt.f32.partialorder %v636_v9, 0.0 }
 0x104   :  { %vm793_vm8 = vcmp.gt.f32.partialorder %v699_v8, 0.0  ;;  %v862_v15 = vmul.f32 %v1715_v51, %v699_v8  ;;  %v860_v16 = vmul.f32 %v1718_v53, %v636_v9  ;;  %v641_v18 = vpop.f32.mrf.mxu0  ;;  %1033 = vst [vmem:[%s1863_s3] sm:$0xff] %v1178_v13  ;;  %v703_v19 = vadd.f32 %v702_v10, %v1695_v40 }
 0x105   :  { %v704_v17 = vpop.f32.mrf.mxu1  ;;  %1034 = vst [vmem:[%s1863_s3 + $0x8] sm:$0xff] %v1179_v12  ;;  %v640_v21 = vadd.f32 %v639_v11, %v1698_v41  ;;  %v642_v22 = vadd.f32 %v641_v18, %v1710_v47  ;;  %v897_v23 = vsel %vm792_vm7, %v697_v61, %v861_v4 }
 0x106   :  { %v705_v20 = vadd.f32 %v704_v17, %v1707_v46  ;;  %v898_v24 = vsel %vm793_vm8, %v699_v8, %v862_v15  ;;  %v896_v25 = vsel %vm791_vm9, %v636_v9, %v860_v16  ;;  %v643_v27 = vpop.f32.mrf.mxu0  ;;  %vm798_vm10 = vcmp.gt.f32.partialorder %v703_v19, 0.0 }
 0x107   :  { %v706_v26 = vpop.f32.mrf.mxu1  ;;  %v1182_v28 = vpack.c.bf16 %v898_v24, %v897_v23  ;;  %v1181_v29 = vpack.c.bf16 %v896_v25, %v895_v14  ;;  %v867_v30 = vmul.f32 %v1701_v42, %v703_v19  ;;  %vm796_vm12 = vcmp.gt.f32.partialorder %v640_v21, 0.0 }
 0x108   :  { %vm799_vm11 = vcmp.gt.f32.partialorder %v705_v20, 0.0  ;;  %v868_v31 = vmul.f32 %v1715_v51, %v705_v20  ;;  %v707_v32 = vadd.f32 %v706_v26, %v1695_v40  ;;  %v645_v35 = vpop.f32.mrf.mxu0  ;;  %v865_v44 = vmul.f32 %v1704_v43, %v640_v21 }
 0x109   :  { %v708_v34 = vpop.f32.mrf.mxu1  ;;  %1039 = vst [vmem:[%s1863_s3 + $0x20] sm:$0xff] %v1182_v28  ;;  %1038 = vst [vmem:[%s1863_s3 + $0x18] sm:$0xff] %v1181_v29  ;;  %v903_v38 = vsel %vm798_vm10, %v703_v19, %v867_v30  ;;  %vm797_vm13 = vcmp.gt.f32.partialorder %v642_v22, 0.0  ;;  %v866_v50 = vmul.f32 %v1718_v53, %v642_v22  ;;  %v644_v61 = vadd.f32 %v643_v27, %v1698_v41 }
 0x10a   :  { %v709_v39 = vadd.f32 %v708_v34, %v1707_v46  ;;  %v904_v45 = vsel %vm799_vm11, %v705_v20, %v868_v31  ;;  %vm804_vm14 = vcmp.gt.f32.partialorder %v707_v32, 0.0  ;;  %v873_v48 = vmul.f32 %v1701_v42, %v707_v32  ;;  %v649_v52 = vpop.f32.mrf.mxu0 }
 0x10b   :  { %v712_v49 = vpop.f32.mrf.mxu1  ;;  %v1185_v54 = vpack.c.bf16 %v904_v45, %v903_v38  ;;  %v901_v56 = vsel %vm796_vm12, %v640_v21, %v865_v44  ;;  %v902_v59 = vsel %vm797_vm13, %v642_v22, %v866_v50  ;;  %v646_v2 = vadd.f32 %v645_v35, %v1710_v47 }
 0x10c   :  { %vm805_vm15 = vcmp.gt.f32.partialorder %v709_v39, 0.0  ;;  %v874_v55 = vmul.f32 %v1715_v51, %v709_v39  ;;  %v909_v57 = vsel %vm804_vm14, %v707_v32, %v873_v48  ;;  %v713_v58 = vadd.f32 %v712_v49, %v1695_v40  ;;  %v651_v62 = vpop.f32.mrf.mxu0 }
 0x10d   :  { %v714_v60 = vpop.f32.mrf.mxu1  ;;  %1042 = vst [vmem:[%s1863_s3 + $0x38] sm:$0xff] %v1185_v54  ;;  %v1184_v0 = vpack.c.bf16 %v902_v59, %v901_v56  ;;  %vm802_vm2 = vcmp.gt.f32.partialorder %v644_v61, 0.0  ;;  %v871_v8 = vmul.f32 %v1704_v43, %v644_v61  ;;  %vm803_vm4 = vcmp.gt.f32.partialorder %v646_v2, 0.0 }
 0x10e   :  { %v910_v63 = vsel %vm805_vm15, %v709_v39, %v874_v55  ;;  %v715_v1 = vadd.f32 %v714_v60, %v1707_v46  ;;  %vm810_vm1 = vcmp.gt.f32.partialorder %v713_v58, 0.0  ;;  %v879_v4 = vmul.f32 %v1701_v42, %v713_v58  ;;  %v653_v6 = vpop.f32.mrf.mxu0 }
 0x10f   :  { %v1188_v3 = vpack.c.bf16 %v910_v63, %v909_v57  ;;  %v716_v5 = vpop.f32.mrf.mxu1  ;;  %1041 = vst [vmem:[%s1863_s3 + $0x30] sm:$0xff] %v1184_v0  ;;  %v872_v11 = vmul.f32 %v1718_v53, %v646_v2  ;;  %v650_v13 = vadd.f32 %v649_v52, %v1698_v41  ;;  %v907_v15 = vsel %vm802_vm2, %v644_v61, %v871_v8 }
 0x110   :  { %vm811_vm3 = vcmp.gt.f32.partialorder %v715_v1, 0.0  ;;  %v880_v7 = vmul.f32 %v1715_v51, %v715_v1  ;;  %v717_v9 = vadd.f32 %v716_v5, %v1695_v40  ;;  %v915_v10 = vsel %vm810_vm1, %v713_v58, %v879_v4  ;;  %v655_v17 = vpop.f32.mrf.mxu0 }
 0x111   :  { %1045 = vst [vmem:[%s1863_s3 + $0x50] sm:$0xff] %v1188_v3  ;;  %v718_v12 = vpop.f32.mrf.mxu1  ;;  %v908_v19 = vsel %vm803_vm4, %v646_v2, %v872_v11  ;;  %vm808_vm6 = vcmp.gt.f32.partialorder %v650_v13, 0.0  ;;  %v877_v22 = vmul.f32 %v1704_v43, %v650_v13  ;;  %v652_v23 = vadd.f32 %v651_v62, %v1710_v47 }
 0x112   :  { %v916_v14 = vsel %vm811_vm3, %v715_v1, %v880_v7  ;;  %vm816_vm5 = vcmp.gt.f32.partialorder %v717_v9, 0.0  ;;  %v885_v16 = vmul.f32 %v1701_v42, %v717_v9  ;;  %v719_v40 = vadd.f32 %v718_v12, %v1707_v46 }
 0x113   :  { %v1191_v18 = vpack.c.bf16 %v916_v14, %v915_v10  ;;  %v1187_v21 = vpack.c.bf16 %v908_v19, %v907_v15  ;;  %v654_v42 = vadd.f32 %v653_v6, %v1698_v41  ;;  %v656_v25 = vadd.f32 %v655_v17, %v1710_v47 }
 0x114   :  { %v921_v20 = vsel %vm816_vm5, %v717_v9, %v885_v16  ;;  %vm817_vm7 = vcmp.gt.f32.partialorder %v719_v40, 0.0  ;;  %v886_v24 = vmul.f32 %v1715_v51, %v719_v40  ;;  %v913_v46 = vsel %vm808_vm6, %v650_v13, %v877_v22 }
 0x115   :  { %1048 = vst [vmem:[%s1863_s3 + $0x68] sm:$0xff] %v1191_v18  ;;  %1044 = vst [vmem:[%s1863_s3 + $0x48] sm:$0xff] %v1187_v21  ;;  %vm809_vm8 = vcmp.gt.f32.partialorder %v652_v23, 0.0  ;;  %v878_v26 = vmul.f32 %v1718_v53, %v652_v23  ;;  %vm814_vm9 = vcmp.gt.f32.partialorder %v654_v42, 0.0  ;;  %v883_v28 = vmul.f32 %v1704_v43, %v654_v42 }
 0x116   :  { %v922_v27 = vsel %vm817_vm7, %v719_v40, %v886_v24  ;;  %vm815_vm10 = vcmp.gt.f32.partialorder %v656_v25, 0.0  ;;  %v884_v51 = vmul.f32 %v1718_v53, %v656_v25  ;;  %v122_v43 = vsub.s32 4, %v1678_v33 }
 0x117   :  { %v1194_v29 = vpack.c.bf16 %v922_v27, %v921_v20  ;;  %v914_v30 = vsel %vm809_vm8, %v652_v23, %v878_v26  ;;  %v919_v31 = vsel %vm814_vm9, %v654_v42, %v883_v28  ;;  %v126_v53 = vsub.s32 5, %v1678_v33 }
 0x118   :  { %v1190_v41 = vpack.c.bf16 %v914_v30, %v913_v46  ;;  %v920_v47 = vsel %vm815_vm10, %v656_v25, %v884_v51  ;;  %v123_v34 = vrot.slane %v1685_v36, %v122_v43  ;;  %v1807_v35 = vrot.slane %v1690_v37, %v122_v43 }
 0x119   :  { %1051 = vst [vmem:[%s1863_s3 + $0x80] sm:$0xff] %v1194_v29  ;;  %v1193_v32 = vpack.c.bf16 %v920_v47, %v919_v31  ;;  %v127_v44 = vrot.slane %v1685_v36, %v126_v53  ;;  %v1811_v50 = vrot.slane %v1690_v37, %v126_v53  ;;  %vm1035_vm13 = vcmask 523268  }
 0x11a   :  { %1047 = vst [vmem:[%s1863_s3 + $0x60] sm:$0xff] %v1190_v41  ;;  %vm1820_vm2 = vmor %vm1035_vm13, %vm576_vm0 }
 0x11b   :  { %1050 = vst [vmem:[%s1863_s3 + $0x78] sm:$0xff] %v1193_v32 }
 0x132   :  { %v755_v38 = vpop.f32.mrf.mxu0 }
 0x133   :  { %v765_v39 = vpop.f32.mrf.mxu1  ;;  %v756_v45 = vadd.f32 %v755_v38, %v123_v34 }
 0x134   :  { %v766_v48 = vadd.f32 %v765_v39, %v123_v34  ;;  %v757_v49 = vpop.f32.mrf.mxu0 }
 0x135   :  { %v767_v52 = vpop.f32.mrf.mxu1  ;;  %vm788_vm11 = vcmp.gt.f32.partialorder %v756_v45, 0.0  ;;  %v857_v54 = vmul.f32 %v1807_v35, %v756_v45  ;;  %v758_v55 = vadd.f32 %v757_v49, %v127_v44 }
 0x136   :  { %v869_v33 = vmul.f32 %v1807_v35, %v766_v48  ;;  %vm800_vm12 = vcmp.gt.f32.partialorder %v766_v48, 0.0  ;;  %v768_v56 = vadd.f32 %v767_v52, %v127_v44  ;;  %v759_v57 = vpop.f32.mrf.mxu0 }
 0x137   :  { %v769_v58 = vpop.f32.mrf.mxu1  ;;  %v893_v59 = vsel %vm788_vm11, %v756_v45, %v857_v54  ;;  %v760_v36 = vadd.f32 %v759_v57, %v123_v34  ;;  %vm789_vm14 = vcmp.gt.f32.partialorder %v758_v55, 0.0  ;;  %v858_v61 = vmul.f32 %v1811_v50, %v758_v55 }
 0x138   :  { %v770_v60 = vadd.f32 %v769_v58, %v123_v34  ;;  %vm801_vm15 = vcmp.gt.f32.partialorder %v768_v56, 0.0  ;;  %v870_v37 = vmul.f32 %v1811_v50, %v768_v56  ;;  %v761_v62 = vpop.f32.mrf.mxu0  ;;  %v905_v0 = vsel %vm800_vm12, %v766_v48, %v869_v33 }
 0x139   :  { %v771_v63 = vpop.f32.mrf.mxu1  ;;  %vm794_vm1 = vcmp.gt.f32.partialorder %v760_v36, 0.0  ;;  %v863_v1 = vmul.f32 %v1807_v35, %v760_v36  ;;  %v894_v3 = vsel %vm789_vm14, %v758_v55, %v858_v61  ;;  %v762_v6 = vadd.f32 %v761_v62, %v127_v44 }
 0x13a   :  { %v875_v2 = vmul.f32 %v1807_v35, %v770_v60  ;;  %v906_v5 = vsel %vm801_vm15, %v768_v56, %v870_v37  ;;  %v772_v7 = vadd.f32 %v771_v63, %v127_v44  ;;  %v1180_v9 = vpack.c.bf16 %v894_v3, %v893_v59 }
 0x13b   :  { %v775_v8 = vpop.f32.mrf.mxu1  ;;  %v1186_v10 = vpack.c.bf16 %v906_v5, %v905_v0  ;;  %v899_v11 = vsel %vm794_vm1, %v760_v36, %v863_v1  ;;  %vm806_vm3 = vcmp.gt.f32.partialorder %v770_v60, 0.0  ;;  %vm795_vm4 = vcmp.gt.f32.partialorder %v762_v6, 0.0 }
 0x13c   :  { %v864_v12 = vmul.f32 %v1811_v50, %v762_v6  ;;  %vm807_vm5 = vcmp.gt.f32.partialorder %v772_v7, 0.0  ;;  %v876_v13 = vmul.f32 %v1811_v50, %v772_v7  ;;  %1037 = vst.msk [vmem:[%s1863_s3 + $0x10] sm:$0xff] %vm1820_vm2, %v1180_v9  ;;  %v776_v15 = vadd.f32 %v775_v8, %v123_v34 }
 0x13d   :  { %v777_v14 = vpop.f32.mrf.mxu1  ;;  %1043 = vst.msk [vmem:[%s1863_s3 + $0x40] sm:$0xff] %vm1820_vm2, %v1186_v10  ;;  %v911_v17 = vsel %vm806_vm3, %v770_v60, %v875_v2 }
 0x13e   :  { %v778_v16 = vadd.f32 %v777_v14, %v127_v44  ;;  %v900_v18 = vsel %vm795_vm4, %v762_v6, %v864_v12  ;;  %v912_v19 = vsel %vm807_vm5, %v772_v7, %v876_v13  ;;  %vm812_vm0 = vcmp.gt.f32.partialorder %v776_v15, 0.0 }
 0x13f   :  { %v779_v40 = vpop.f32.mrf.mxu1  ;;  %v1183_v20 = vpack.c.bf16 %v900_v18, %v899_v11  ;;  %v1189_v21 = vpack.c.bf16 %v912_v19, %v911_v17  ;;  %v881_v22 = vmul.f32 %v1807_v35, %v776_v15 }
 0x140   :  { %vm813_vm6 = vcmp.gt.f32.partialorder %v778_v16, 0.0  ;;  %v882_v23 = vmul.f32 %v1811_v50, %v778_v16  ;;  %v780_v24 = vadd.f32 %v779_v40, %v123_v34 }
 0x141   :  { %v781_v42 = vpop.f32.mrf.mxu1  ;;  %1040 = vst.msk [vmem:[%s1863_s3 + $0x28] sm:$0xff] %vm1820_vm2, %v1183_v20  ;;  %1046 = vst.msk [vmem:[%s1863_s3 + $0x58] sm:$0xff] %vm1820_vm2, %v1189_v21  ;;  %v917_v46 = vsel %vm812_vm0, %v776_v15, %v881_v22 }
 0x142   :  { %v782_v25 = vadd.f32 %v781_v42, %v127_v44  ;;  %v918_v26 = vsel %vm813_vm6, %v778_v16, %v882_v23  ;;  %vm818_vm7 = vcmp.gt.f32.partialorder %v780_v24, 0.0  ;;  %v887_v27 = vmul.f32 %v1807_v35, %v780_v24 }
 0x143   :  { %v1192_v28 = vpack.c.bf16 %v918_v26, %v917_v46 }
 0x144   :  { %vm819_vm8 = vcmp.gt.f32.partialorder %v782_v25, 0.0  ;;  %v888_v29 = vmul.f32 %v1811_v50, %v782_v25  ;;  %v923_v30 = vsel %vm818_vm7, %v780_v24, %v887_v27 }
 0x145   :  { %1049 = vst.msk [vmem:[%s1863_s3 + $0x70] sm:$0xff] %vm1820_vm2, %v1192_v28 }
 0x146   :  { %v924_v51 = vsel %vm819_vm8, %v782_v25, %v888_v29 }
 0x147   :  { %v1195_v41 = vpack.c.bf16 %v924_v51, %v923_v30 }
 0x149   :  { %1052 = vst.msk [vmem:[%s1863_s3 + $0x88] sm:$0xff] %vm1820_vm2, %v1195_v41 }

// kernel: tile.43
= control target key start
LH: loop header
LB: loop body
LE: loop exit
PB: predicated region body
PF: predicated region fallthrough
CT: control target
= control target key end

     0   :  { %s28_s0 = inlined_call_operand.vmem [shape: f32[64], index: 0, kind: input, shape index: {}]   ;;  %s29_s1 = inlined_call_operand.vmem [shape: f32[9,64], index: 1, kind: output, shape index: {}]  }
   0x1   :  { %v4_v0 = vld [vmem:[%s28_s0] ss:$0 sm:$0xff] }
   0x2   :  { %5 = vst [vmem:[%s29_s1] sm:$0xff] %v4_v0  ;;  %8 = vst [vmem:[%s29_s1 + $0x8] sm:$0xff] %v4_v0 }

// kernel: tile.48
= control target key start
LH: loop header
LB: loop body
LE: loop exit
PB: predicated region body
PF: predicated region fallthrough
CT: control target
= control target key end

     0   :  { %vm3_vm0 = vcmask 523264   ;;  %s57_s8 = smov 64   ;;  %vm11_vm1 = vcmask 1048064   ;;  %s89_s0 = inlined_call_operand.vmem [shape: f32[9,64], index: 0, kind: input, shape index: {}]   ;;  %s90_s1 = inlined_call_operand.vmem [shape: f32[1,576], index: 1, kind: output, shape index: {}]  }
   0x1   :  { %v51_v0 = vld [vmem:[%s89_s0 + $0x1] ss:$2 sm:$0xf]   ;;  %v2_v1 = vld [vmem:[%s89_s0] ss:$2 sm:$0x1f]  }
   0x2   :  { %9 = vrot.lane.b32.xlu0 %v51_v0, %s57_s8  ;;  %4 = vst.msk [vmem:[#allocation0] ss:$8 sm:$0xf] %vm3_vm0, %v2_v1   ;;  %6 = vst.msk [vmem:[#allocation0 + $0x1c] sm:$0x10] %vm3_vm0, %v2_v1  }
   0x9   :  { %v42_v2 = vld [vmem:[#allocation0 + $0x20] sm:$0x1] }
   0xa   :  { %55 = vst [vmem:[%s90_s1 + $0x4] sm:$0x1] %v42_v2 }
  0x74   :  { %v10_v3 = vpop.permute.xlu0 %9  }
  0x75   :  { %12 = vst.msk [vmem:[#allocation0] ss:$8 sm:$0xf] %vm11_vm1, %v10_v3  }
  0x7c   :  { %v17_v4 = vld [vmem:[#allocation0] sm:$0x1]  ;;  %v22_v5 = vld [vmem:[#allocation0 + $0x8] sm:$0x1]  ;;  %v28_v6 = vld [vmem:[#allocation0 + $0x10] sm:$0x1] }
  0x7d   :  { %20 = vst [vmem:[%s90_s1] sm:$0x1] %v17_v4  ;;  %52 = vst [vmem:[%s90_s1 + $0x1] sm:$0x1] %v22_v5  ;;  %v35_v7 = vld [vmem:[#allocation0 + $0x18] sm:$0x1] }
  0x7e   :  { %53 = vst [vmem:[%s90_s1 + $0x2] sm:$0x1] %v28_v6  ;;  %54 = vst [vmem:[%s90_s1 + $0x3] sm:$0x1] %v35_v7 }

// kernel: onet_forward.5
= control target key start
LH: loop header
LB: loop body
LE: loop exit
PB: predicated region body
PF: predicated region fallthrough
CT: control target
= control target key end

     0   :  { %vm2264_vm0 = vcmask 261120   ;;  %vm3200_vm14 = vcmask 519168   ;;  %s5577_s0 = inlined_call_operand.vmem [shape: bf16[18,1056], index: 0, kind: input, shape index: {}]   ;;  %s5578_s1 = inlined_call_operand.vmem [shape: bf16[1056,576], index: 1, kind: input, shape index: {}]   ;;  %s5579_s2 = inlined_call_operand.vmem [shape: f32[2,576], index: 2, kind: input, shape index: {}]   ;;  %s5580_s3 = inlined_call_operand.vmem [shape: bf16[18,576], index: 3, kind: output, shape index: {}]  }
   0x1   :  { %v3773_v0 = vld [vmem:[%s5578_s1 + $0x11c] ss:$20 sps:$4 sm:$0xff]   ;;  %v3777_v2 = vld [vmem:[%s5578_s1 + $0x118] ss:$20 sps:$4 sm:$0xff]   ;;  %v3779_v4 = vld [vmem:[%s5578_s1 + $0xf4] ss:$20 sps:$4 sm:$0xff]  }
   0x2   :  { %v3775_v1 = vld [vmem:[%s5578_s1 + $0x39c] ss:$20 sps:$4 sm:$0xff]   ;;  %2271 = vmatprep.subr.bf16.mxu0 %v3773_v0  ;;  %v3778_v3 = vld [vmem:[%s5578_s1 + $0x398] ss:$20 sps:$4 sm:$0xff]   ;;  %v3781_v5 = vld [vmem:[%s5578_s1 + $0x374] ss:$20 sps:$4 sm:$0xff]  }
   0x3   :  { %2324 = vmatprep.subr.bf16.mxu1 %v3775_v1  ;;  %2272 = vmatpush1.bf16.msra.mxu0 %v3777_v2  ;;  %v3783_v6 = vld [vmem:[%s5578_s1 + $0xf0] ss:$20 sps:$4 sm:$0xff]   ;;  %v3785_v8 = vld [vmem:[%s5578_s1 + $0xcc] ss:$20 sps:$4 sm:$0xff]   ;;  %v3789_v10 = vld [vmem:[%s5578_s1 + $0xc8] ss:$20 sps:$4 sm:$0xff]  }
   0x4   :  { %2325 = vmatpush1.bf16.msra.mxu1 %v3778_v3  ;;  %2273 = vmatprep.subr.bf16.mxu0 %v3779_v4  ;;  %v3784_v7 = vld [vmem:[%s5578_s1 + $0x370] ss:$20 sps:$4 sm:$0xff]   ;;  %v3787_v9 = vld [vmem:[%s5578_s1 + $0x34c] ss:$20 sps:$4 sm:$0xff]   ;;  %v3790_v11 = vld [vmem:[%s5578_s1 + $0x348] ss:$20 sps:$4 sm:$0xff]  }
   0x5   :  { %2326 = vmatprep.subr.bf16.mxu1 %v3781_v5  ;;  %v3791_v12 = vld [vmem:[%s5578_s1 + $0xa4] ss:$20 sps:$4 sm:$0xff]   ;;  %v3795_v14 = vld [vmem:[%s5578_s1 + $0xa0] ss:$20 sps:$4 sm:$0xff]   ;;  %v3797_v16 = vld [vmem:[%s5578_s1 + $0x7c] ss:$20 sps:$4 sm:$0xff]  }
   0x6   :  { %v3793_v13 = vld [vmem:[%s5578_s1 + $0x324] ss:$20 sps:$4 sm:$0xff]   ;;  %v3796_v15 = vld [vmem:[%s5578_s1 + $0x320] ss:$20 sps:$4 sm:$0xff]   ;;  %v3799_v17 = vld [vmem:[%s5578_s1 + $0x2fc] ss:$20 sps:$4 sm:$0xff]  }
   0x7   :  { %2274 = vmatpush1.bf16.msra.mxu0 %v3783_v6  ;;  %v3801_v18 = vld [vmem:[%s5578_s1 + $0x78] ss:$20 sps:$4 sm:$0xff]   ;;  %v3803_v20 = vld [vmem:[%s5578_s1 + $0x54] ss:$20 sps:$4 sm:$0xff]   ;;  %v3807_v22 = vld [vmem:[%s5578_s1 + $0x50] ss:$20 sps:$4 sm:$0xff]  }
   0x8   :  { %2327 = vmatpush1.bf16.msra.mxu1 %v3784_v7  ;;  %2275 = vmatprep.subr.bf16.mxu0 %v3785_v8  ;;  %v3802_v19 = vld [vmem:[%s5578_s1 + $0x2f8] ss:$20 sps:$4 sm:$0xff]   ;;  %v3805_v21 = vld [vmem:[%s5578_s1 + $0x2d4] ss:$20 sps:$4 sm:$0xff]   ;;  %v3808_v23 = vld [vmem:[%s5578_s1 + $0x2d0] ss:$20 sps:$4 sm:$0xff]  }
   0x9   :  { %2328 = vmatprep.subr.bf16.mxu1 %v3787_v9  ;;  %v3809_v24 = vld [vmem:[%s5578_s1 + $0x2c] ss:$20 sps:$4 sm:$0xff]   ;;  %v3813_v26 = vld [vmem:[%s5578_s1 + $0x28] ss:$20 sps:$4 sm:$0xff]   ;;  %v3815_v28 = vld [vmem:[%s5578_s1 + $0x4] ss:$20 sps:$4 sm:$0xff]  }
   0xa   :  { %v3811_v25 = vld [vmem:[%s5578_s1 + $0x2ac] ss:$20 sps:$4 sm:$0xff]   ;;  %v3814_v27 = vld [vmem:[%s5578_s1 + $0x2a8] ss:$20 sps:$4 sm:$0xff]   ;;  %v3817_v29 = vld [vmem:[%s5578_s1 + $0x284] ss:$20 sps:$4 sm:$0xff]  }
   0xb   :  { %2276 = vmatpush1.bf16.msra.mxu0 %v3789_v10  ;;  %v3819_v30 = vld [vmem:[%s5578_s1] ss:$20 sps:$4 sm:$0xff]   ;;  %v3821_v32 = vld [vmem:[%s5578_s1 + $0x25c] ss:$20 sps:$4 sm:$0xff]   ;;  %v3825_v34 = vld [vmem:[%s5578_s1 + $0x258] ss:$20 sps:$4 sm:$0xff]  }
   0xc   :  { %2329 = vmatpush1.bf16.msra.mxu1 %v3790_v11  ;;  %2277 = vmatprep.subr.bf16.mxu0 %v3791_v12  ;;  %v3820_v31 = vld [vmem:[%s5578_s1 + $0x280] ss:$20 sps:$4 sm:$0xff]   ;;  %v3823_v33 = vld [vmem:[%s5578_s1 + $0x4dc] ss:$20 sps:$4 sm:$0xff]   ;;  %v3826_v35 = vld [vmem:[%s5578_s1 + $0x4d8] ss:$20 sps:$4 sm:$0xff]  }
   0xd   :  { %2330 = vmatprep.subr.bf16.mxu1 %v3793_v13  ;;  %v3827_v36 = vld [vmem:[%s5578_s1 + $0x234] ss:$20 sps:$4 sm:$0xff]   ;;  %v3831_v38 = vld [vmem:[%s5578_s1 + $0x230] ss:$20 sps:$4 sm:$0xff]   ;;  %v3833_v40 = vld [vmem:[%s5578_s1 + $0x20c] ss:$20 sps:$4 sm:$0xff]  }
   0xe   :  { %v3829_v37 = vld [vmem:[%s5578_s1 + $0x4b4] ss:$20 sps:$4 sm:$0xff]   ;;  %v3832_v39 = vld [vmem:[%s5578_s1 + $0x4b0] ss:$20 sps:$4 sm:$0xff]   ;;  %v3835_v41 = vld [vmem:[%s5578_s1 + $0x48c] ss:$20 sps:$4 sm:$0xff]  }
   0xf   :  { %2278 = vmatpush1.bf16.msra.mxu0 %v3795_v14  ;;  %v3837_v42 = vld [vmem:[%s5578_s1 + $0x208] ss:$20 sps:$4 sm:$0xff]   ;;  %v3839_v44 = vld [vmem:[%s5578_s1 + $0x1e4] ss:$20 sps:$4 sm:$0xff]   ;;  %v3843_v46 = vld [vmem:[%s5578_s1 + $0x1e0] ss:$20 sps:$4 sm:$0xff]  }
  0x10   :  { %2331 = vmatpush1.bf16.msra.mxu1 %v3796_v15  ;;  %2279 = vmatprep.subr.bf16.mxu0 %v3797_v16  ;;  %v3838_v43 = vld [vmem:[%s5578_s1 + $0x488] ss:$20 sps:$4 sm:$0xff]   ;;  %v3841_v45 = vld [vmem:[%s5578_s1 + $0x464] ss:$20 sps:$4 sm:$0xff]   ;;  %v3844_v47 = vld [vmem:[%s5578_s1 + $0x460] ss:$20 sps:$4 sm:$0xff]  }
  0x11   :  { %2332 = vmatprep.subr.bf16.mxu1 %v3799_v17  ;;  %v3845_v48 = vld [vmem:[%s5578_s1 + $0x1bc] ss:$20 sps:$4 sm:$0xff]   ;;  %v4450_v49 = vld [vmem:[%s5577_s0 + $0x4] ss:$36 sps:$4 sm:$0xff]   ;;  %v3849_v52 = vld [vmem:[%s5578_s1 + $0x1b8] ss:$20 sps:$4 sm:$0xff]  }
  0x12   :  { %v4455_v50 = vld [vmem:[%s5577_s0 + $0xc] ss:$36 sps:$4 sm:$0xff]   ;;  %2303 = vmatprep.mubr.bf16.mxu0 %v4450_v49  ;;  %v3851_v54 = vld [vmem:[%s5578_s1 + $0x194] ss:$20 sps:$4 sm:$0xff]   ;;  %v3863_v62 = vld [vmem:[%s5578_s1 + $0x144] ss:$20 sps:$4 sm:$0xff]  }
  0x13   :  { %2280 = vmatpush1.bf16.msra.mxu0 %v3801_v18  ;;  %v3847_v51 = vld [vmem:[%s5578_s1 + $0x43c] ss:$20 sps:$4 sm:$0xff]   ;;  %2356 = vmatprep.mubr.bf16.mxu1 %v4455_v50  ;;  %v3850_v53 = vld [vmem:[%s5578_s1 + $0x438] ss:$20 sps:$4 sm:$0xff]   ;;  %v3853_v55 = vld [vmem:[%s5578_s1 + $0x414] ss:$20 sps:$4 sm:$0xff]  }
  0x14   :  { %2333 = vmatpush1.bf16.msra.mxu1 %v3802_v19  ;;  %2281 = vmatprep.subr.bf16.mxu0 %v3803_v20  ;;  %v3855_v56 = vld [vmem:[%s5578_s1 + $0x190] ss:$20 sps:$4 sm:$0xff]   ;;  %v3857_v58 = vld [vmem:[%s5578_s1 + $0x16c] ss:$20 sps:$4 sm:$0xff]   ;;  %v3861_v60 = vld [vmem:[%s5578_s1 + $0x168] ss:$20 sps:$4 sm:$0xff]  }
  0x15   :  { %2334 = vmatprep.subr.bf16.mxu1 %v3805_v21  ;;  %v3856_v57 = vld [vmem:[%s5578_s1 + $0x410] ss:$20 sps:$4 sm:$0xff]   ;;  %v3859_v59 = vld [vmem:[%s5578_s1 + $0x3ec] ss:$20 sps:$4 sm:$0xff]   ;;  %v3862_v61 = vld [vmem:[%s5578_s1 + $0x3e8] ss:$20 sps:$4 sm:$0xff]  }
  0x16   :  { %v3865_v63 = vld [vmem:[%s5578_s1 + $0x3c4] ss:$20 sps:$4 sm:$0xff]   ;;  %v3867_v0 = vld [vmem:[%s5578_s1 + $0x140] ss:$20 sps:$4 sm:$0xff]   ;;  %v3876_v2 = vld [vmem:[%s5578_s1 + $0x61c] ss:$20 sps:$4 sm:$0xff]  }
  0x17   :  { %2282 = vmatpush1.bf16.msra.mxu0 %v3807_v22  ;;  %v3868_v1 = vld [vmem:[%s5578_s1 + $0x3c0] ss:$20 sps:$4 sm:$0xff]   ;;  %v3879_v3 = vld [vmem:[%s5578_s1 + $0x89c] ss:$20 sps:$4 sm:$0xff]   ;;  %v3874_v5 = vld [vmem:[%s5578_s1 + $0x618] ss:$20 sps:$4 sm:$0xff]  }
  0x18   :  { %2335 = vmatpush1.bf16.msra.mxu1 %v3808_v23  ;;  %2283 = vmatprep.subr.bf16.mxu0 %v3809_v24  ;;  %v4513_v4 = vld [vmem:[%s5577_s0] ss:$36 sps:$4 sm:$0xff]   ;;  %v3877_v6 = vld [vmem:[%s5578_s1 + $0x898] ss:$20 sps:$4 sm:$0xff]   ;;  %v3883_v8 = vld [vmem:[%s5578_s1 + $0x5f4] ss:$20 sps:$4 sm:$0xff]  }
  0x19   :  { %2336 = vmatprep.subr.bf16.mxu1 %v3811_v25  ;;  %v3880_v7 = vld [vmem:[%s5577_s0 + $0x8] ss:$36 sps:$4 sm:$0xff]   ;;  %v3881_v10 = vld [vmem:[%s5578_s1 + $0x5f0] ss:$20 sps:$4 sm:$0xff]   ;;  %v3893_v18 = vld [vmem:[%s5578_s1 + $0x5a0] ss:$20 sps:$4 sm:$0xff]  }
  0x1a   :  { %v3886_v9 = vld [vmem:[%s5578_s1 + $0x874] ss:$20 sps:$4 sm:$0xff]   ;;  %v3884_v11 = vld [vmem:[%s5578_s1 + $0x870] ss:$20 sps:$4 sm:$0xff]   ;;  %v3889_v12 = vld [vmem:[%s5578_s1 + $0x5cc] ss:$20 sps:$4 sm:$0xff]  }
  0x1b   :  { %2284 = vmatpush1.bf16.msra.mxu0 %v3813_v26  ;;  %v3892_v13 = vld [vmem:[%s5578_s1 + $0x84c] ss:$20 sps:$4 sm:$0xff]   ;;  %v3887_v14 = vld [vmem:[%s5578_s1 + $0x5c8] ss:$20 sps:$4 sm:$0xff]   ;;  %v3895_v16 = vld [vmem:[%s5578_s1 + $0x5a4] ss:$20 sps:$4 sm:$0xff]  }
  0x1c   :  { %2337 = vmatpush1.bf16.msra.mxu1 %v3814_v27  ;;  %2285 = vmatprep.subr.bf16.mxu0 %v3815_v28  ;;  %v3890_v15 = vld [vmem:[%s5578_s1 + $0x848] ss:$20 sps:$4 sm:$0xff]   ;;  %v3898_v17 = vld [vmem:[%s5578_s1 + $0x824] ss:$20 sps:$4 sm:$0xff]   ;;  %v3896_v19 = vld [vmem:[%s5578_s1 + $0x820] ss:$20 sps:$4 sm:$0xff]  }
  0x1d   :  { %2338 = vmatprep.subr.bf16.mxu1 %v3817_v29  ;;  %v3901_v20 = vld [vmem:[%s5578_s1 + $0x57c] ss:$20 sps:$4 sm:$0xff]   ;;  %v3899_v22 = vld [vmem:[%s5578_s1 + $0x578] ss:$20 sps:$4 sm:$0xff]   ;;  %v3907_v24 = vld [vmem:[%s5578_s1 + $0x554] ss:$20 sps:$4 sm:$0xff]  }
  0x1e   :  { %v3904_v21 = vld [vmem:[%s5578_s1 + $0x7fc] ss:$20 sps:$4 sm:$0xff]   ;;  %v3902_v23 = vld [vmem:[%s5578_s1 + $0x7f8] ss:$20 sps:$4 sm:$0xff]   ;;  %v3910_v25 = vld [vmem:[%s5578_s1 + $0x7d4] ss:$20 sps:$4 sm:$0xff]  }
  0x1f   :  { %2286 = vmatpush1.bf16.msra.mxu0 %v3819_v30  ;;  %v4582_v26 = vld [vmem:[%s5577_s0 + $0x4c] ss:$36 sps:$4 sm:$0xff]   ;;  %v4596_v29 = vld [vmem:[%s5577_s0 + $0x54] ss:$36 sps:$4 sm:$0xff]  }
  0x20   :  { %2339 = vmatpush1.bf16.msra.mxu1 %v3820_v31  ;;  %2287 = vmatprep.subr.bf16.mxu0 %v3821_v32  ;;  %v4587_v27 = vld [vmem:[%s5577_s0 + $0x48] ss:$36 sps:$4 sm:$0xff]   ;;  %v3905_v28 = vld [vmem:[%s5578_s1 + $0x550] ss:$20 sps:$4 sm:$0xff]  }
  0x21   :  { %2340 = vmatprep.subr.bf16.mxu1 %v3823_v33  ;;  %v3908_v30 = vld [vmem:[%s5578_s1 + $0x7d0] ss:$20 sps:$4 sm:$0xff]   ;;  %v3913_v32 = vld [vmem:[%s5578_s1 + $0x52c] ss:$20 sps:$4 sm:$0xff]  }
  0x22   :  { %v3958_v31 = vld [vmem:[%s5577_s0 + $0x50] ss:$36 sps:$4 sm:$0xff]   ;;  %v3916_v33 = vld [vmem:[%s5578_s1 + $0x7ac] ss:$20 sps:$4 sm:$0xff]  }
  0x23   :  { %2288 = vmatpush2.bf16.msra.mxu0 %v3825_v34  ;;  %v3911_v34 = vld [vmem:[%s5578_s1 + $0x528] ss:$20 sps:$4 sm:$0xff]  }
  0x24   :  { %2341 = vmatpush2.bf16.msra.mxu1 %v3826_v35  ;;  %2289 = vmatprep.subr.bf16.mxu0 %v3827_v36  ;;  %v3914_v35 = vld [vmem:[%s5578_s1 + $0x7a8] ss:$20 sps:$4 sm:$0xff]   ;;  %v3919_v36 = vld [vmem:[%s5578_s1 + $0x504] ss:$20 sps:$4 sm:$0xff]  }
  0x25   :  { %2342 = vmatprep.subr.bf16.mxu1 %v3829_v37  ;;  %v3922_v37 = vld [vmem:[%s5578_s1 + $0x784] ss:$20 sps:$4 sm:$0xff]  }
  0x27   :  { %2290 = vmatpush2.bf16.msra.mxu0 %v3831_v38  ;;  %v3917_v38 = vld [vmem:[%s5578_s1 + $0x500] ss:$20 sps:$4 sm:$0xff]  }
  0x28   :  { %2343 = vmatpush2.bf16.msra.mxu1 %v3832_v39  ;;  %2291 = vmatprep.subr.bf16.mxu0 %v3833_v40  ;;  %v3920_v39 = vld [vmem:[%s5578_s1 + $0x780] ss:$20 sps:$4 sm:$0xff]   ;;  %v3925_v40 = vld [vmem:[%s5578_s1 + $0x75c] ss:$20 sps:$4 sm:$0xff]  }
  0x29   :  { %2344 = vmatprep.subr.bf16.mxu1 %v3835_v41  ;;  %v4636_v41 = vld [vmem:[%s5577_s0 + $0x14] ss:$36 sps:$4 sm:$0xff]  }
  0x2b   :  { %2292 = vmatpush2.bf16.msra.mxu0 %v3837_v42  ;;  %v3928_v42 = vld [vmem:[%s5578_s1 + $0x9dc] ss:$20 sps:$4 sm:$0xff]  }
  0x2c   :  { %2345 = vmatpush2.bf16.msra.mxu1 %v3838_v43  ;;  %2293 = vmatprep.subr.bf16.mxu0 %v3839_v44  ;;  %v4644_v43 = vld [vmem:[%s5577_s0 + $0x1c] ss:$36 sps:$4 sm:$0xff]   ;;  %v3923_v44 = vld [vmem:[%s5578_s1 + $0x758] ss:$20 sps:$4 sm:$0xff]  }
  0x2d   :  { %2346 = vmatprep.subr.bf16.mxu1 %v3841_v45  ;;  %v3926_v45 = vld [vmem:[%s5578_s1 + $0x9d8] ss:$20 sps:$4 sm:$0xff]  }
  0x2f   :  { %2294 = vmatpush2.bf16.msra.mxu0 %v3843_v46  ;;  %v3931_v46 = vld [vmem:[%s5578_s1 + $0x734] ss:$20 sps:$4 sm:$0xff]  }
  0x30   :  { %2347 = vmatpush2.bf16.msra.mxu1 %v3844_v47  ;;  %2295 = vmatprep.subr.bf16.mxu0 %v3845_v48  ;;  %v3934_v47 = vld [vmem:[%s5578_s1 + $0x9b4] ss:$20 sps:$4 sm:$0xff]   ;;  %v3929_v48 = vld [vmem:[%s5578_s1 + $0x730] ss:$20 sps:$4 sm:$0xff]  }
  0x31   :  { %2348 = vmatprep.subr.bf16.mxu1 %v3847_v51  ;;  %v3932_v51 = vld [vmem:[%s5578_s1 + $0x9b0] ss:$20 sps:$4 sm:$0xff]  }
  0x33   :  { %2296 = vmatpush2.bf16.msra.mxu0 %v3849_v52  ;;  %v3937_v52 = vld [vmem:[%s5578_s1 + $0x70c] ss:$20 sps:$4 sm:$0xff]  }
  0x34   :  { %2349 = vmatpush2.bf16.msra.mxu1 %v3850_v53  ;;  %2297 = vmatprep.subr.bf16.mxu0 %v3851_v54  ;;  %v3940_v53 = vld [vmem:[%s5578_s1 + $0x98c] ss:$20 sps:$4 sm:$0xff]   ;;  %v3935_v54 = vld [vmem:[%s5578_s1 + $0x708] ss:$20 sps:$4 sm:$0xff]  }
  0x35   :  { %2350 = vmatprep.subr.bf16.mxu1 %v3853_v55  ;;  %v3938_v55 = vld [vmem:[%s5578_s1 + $0x988] ss:$20 sps:$4 sm:$0xff]  }
  0x37   :  { %2298 = vmatpush2.bf16.msra.mxu0 %v3855_v56  ;;  %v3943_v56 = vld [vmem:[%s5578_s1 + $0x6e4] ss:$20 sps:$4 sm:$0xff]  }
  0x38   :  { %2351 = vmatpush2.bf16.msra.mxu1 %v3856_v57  ;;  %2299 = vmatprep.subr.bf16.mxu0 %v3857_v58  ;;  %v3946_v57 = vld [vmem:[%s5578_s1 + $0x964] ss:$20 sps:$4 sm:$0xff]   ;;  %v3941_v58 = vld [vmem:[%s5578_s1 + $0x6e0] ss:$20 sps:$4 sm:$0xff]  }
  0x39   :  { %2352 = vmatprep.subr.bf16.mxu1 %v3859_v59  ;;  %v3944_v59 = vld [vmem:[%s5578_s1 + $0x960] ss:$20 sps:$4 sm:$0xff]  }
  0x3b   :  { %2300 = vmatpush2.bf16.msra.mxu0 %v3861_v60  ;;  %v3949_v60 = vld [vmem:[%s5578_s1 + $0x6bc] ss:$20 sps:$4 sm:$0xff]  }
  0x3c   :  { %2353 = vmatpush2.bf16.msra.mxu1 %v3862_v61  ;;  %2301 = vmatprep.subr.bf16.mxu0 %v3863_v62  ;;  %v3952_v61 = vld [vmem:[%s5578_s1 + $0x93c] ss:$20 sps:$4 sm:$0xff]   ;;  %v3947_v62 = vld [vmem:[%s5578_s1 + $0x6b8] ss:$20 sps:$4 sm:$0xff]  }
  0x3d   :  { %2354 = vmatprep.subr.bf16.mxu1 %v3865_v63  ;;  %v3950_v63 = vld [vmem:[%s5578_s1 + $0x938] ss:$20 sps:$4 sm:$0xff]  }
  0x3f   :  { %2302 = vmatpush2.bf16.msra.mxu0 %v3867_v0  ;;  %v3961_v0 = vld [vmem:[%s5578_s1 + $0x694] ss:$20 sps:$4 sm:$0xff]  }
  0x40   :  { %2355 = vmatpush2.bf16.msra.mxu1 %v3868_v1  ;;  %2377 = vmatprep.subr.bf16.mxu0 %v3876_v2  ;;  %v3964_v1 = vld [vmem:[%s5578_s1 + $0x914] ss:$20 sps:$4 sm:$0xff]   ;;  %v3959_v2 = vld [vmem:[%s5578_s1 + $0x690] ss:$20 sps:$4 sm:$0xff]  }
  0x41   :  { %2430 = vmatprep.subr.bf16.mxu1 %v3879_v3  ;;  %v3962_v3 = vld [vmem:[%s5578_s1 + $0x910] ss:$20 sps:$4 sm:$0xff]  }
  0x42   :  { %2304 = vmatmul.mubr.bf16.vlgmr.msra.gmra.mxu0 %v4513_v4 }
  0x43   :  { %2357 = vmatmul.mubr.bf16.vlgmr.msra.gmra.mxu1 %v3880_v7  ;;  %2378 = vmatpush1.bf16.msra.mxu0 %v3874_v5  ;;  %v3967_v5 = vld [vmem:[%s5578_s1 + $0x66c] ss:$20 sps:$4 sm:$0xff]   ;;  %v3965_v7 = vld [vmem:[%s5578_s1 + $0x668] ss:$20 sps:$4 sm:$0xff]  }
  0x44   :  { %2431 = vmatpush1.bf16.msra.mxu1 %v3877_v6  ;;  %2379 = vmatprep.subr.bf16.mxu0 %v3883_v8  ;;  %v3970_v6 = vld [vmem:[%s5578_s1 + $0x8ec] ss:$20 sps:$4 sm:$0xff]   ;;  %v3968_v8 = vld [vmem:[%s5578_s1 + $0x8e8] ss:$20 sps:$4 sm:$0xff]  }
  0x45   :  { %2432 = vmatprep.subr.bf16.mxu1 %v3886_v9  ;;  %2313 = vmatprep.mubr.bf16.mxu0 %v4582_v26  ;;  %v3973_v9 = vld [vmem:[%s5578_s1 + $0x644] ss:$20 sps:$4 sm:$0xff]  }
  0x46   :  { %2366 = vmatprep.mubr.bf16.mxu1 %v4596_v29 }
  0x47   :  { %2380 = vmatpush1.bf16.msra.mxu0 %v3881_v10  ;;  %v3976_v10 = vld [vmem:[%s5578_s1 + $0x8c4] ss:$20 sps:$4 sm:$0xff]  }
  0x48   :  { %2433 = vmatpush1.bf16.msra.mxu1 %v3884_v11  ;;  %2381 = vmatprep.subr.bf16.mxu0 %v3889_v12  ;;  %v3971_v11 = vld [vmem:[%s5578_s1 + $0x640] ss:$20 sps:$4 sm:$0xff]  }
  0x49   :  { %2434 = vmatprep.subr.bf16.mxu1 %v3892_v13  ;;  %v3974_v12 = vld [vmem:[%s5578_s1 + $0x8c0] ss:$20 sps:$4 sm:$0xff]  }
  0x4a   :  { %2314 = vmatmul.mubr.bf16.gmra.mxu0 %v4587_v27  ;;  %v3977_v13 = vld [vmem:[%s5577_s0 + $0x10] ss:$36 sps:$4 sm:$0xff]  }
  0x4b   :  { %2382 = vmatpush1.bf16.msra.mxu0 %v3887_v14  ;;  %2367 = vmatmul.mubr.bf16.gmra.mxu1 %v3958_v31  ;;  %v3985_v14 = vld [vmem:[%s5578_s1 + $0xa2c] ss:$20 sps:$4 sm:$0xff]  }
  0x4c   :  { %2435 = vmatpush1.bf16.msra.mxu1 %v3890_v15  ;;  %2383 = vmatprep.subr.bf16.mxu0 %v3895_v16  ;;  %v3988_v15 = vld [vmem:[%s5578_s1 + $0x124] ss:$20 sps:$4 sm:$0xff]  }
  0x4d   :  { %2436 = vmatprep.subr.bf16.mxu1 %v3898_v17  ;;  %2409 = vmatprep.mubr.bf16.mxu0 %v4636_v41  ;;  %v3980_v16 = vld [vmem:[%s5577_s0 + $0x18] ss:$36 sps:$4 sm:$0xff]   ;;  %v4003_v31 = vld [vmem:[%s5577_s0 + $0x60] ss:$36 sps:$4 sm:$0xff]  }
  0x4e   :  { %2462 = vmatprep.mubr.bf16.mxu1 %v4644_v43  ;;  %v3983_v17 = vld [vmem:[%s5578_s1 + $0xa28] ss:$20 sps:$4 sm:$0xff]  }
  0x4f   :  { %2384 = vmatpush1.bf16.msra.mxu0 %v3893_v18  ;;  %v3986_v18 = vld [vmem:[%s5578_s1 + $0x120] ss:$20 sps:$4 sm:$0xff]  }
  0x50   :  { %2437 = vmatpush1.bf16.msra.mxu1 %v3896_v19  ;;  %2385 = vmatprep.subr.bf16.mxu0 %v3901_v20  ;;  %v3991_v19 = vld [vmem:[%s5578_s1 + $0xfc] ss:$20 sps:$4 sm:$0xff]  }
  0x51   :  { %2438 = vmatprep.subr.bf16.mxu1 %v3904_v21  ;;  %v4762_v20 = vld [vmem:[%s5577_s0 + $0x5c] ss:$36 sps:$4 sm:$0xff]   ;;  %v3997_v21 = vld [vmem:[%s5578_s1 + $0xa04] ss:$20 sps:$4 sm:$0xff]  }
  0x53   :  { %2386 = vmatpush1.bf16.msra.mxu0 %v3899_v22  ;;  %v4001_v22 = vld [vmem:[%s5577_s0 + $0x64] ss:$36 sps:$4 sm:$0xff]  }
  0x54   :  { %2439 = vmatpush1.bf16.msra.mxu1 %v3902_v23  ;;  %2387 = vmatprep.subr.bf16.mxu0 %v3907_v24  ;;  %v3989_v23 = vld [vmem:[%s5578_s1 + $0xf8] ss:$20 sps:$4 sm:$0xff]   ;;  %v3995_v24 = vld [vmem:[%s5578_s1 + $0xa00] ss:$20 sps:$4 sm:$0xff]  }
  0x55   :  { %2440 = vmatprep.subr.bf16.mxu1 %v3910_v25  ;;  %v4000_v25 = vld [vmem:[%s5578_s1 + $0xd4] ss:$20 sps:$4 sm:$0xff]  }
  0x57   :  { %2388 = vmatpush1.bf16.msra.mxu0 %v3905_v28  ;;  %v4009_v28 = vld [vmem:[%s5578_s1 + $0x3a4] ss:$20 sps:$4 sm:$0xff]  }
  0x58   :  { %2441 = vmatpush1.bf16.msra.mxu1 %v3908_v30  ;;  %2389 = vmatprep.subr.bf16.mxu0 %v3913_v32  ;;  %v4786_v30 = vld [vmem:[%s5577_s0 + $0x58] ss:$36 sps:$4 sm:$0xff]   ;;  %v3998_v32 = vld [vmem:[%s5578_s1 + $0xd0] ss:$20 sps:$4 sm:$0xff]  }
  0x59   :  { %2442 = vmatprep.subr.bf16.mxu1 %v3916_v33  ;;  %v4006_v33 = vld [vmem:[%s5578_s1 + $0xac] ss:$20 sps:$4 sm:$0xff]  }
  0x5b   :  { %2390 = vmatpush1.bf16.msra.mxu0 %v3911_v34  ;;  %v4004_v34 = vld [vmem:[%s5578_s1 + $0xa8] ss:$20 sps:$4 sm:$0xff]  }
  0x5c   :  { %2443 = vmatpush1.bf16.msra.mxu1 %v3914_v35  ;;  %2391 = vmatprep.subr.bf16.mxu0 %v3919_v36  ;;  %v4279_v35 = vmov 0   ;;  %v4013_v36 = vld [vmem:[%s5578_s1 + $0x84] ss:$20 sps:$4 sm:$0xff]  }
  0x5d   :  { %2444 = vmatprep.subr.bf16.mxu1 %v3922_v37  ;;  %v4809_v37 = vld [vmem:[%s5577_s0 + $0x20] ss:$36 sps:$4 sm:$0xff]  }
  0x5f   :  { %2392 = vmatpush1.bf16.msra.mxu0 %v3917_v38  ;;  %v4007_v38 = vld [vmem:[%s5578_s1 + $0x3a0] ss:$20 sps:$4 sm:$0xff]  }
  0x60   :  { %2445 = vmatpush1.bf16.msra.mxu1 %v3920_v39  ;;  %2393 = vmatprep.subr.bf16.mxu0 %v3925_v40  ;;  %v4011_v39 = vld [vmem:[%s5578_s1 + $0x80] ss:$20 sps:$4 sm:$0xff]   ;;  %v4019_v40 = vld [vmem:[%s5578_s1 + $0x5c] ss:$20 sps:$4 sm:$0xff]  }
  0x61   :  { %2446 = vmatprep.subr.bf16.mxu1 %v3928_v42  ;;  %v4014_v42 = vld [vmem:[%s5578_s1 + $0x378] ss:$20 sps:$4 sm:$0xff]  }
  0x63   :  { %2394 = vmatpush2.bf16.msra.mxu0 %v3923_v44  ;;  %v4017_v44 = vld [vmem:[%s5578_s1 + $0x58] ss:$20 sps:$4 sm:$0xff]  }
  0x64   :  { %2447 = vmatpush2.bf16.msra.mxu1 %v3926_v45  ;;  %2395 = vmatprep.subr.bf16.mxu0 %v3931_v46  ;;  %v4022_v45 = vld [vmem:[%s5578_s1 + $0x354] ss:$20 sps:$4 sm:$0xff]  }
  0x65   :  { %2448 = vmatprep.subr.bf16.mxu1 %v3934_v47  ;;  %v4026_v46 = vld [vmem:[%s5578_s1 + $0x34] ss:$20 sps:$4 sm:$0xff]  }
  0x66   :  { %v4841_v47 = vld [vmem:[%s5577_s0 + $0x68] ss:$36 sps:$4 sm:$0xff]  }
  0x67   :  { %2396 = vmatpush2.bf16.msra.mxu0 %v3929_v48  ;;  %v4020_v48 = vld [vmem:[%s5578_s1 + $0x350] ss:$20 sps:$4 sm:$0xff]  }
  0x68   :  { %2449 = vmatpush2.bf16.msra.mxu1 %v3932_v51  ;;  %2397 = vmatprep.subr.bf16.mxu0 %v3937_v52  ;;  %v4024_v51 = vld [vmem:[%s5578_s1 + $0x30] ss:$20 sps:$4 sm:$0xff]   ;;  %v4029_v52 = vld [vmem:[%s5578_s1 + $0x32c] ss:$20 sps:$4 sm:$0xff]  }
  0x69   :  { %2450 = vmatprep.subr.bf16.mxu1 %v3940_v53  ;;  %v4032_v53 = vld [vmem:[%s5578_s1 + $0xc] ss:$20 sps:$4 sm:$0xff]  }
  0x6b   :  { %2398 = vmatpush2.bf16.msra.mxu0 %v3935_v54  ;;  %v4027_v54 = vld [vmem:[%s5578_s1 + $0x328] ss:$20 sps:$4 sm:$0xff]  }
  0x6c   :  { %2451 = vmatpush2.bf16.msra.mxu1 %v3938_v55  ;;  %2399 = vmatprep.subr.bf16.mxu0 %v3943_v56  ;;  %v4030_v55 = vld [vmem:[%s5578_s1 + $0x8] ss:$20 sps:$4 sm:$0xff]   ;;  %v4035_v56 = vld [vmem:[%s5578_s1 + $0x304] ss:$20 sps:$4 sm:$0xff]  }
  0x6d   :  { %2452 = vmatprep.subr.bf16.mxu1 %v3946_v57  ;;  %v4038_v57 = vld [vmem:[%s5578_s1 + $0x264] ss:$20 sps:$4 sm:$0xff]  }
  0x6f   :  { %2400 = vmatpush2.bf16.msra.mxu0 %v3941_v58  ;;  %v4033_v58 = vld [vmem:[%s5578_s1 + $0x300] ss:$20 sps:$4 sm:$0xff]  }
  0x70   :  { %2453 = vmatpush2.bf16.msra.mxu1 %v3944_v59  ;;  %2401 = vmatprep.subr.bf16.mxu0 %v3949_v60  ;;  %v4036_v59 = vld [vmem:[%s5578_s1 + $0x260] ss:$20 sps:$4 sm:$0xff]   ;;  %v4041_v60 = vld [vmem:[%s5578_s1 + $0x2dc] ss:$20 sps:$4 sm:$0xff]  }
  0x71   :  { %2454 = vmatprep.subr.bf16.mxu1 %v3952_v61  ;;  %v4039_v61 = vld [vmem:[%s5578_s1 + $0x2d8] ss:$20 sps:$4 sm:$0xff]  }
  0x73   :  { %2402 = vmatpush2.bf16.msra.mxu0 %v3947_v62  ;;  %v4042_v62 = vld [vmem:[%s5578_s1 + $0x238] ss:$20 sps:$4 sm:$0xff]  }
  0x74   :  { %2455 = vmatpush2.bf16.msra.mxu1 %v3950_v63  ;;  %2403 = vmatprep.subr.bf16.mxu0 %v3961_v0  ;;  %v4047_v63 = vld [vmem:[%s5578_s1 + $0x2b4] ss:$20 sps:$4 sm:$0xff]  }
  0x75   :  { %2456 = vmatprep.subr.bf16.mxu1 %v3964_v1  ;;  %v4050_v0 = vld [vmem:[%s5578_s1 + $0x214] ss:$20 sps:$4 sm:$0xff]   ;;  %v4045_v1 = vld [vmem:[%s5578_s1 + $0x2b0] ss:$20 sps:$4 sm:$0xff]  }
  0x77   :  { %2404 = vmatpush2.bf16.msra.mxu0 %v3959_v2  ;;  %v4048_v2 = vld [vmem:[%s5578_s1 + $0x210] ss:$20 sps:$4 sm:$0xff]  }
  0x78   :  { %2457 = vmatpush2.bf16.msra.mxu1 %v3962_v3  ;;  %2405 = vmatprep.subr.bf16.mxu0 %v3967_v5  ;;  %v4053_v3 = vld [vmem:[%s5578_s1 + $0x28c] ss:$20 sps:$4 sm:$0xff]  }
  0x79   :  { %2458 = vmatprep.subr.bf16.mxu1 %v3970_v6  ;;  %v4056_v5 = vld [vmem:[%s5578_s1 + $0x1ec] ss:$20 sps:$4 sm:$0xff]   ;;  %v4051_v6 = vld [vmem:[%s5578_s1 + $0x288] ss:$20 sps:$4 sm:$0xff]  }
  0x7b   :  { %2406 = vmatpush2.bf16.msra.mxu0 %v3965_v7  ;;  %v4054_v7 = vld [vmem:[%s5578_s1 + $0x1e8] ss:$20 sps:$4 sm:$0xff]  }
  0x7c   :  { %2459 = vmatpush2.bf16.msra.mxu1 %v3968_v8  ;;  %2407 = vmatprep.subr.bf16.mxu0 %v3973_v9  ;;  %v4059_v8 = vld [vmem:[%s5578_s1 + $0x4e4] ss:$20 sps:$4 sm:$0xff]  }
  0x7d   :  { %2460 = vmatprep.subr.bf16.mxu1 %v3976_v10  ;;  %v4062_v9 = vld [vmem:[%s5578_s1 + $0x1c4] ss:$20 sps:$4 sm:$0xff]   ;;  %v4057_v10 = vld [vmem:[%s5578_s1 + $0x4e0] ss:$20 sps:$4 sm:$0xff]  }
  0x7f   :  { %2408 = vmatpush2.bf16.msra.mxu0 %v3971_v11  ;;  %v4060_v11 = vld [vmem:[%s5578_s1 + $0x1c0] ss:$20 sps:$4 sm:$0xff]  }
  0x80   :  { %2461 = vmatpush2.bf16.msra.mxu1 %v3974_v12  ;;  %2495 = vmatprep.subr.bf16.mxu0 %v3985_v14  ;;  %v4065_v12 = vld [vmem:[%s5578_s1 + $0x4bc] ss:$20 sps:$4 sm:$0xff]   ;;  %v4063_v14 = vld [vmem:[%s5578_s1 + $0x4b8] ss:$20 sps:$4 sm:$0xff]  }
  0x81   :  { %2536 = vmatprep.subr.bf16.mxu1 %v3988_v15  ;;  %v4066_v15 = vld [vmem:[%s5578_s1 + $0x198] ss:$20 sps:$4 sm:$0xff]  }
  0x82   :  { %2410 = vmatmul.mubr.bf16.vlgmr.msra.gmra.mxu0 %v3977_v13  ;;  %v4068_v13 = vld [vmem:[%s5578_s1 + $0x19c] ss:$20 sps:$4 sm:$0xff]  }
  0x83   :  { %2463 = vmatmul.mubr.bf16.vlgmr.msra.gmra.mxu1 %v3980_v16  ;;  %2496 = vmatpush1.bf16.msra.mxu0 %v3983_v17  ;;  %v4071_v16 = vld [vmem:[%s5578_s1 + $0x494] ss:$20 sps:$4 sm:$0xff]  }
  0x84   :  { %2537 = vmatpush1.bf16.msra.mxu1 %v3986_v18  ;;  %2419 = vmatprep.mubr.bf16.mxu0 %v4762_v20  ;;  %v4074_v17 = vld [vmem:[%s5578_s1 + $0x174] ss:$20 sps:$4 sm:$0xff]   ;;  %v4069_v18 = vld [vmem:[%s5578_s1 + $0x490] ss:$20 sps:$4 sm:$0xff]  }
  0x85   :  { %2538 = vmatprep.subr.bf16.mxu1 %v3991_v19  ;;  %2497 = vmatprep.subr.bf16.mxu0 %v3997_v21  ;;  %v4072_v19 = vld [vmem:[%s5578_s1 + $0x170] ss:$20 sps:$4 sm:$0xff]   ;;  %v4077_v21 = vld [vmem:[%s5578_s1 + $0x46c] ss:$20 sps:$4 sm:$0xff]  }
  0x86   :  { %2472 = vmatprep.mubr.bf16.mxu1 %v4001_v22  ;;  %v4080_v22 = vld [vmem:[%s5578_s1 + $0x14c] ss:$20 sps:$4 sm:$0xff]  }
  0x87   :  { %2498 = vmatpush1.bf16.msra.mxu0 %v3995_v24  ;;  %v4078_v24 = vld [vmem:[%s5578_s1 + $0x148] ss:$20 sps:$4 sm:$0xff]  }
  0x88   :  { %2539 = vmatpush1.bf16.msra.mxu1 %v3989_v23  ;;  %2589 = vmatprep.subr.bf16.mxu0 %v4009_v28  ;;  %v4075_v23 = vld [vmem:[%s5578_s1 + $0x468] ss:$20 sps:$4 sm:$0xff]   ;;  %v4086_v28 = vld [vmem:[%s5578_s1 + $0x624] ss:$20 sps:$4 sm:$0xff]  }
  0x89   :  { %2540 = vmatprep.subr.bf16.mxu1 %v4000_v25  ;;  %v4083_v25 = vld [vmem:[%s5578_s1 + $0x444] ss:$20 sps:$4 sm:$0xff]  }
  0x8a   :  { %2420 = vmatmul.mubr.bf16.gmra.mxu0 %v4786_v30 }
  0x8b   :  { %2473 = vmatmul.mubr.bf16.gmra.mxu1 %v4003_v31  ;;  %2515 = vmatprep.mubr.bf16.mxu0 %v4279_v35  ;;  %v4081_v31 = vld [vmem:[%s5578_s1 + $0x440] ss:$20 sps:$4 sm:$0xff]  }
  0x8c   :  { %2541 = vmatpush1.bf16.msra.mxu1 %v3998_v32  ;;  %2568 = vmatprep.mubr.bf16.mxu1 %v4450_v49  ;;  %v4016_v49 = vld [vmem:[%s5578_s1 + $0x37c] ss:$20 sps:$4 sm:$0xff]   ;;  %v4084_v32 = vld [vmem:[%s5578_s1 + $0x620] ss:$20 sps:$4 sm:$0xff]  }
  0x8d   :  { %2542 = vmatprep.subr.bf16.mxu1 %v4006_v33  ;;  %v4089_v33 = vld [vmem:[%s5578_s1 + $0x41c] ss:$20 sps:$4 sm:$0xff]  }
  0x90   :  { %2543 = vmatpush1.bf16.msra.mxu1 %v4004_v34  ;;  %v4092_v34 = vld [vmem:[%s5578_s1 + $0x5fc] ss:$20 sps:$4 sm:$0xff]  }
  0x91   :  { %2544 = vmatprep.subr.bf16.mxu1 %v4013_v36  ;;  %v4087_v36 = vld [vmem:[%s5578_s1 + $0x418] ss:$20 sps:$4 sm:$0xff]  }
  0x92   :  { %3614 = vmatmul.mubr.msk.bf16.vlgmr.msra.gmra.mxu0 %vm2264_vm0, %v4809_v37 }
  0x93   :  { %2590 = vmatpush1.bf16.msra.mxu0 %v4007_v38  ;;  %2525 = vmatprep.mubr.bf16.mxu0 %v4279_v35  ;;  %v4090_v38 = vld [vmem:[%s5578_s1 + $0x5f8] ss:$20 sps:$4 sm:$0xff]  }
  0x94   :  { %2545 = vmatpush1.bf16.msra.mxu1 %v4011_v39  ;;  %2591 = vmatprep.subr.bf16.mxu0 %v4016_v49  ;;  %v4095_v39 = vld [vmem:[%s5578_s1 + $0x3f4] ss:$20 sps:$4 sm:$0xff]  }
  0x95   :  { %2546 = vmatprep.subr.bf16.mxu1 %v4019_v40  ;;  %v4098_v49 = vld [vmem:[%s5578_s1 + $0x5d4] ss:$20 sps:$4 sm:$0xff]   ;;  %v4096_v40 = vld [vmem:[%s5578_s1 + $0x5d0] ss:$20 sps:$4 sm:$0xff]  }
  0x97   :  { %2592 = vmatpush1.bf16.msra.mxu0 %v4014_v42  ;;  %v4101_v42 = vld [vmem:[%s5578_s1 + $0x3cc] ss:$20 sps:$4 sm:$0xff]  }
  0x98   :  { %2547 = vmatpush1.bf16.msra.mxu1 %v4017_v44  ;;  %2593 = vmatprep.subr.bf16.mxu0 %v4022_v45  ;;  %v4104_v44 = vld [vmem:[%s5578_s1 + $0x5ac] ss:$20 sps:$4 sm:$0xff]   ;;  %v4102_v45 = vld [vmem:[%s5578_s1 + $0x5a8] ss:$20 sps:$4 sm:$0xff]  }
  0x99   :  { %2548 = vmatprep.subr.bf16.mxu1 %v4026_v46  ;;  %v4107_v46 = vld [vmem:[%s5578_s1 + $0x8a4] ss:$20 sps:$4 sm:$0xff]  }
  0x9a   :  { %3615 = vmatmul.mubr.msk.bf16.gmra.mxu0 %vm2264_vm0, %v4841_v47 }
  0x9b   :  { %2594 = vmatpush1.bf16.msra.mxu0 %v4020_v48  ;;  %2621 = vmatprep.mubr.bf16.mxu0 %v4455_v50  ;;  %v4044_v50 = vld [vmem:[%s5578_s1 + $0x23c] ss:$20 sps:$4 sm:$0xff]   ;;  %v4110_v48 = vld [vmem:[%s5578_s1 + $0x584] ss:$20 sps:$4 sm:$0xff]  }
  0x9c   :  { %2549 = vmatpush1.bf16.msra.mxu1 %v4024_v51  ;;  %2595 = vmatprep.subr.bf16.mxu0 %v4029_v52  ;;  %v4105_v51 = vld [vmem:[%s5578_s1 + $0x8a0] ss:$20 sps:$4 sm:$0xff]   ;;  %v4113_v52 = vld [vmem:[%s5578_s1 + $0x87c] ss:$20 sps:$4 sm:$0xff]  }
  0x9d   :  { %2550 = vmatprep.subr.bf16.mxu1 %v4032_v53  ;;  %v4116_v53 = vld [vmem:[%s5578_s1 + $0x55c] ss:$20 sps:$4 sm:$0xff]  }
  0x9f   :  { %2596 = vmatpush1.bf16.msra.mxu0 %v4027_v54  ;;  %v5036_v54 = vld [vmem:[%s5577_s0 + $0x8] ss:$36 sps:$4 sm:$0xff]  }
  0xa0   :  { %2551 = vmatpush1.bf16.msra.mxu1 %v4030_v55  ;;  %2597 = vmatprep.subr.bf16.mxu0 %v4035_v56  ;;  %v4114_v55 = vld [vmem:[%s5578_s1 + $0x558] ss:$20 sps:$4 sm:$0xff]   ;;  %v4119_v56 = vld [vmem:[%s5578_s1 + $0x854] ss:$20 sps:$4 sm:$0xff]  }
  0xa1   :  { %2552 = vmatprep.subr.bf16.mxu1 %v4038_v57  ;;  %v4122_v57 = vld [vmem:[%s5578_s1 + $0x534] ss:$20 sps:$4 sm:$0xff]  }
  0xa3   :  { %2598 = vmatpush1.bf16.msra.mxu0 %v4033_v58  ;;  %v4117_v58 = vld [vmem:[%s5578_s1 + $0x850] ss:$20 sps:$4 sm:$0xff]  }
  0xa4   :  { %2553 = vmatpush2.bf16.msra.mxu1 %v4036_v59  ;;  %2599 = vmatprep.subr.bf16.mxu0 %v4041_v60  ;;  %v4120_v59 = vld [vmem:[%s5578_s1 + $0x530] ss:$20 sps:$4 sm:$0xff]   ;;  %v4125_v60 = vld [vmem:[%s5578_s1 + $0x82c] ss:$20 sps:$4 sm:$0xff]  }
  0xa5   :  { %2554 = vmatprep.subr.bf16.mxu1 %v4044_v50  ;;  %v4128_v50 = vld [vmem:[%s5578_s1 + $0x50c] ss:$20 sps:$4 sm:$0xff]  }
  0xa7   :  { %2600 = vmatpush1.bf16.msra.mxu0 %v4039_v61  ;;  %v4126_v61 = vld [vmem:[%s5578_s1 + $0x508] ss:$20 sps:$4 sm:$0xff]  }
  0xa8   :  { %2555 = vmatpush2.bf16.msra.mxu1 %v4042_v62  ;;  %2601 = vmatprep.subr.bf16.mxu0 %v4047_v63  ;;  %v5070_v62 = vld [vmem:[%s5577_s0 + $0x50] ss:$36 sps:$4 sm:$0xff]   ;;  %v4131_v63 = vld [vmem:[%s5578_s1 + $0x804] ss:$20 sps:$4 sm:$0xff]  }
  0xa9   :  { %2556 = vmatprep.subr.bf16.mxu1 %v4050_v0  ;;  %v4134_v0 = vld [vmem:[%s5578_s1 + $0x764] ss:$20 sps:$4 sm:$0xff]  }
  0xab   :  { %2602 = vmatpush1.bf16.msra.mxu0 %v4045_v1  ;;  %v4129_v1 = vld [vmem:[%s5578_s1 + $0x800] ss:$20 sps:$4 sm:$0xff]  }
  0xac   :  { %2557 = vmatpush2.bf16.msra.mxu1 %v4048_v2  ;;  %2603 = vmatprep.subr.bf16.mxu0 %v4053_v3  ;;  %v4132_v2 = vld [vmem:[%s5578_s1 + $0x760] ss:$20 sps:$4 sm:$0xff]   ;;  %v4137_v3 = vld [vmem:[%s5578_s1 + $0x7dc] ss:$20 sps:$4 sm:$0xff]  }
  0xad   :  { %2558 = vmatprep.subr.bf16.mxu1 %v4056_v5  ;;  %v4140_v5 = vld [vmem:[%s5578_s1 + $0x73c] ss:$20 sps:$4 sm:$0xff]  }
  0xaf   :  { %2604 = vmatpush1.bf16.msra.mxu0 %v4051_v6  ;;  %v4138_v6 = vld [vmem:[%s5578_s1 + $0x738] ss:$20 sps:$4 sm:$0xff]  }
  0xb0   :  { %2559 = vmatpush2.bf16.msra.mxu1 %v4054_v7  ;;  %2605 = vmatprep.subr.bf16.mxu0 %v4059_v8  ;;  %v4143_v7 = vld [vmem:[%s5578_s1 + $0x7b4] ss:$20 sps:$4 sm:$0xff]  }
  0xb1   :  { %2560 = vmatprep.subr.bf16.mxu1 %v4062_v9  ;;  %v4146_v8 = vld [vmem:[%s5578_s1 + $0x714] ss:$20 sps:$4 sm:$0xff]   ;;  %v4141_v9 = vld [vmem:[%s5578_s1 + $0x7b0] ss:$20 sps:$4 sm:$0xff]  }
  0xb3   :  { %2606 = vmatpush2.bf16.msra.mxu0 %v4057_v10  ;;  %v4144_v10 = vld [vmem:[%s5578_s1 + $0x710] ss:$20 sps:$4 sm:$0xff]  }
  0xb4   :  { %2561 = vmatpush2.bf16.msra.mxu1 %v4060_v11  ;;  %2607 = vmatprep.subr.bf16.mxu0 %v4065_v12  ;;  %v4149_v11 = vld [vmem:[%s5578_s1 + $0x78c] ss:$20 sps:$4 sm:$0xff]  }
  0xb5   :  { %2562 = vmatprep.subr.bf16.mxu1 %v4068_v13  ;;  %v4152_v12 = vld [vmem:[%s5578_s1 + $0x6ec] ss:$20 sps:$4 sm:$0xff]   ;;  %v4147_v13 = vld [vmem:[%s5578_s1 + $0x788] ss:$20 sps:$4 sm:$0xff]  }
  0xb7   :  { %2608 = vmatpush2.bf16.msra.mxu0 %v4063_v14  ;;  %v4150_v14 = vld [vmem:[%s5578_s1 + $0x6e8] ss:$20 sps:$4 sm:$0xff]  }
  0xb8   :  { %2563 = vmatpush2.bf16.msra.mxu1 %v4066_v15  ;;  %2609 = vmatprep.subr.bf16.mxu0 %v4071_v16  ;;  %v4155_v15 = vld [vmem:[%s5578_s1 + $0x9e4] ss:$20 sps:$4 sm:$0xff]  }
  0xb9   :  { %2564 = vmatprep.subr.bf16.mxu1 %v4074_v17  ;;  %v4158_v16 = vld [vmem:[%s5578_s1 + $0x6c4] ss:$20 sps:$4 sm:$0xff]   ;;  %v4153_v17 = vld [vmem:[%s5578_s1 + $0x9e0] ss:$20 sps:$4 sm:$0xff]  }
  0xbb   :  { %2610 = vmatpush2.bf16.msra.mxu0 %v4069_v18  ;;  %v4156_v18 = vld [vmem:[%s5578_s1 + $0x6c0] ss:$20 sps:$4 sm:$0xff]  }
  0xbc   :  { %2565 = vmatpush2.bf16.msra.mxu1 %v4072_v19  ;;  %2611 = vmatprep.subr.bf16.mxu0 %v4077_v21  ;;  %v4161_v19 = vld [vmem:[%s5578_s1 + $0x9bc] ss:$20 sps:$4 sm:$0xff]  }
  0xbd   :  { %2566 = vmatprep.subr.bf16.mxu1 %v4080_v22  ;;  %v4164_v21 = vld [vmem:[%s5578_s1 + $0x69c] ss:$20 sps:$4 sm:$0xff]   ;;  %v4159_v22 = vld [vmem:[%s5578_s1 + $0x9b8] ss:$20 sps:$4 sm:$0xff]  }
  0xbf   :  { %2612 = vmatpush2.bf16.msra.mxu0 %v4075_v23  ;;  %v4162_v23 = vld [vmem:[%s5578_s1 + $0x698] ss:$20 sps:$4 sm:$0xff]  }
  0xc0   :  { %2567 = vmatpush2.bf16.msra.mxu1 %v4078_v24  ;;  %2613 = vmatprep.subr.bf16.mxu0 %v4083_v25  ;;  %v4167_v24 = vld [vmem:[%s5578_s1 + $0x994] ss:$20 sps:$4 sm:$0xff]  }
  0xc1   :  { %2642 = vmatprep.subr.bf16.mxu1 %v4086_v28  ;;  %v4170_v25 = vld [vmem:[%s5578_s1 + $0x674] ss:$20 sps:$4 sm:$0xff]   ;;  %v4165_v28 = vld [vmem:[%s5578_s1 + $0x990] ss:$20 sps:$4 sm:$0xff]  }
  0xc3   :  { %2569 = vmatmul.mubr.bf16.vlgmr.msra.gmra.mxu1 %v4513_v4  ;;  %2614 = vmatpush2.bf16.msra.mxu0 %v4081_v31  ;;  %v4093_v4 = vld [vmem:[%s5578_s1 + $0x3f0] ss:$20 sps:$4 sm:$0xff]  }
  0xc4   :  { %2643 = vmatpush1.bf16.msra.mxu1 %v4084_v32  ;;  %2615 = vmatprep.subr.bf16.mxu0 %v4089_v33  ;;  %v4168_v31 = vld [vmem:[%s5578_s1 + $0x670] ss:$20 sps:$4 sm:$0xff]   ;;  %v4173_v32 = vld [vmem:[%s5578_s1 + $0x96c] ss:$20 sps:$4 sm:$0xff]  }
  0xc5   :  { %2644 = vmatprep.subr.bf16.mxu1 %v4092_v34  ;;  %2578 = vmatprep.mubr.bf16.mxu1 %v4582_v26  ;;  %v4099_v26 = vld [vmem:[%s5578_s1 + $0x3c8] ss:$20 sps:$4 sm:$0xff]   ;;  %v4176_v33 = vld [vmem:[%s5578_s1 + $0x64c] ss:$20 sps:$4 sm:$0xff]  }
  0xc6   :  { %v4171_v34 = vld [vmem:[%s5578_s1 + $0x968] ss:$20 sps:$4 sm:$0xff]  }
  0xc7   :  { %2616 = vmatpush2.bf16.msra.mxu0 %v4087_v36  ;;  %v4174_v36 = vld [vmem:[%s5578_s1 + $0x648] ss:$20 sps:$4 sm:$0xff]  }
  0xc8   :  { %2645 = vmatpush1.bf16.msra.mxu1 %v4090_v38  ;;  %2617 = vmatprep.subr.bf16.mxu0 %v4095_v39  ;;  %v4179_v38 = vld [vmem:[%s5578_s1 + $0x944] ss:$20 sps:$4 sm:$0xff]   ;;  %v4188_v39 = vld [vmem:[%s5578_s1 + $0xa34] ss:$20 sps:$4 sm:$0xff]  }
  0xc9   :  { %2646 = vmatprep.subr.bf16.mxu1 %v4098_v49  ;;  %v4177_v49 = vld [vmem:[%s5578_s1 + $0x940] ss:$20 sps:$4 sm:$0xff]  }
  0xcb   :  { %2579 = vmatmul.mubr.bf16.gmra.mxu1 %v4587_v27  ;;  %2618 = vmatpush2.bf16.msra.mxu0 %v4093_v4  ;;  %v4108_v27 = vld [vmem:[%s5578_s1 + $0x580] ss:$20 sps:$4 sm:$0xff]   ;;  %v4182_v4 = vld [vmem:[%s5578_s1 + $0x91c] ss:$20 sps:$4 sm:$0xff]  }
  0xcc   :  { %2647 = vmatpush1.bf16.msra.mxu1 %v4096_v40  ;;  %2619 = vmatprep.subr.bf16.mxu0 %v4101_v42  ;;  %v4186_v40 = vld [vmem:[%s5578_s1 + $0xa30] ss:$20 sps:$4 sm:$0xff]   ;;  %v4194_v42 = vld [vmem:[%s5578_s1 + $0xa0c] ss:$20 sps:$4 sm:$0xff]  }
  0xcd   :  { %2648 = vmatprep.subr.bf16.mxu1 %v4104_v44  ;;  %2674 = vmatprep.mubr.bf16.mxu1 %v4636_v41  ;;  %v4111_v41 = vld [vmem:[%s5578_s1 + $0x878] ss:$20 sps:$4 sm:$0xff]   ;;  %v5191_v44 = vld [vmem:[%s5577_s0 + $0x10] ss:$36 sps:$4 sm:$0xff]  }
  0xcf   :  { %2620 = vmatpush2.bf16.msra.mxu0 %v4099_v26  ;;  %v4180_v26 = vld [vmem:[%s5578_s1 + $0x918] ss:$20 sps:$4 sm:$0xff]  }
  0xd0   :  { %2649 = vmatpush1.bf16.msra.mxu1 %v4102_v45  ;;  %2695 = vmatprep.subr.bf16.mxu0 %v4107_v46  ;;  %v4185_v45 = vld [vmem:[%s5578_s1 + $0x8f4] ss:$20 sps:$4 sm:$0xff]  }
  0xd1   :  { %2650 = vmatprep.subr.bf16.mxu1 %v4110_v48  ;;  %v4192_v46 = vld [vmem:[%s5578_s1 + $0xa08] ss:$20 sps:$4 sm:$0xff]  }
  0xd2   :  { %2622 = vmatmul.mubr.bf16.vlgmr.msra.gmra.mxu0 %v5036_v54  ;;  %v4197_v48 = vld [vmem:[%s5578_s1 + $0x4e8] ss:$20 sps:$4 sm:$0xff]  }
  0xd3   :  { %2696 = vmatpush1.bf16.msra.mxu0 %v4105_v51  ;;  %2631 = vmatprep.mubr.bf16.mxu0 %v4596_v29  ;;  %v4123_v29 = vld [vmem:[%s5578_s1 + $0x828] ss:$20 sps:$4 sm:$0xff]   ;;  %v4191_v51 = vld [vmem:[%s5578_s1 + $0x8cc] ss:$20 sps:$4 sm:$0xff]  }
  0xd4   :  { %2651 = vmatpush1.bf16.msra.mxu1 %v4108_v27  ;;  %2697 = vmatprep.subr.bf16.mxu0 %v4113_v52  ;;  %v4189_v27 = vld [vmem:[%s5578_s1 + $0x8c8] ss:$20 sps:$4 sm:$0xff]  }
  0xd5   :  { %2652 = vmatprep.subr.bf16.mxu1 %v4116_v53  ;;  %v4195_v52 = vld [vmem:[%s5578_s1 + $0x268] ss:$20 sps:$4 sm:$0xff]  }
  0xd6   :  { %v4196_v53 = vld [vmem:[%s5578_s1 + $0x128] ss:$20 sps:$4 sm:$0xff]  }
  0xd7   :  { %2698 = vmatpush1.bf16.msra.mxu0 %v4111_v41  ;;  %v4199_v41 = vld [vmem:[%s5578_s1 + $0x240] ss:$20 sps:$4 sm:$0xff]  }
  0xd8   :  { %2653 = vmatpush1.bf16.msra.mxu1 %v4114_v55  ;;  %2699 = vmatprep.subr.bf16.mxu0 %v4119_v56  ;;  %v4201_v55 = vld [vmem:[%s5578_s1 + $0x4c0] ss:$20 sps:$4 sm:$0xff]   ;;  %v5236_v56 = vld [vmem:[%s5577_s0 + $0x18] ss:$36 sps:$4 sm:$0xff]  }
  0xd9   :  { %2654 = vmatprep.subr.bf16.mxu1 %v4122_v57  ;;  %v4200_v57 = vld [vmem:[%s5578_s1 + $0x100] ss:$20 sps:$4 sm:$0xff]  }
  0xda   :  { %2632 = vmatmul.mubr.bf16.gmra.mxu0 %v5070_v62 }
  0xdb   :  { %2700 = vmatpush1.bf16.msra.mxu0 %v4117_v58  ;;  %2727 = vmatprep.mubr.bf16.mxu0 %v4644_v43  ;;  %v4135_v43 = vld [vmem:[%s5578_s1 + $0x7d8] ss:$20 sps:$4 sm:$0xff]   ;;  %v4202_v58 = vld [vmem:[%s5578_s1 + $0x380] ss:$20 sps:$4 sm:$0xff]  }
  0xdc   :  { %2655 = vmatpush1.bf16.msra.mxu1 %v4120_v59  ;;  %2701 = vmatprep.subr.bf16.mxu0 %v4125_v60  ;;  %v4203_v59 = vld [vmem:[%s5578_s1 + $0x218] ss:$20 sps:$4 sm:$0xff]   ;;  %v5256_v60 = vld [vmem:[%s5577_s0 + $0x64] ss:$36 sps:$4 sm:$0xff]  }
  0xdd   :  { %2656 = vmatprep.subr.bf16.mxu1 %v4128_v50  ;;  %v4204_v50 = vld [vmem:[%s5578_s1 + $0xd8] ss:$20 sps:$4 sm:$0xff]  }
  0xdf   :  { %2702 = vmatpush1.bf16.msra.mxu0 %v4123_v29  ;;  %v4206_v29 = vld [vmem:[%s5578_s1 + $0x358] ss:$20 sps:$4 sm:$0xff]  }
  0xe0   :  { %2657 = vmatpush1.bf16.msra.mxu1 %v4126_v61  ;;  %2703 = vmatprep.subr.bf16.mxu0 %v4131_v63  ;;  %v4207_v61 = vld [vmem:[%s5578_s1 + $0x1f0] ss:$20 sps:$4 sm:$0xff]  }
  0xe1   :  { %2658 = vmatprep.subr.bf16.mxu1 %v4134_v0  ;;  %v5275_v63 = vld [vmem:[%s5577_s0 + $0x60] ss:$36 sps:$4 sm:$0xff]  }
  0xe2   :  { %v4208_v0 = vld [vmem:[%s5578_s1 + $0xb0] ss:$20 sps:$4 sm:$0xff]  }
  0xe3   :  { %2704 = vmatpush1.bf16.msra.mxu0 %v4129_v1  ;;  %v4210_v1 = vld [vmem:[%s5578_s1 + $0x330] ss:$20 sps:$4 sm:$0xff]  }
  0xe4   :  { %2659 = vmatpush2.bf16.msra.mxu1 %v4132_v2  ;;  %2705 = vmatprep.subr.bf16.mxu0 %v4137_v3  ;;  %v4211_v2 = vld [vmem:[%s5578_s1 + $0x1c8] ss:$20 sps:$4 sm:$0xff]  }
  0xe5   :  { %2660 = vmatprep.subr.bf16.mxu1 %v4140_v5  ;;  %v4267_v3 = vld [vmem:[%s5577_s0 + $0x4] ss:$36 sps:$4 sm:$0xff]   ;;  %v4268_v5 = vld [vmem:[%s5577_s0 + $0xc] ss:$36 sps:$4 sm:$0xff]  }
  0xe7   :  { %2706 = vmatpush1.bf16.msra.mxu0 %v4135_v43  ;;  %v4212_v43 = vld [vmem:[%s5578_s1 + $0x88] ss:$20 sps:$4 sm:$0xff]  }
  0xe8   :  { %2661 = vmatpush2.bf16.msra.mxu1 %v4138_v6  ;;  %2707 = vmatprep.subr.bf16.mxu0 %v4143_v7  ;;  %v4214_v6 = vld [vmem:[%s5578_s1 + $0x308] ss:$20 sps:$4 sm:$0xff]   ;;  %v4215_v7 = vld [vmem:[%s5578_s1 + $0x1a0] ss:$20 sps:$4 sm:$0xff]  }
  0xe9   :  { %2662 = vmatprep.subr.bf16.mxu1 %v4146_v8  ;;  %v4217_v8 = vld [vmem:[%s5578_s1 + $0x420] ss:$20 sps:$4 sm:$0xff]  }
  0xeb   :  { %2708 = vmatpush1.bf16.msra.mxu0 %v4141_v9  ;;  %v4216_v9 = vld [vmem:[%s5578_s1 + $0x60] ss:$20 sps:$4 sm:$0xff]  }
  0xec   :  { %2663 = vmatpush2.bf16.msra.mxu1 %v4144_v10  ;;  %2709 = vmatprep.subr.bf16.mxu0 %v4149_v11  ;;  %v4218_v10 = vld [vmem:[%s5578_s1 + $0x2e0] ss:$20 sps:$4 sm:$0xff]   ;;  %v4219_v11 = vld [vmem:[%s5578_s1 + $0x178] ss:$20 sps:$4 sm:$0xff]  }
  0xed   :  { %2664 = vmatprep.subr.bf16.mxu1 %v4152_v12  ;;  %v4221_v12 = vld [vmem:[%s5578_s1 + $0x3f8] ss:$20 sps:$4 sm:$0xff]  }
  0xef   :  { %2710 = vmatpush1.bf16.msra.mxu0 %v4147_v13 }
  0xf0   :  { %2665 = vmatpush2.bf16.msra.mxu1 %v4150_v14  ;;  %2711 = vmatprep.subr.bf16.mxu0 %v4155_v15  ;;  %v4220_v15 = vld [vmem:[%s5578_s1 + $0x38] ss:$20 sps:$4 sm:$0xff]  }
  0xf1   :  { %2666 = vmatprep.subr.bf16.mxu1 %v4158_v16  ;;  %v4222_v16 = vld [vmem:[%s5578_s1 + $0x2b8] ss:$20 sps:$4 sm:$0xff]  }
  0xf3   :  { %2712 = vmatpush2.bf16.msra.mxu0 %v4153_v17  ;;  %v4223_v17 = vld [vmem:[%s5578_s1 + $0x150] ss:$20 sps:$4 sm:$0xff]  }
  0xf4   :  { %2667 = vmatpush2.bf16.msra.mxu1 %v4156_v18  ;;  %2713 = vmatprep.subr.bf16.mxu0 %v4161_v19  ;;  %v4225_v18 = vld [vmem:[%s5578_s1 + $0x3d0] ss:$20 sps:$4 sm:$0xff]  }
  0xf5   :  { %2668 = vmatprep.subr.bf16.mxu1 %v4164_v21 }
  0xf7   :  { %2714 = vmatpush2.bf16.msra.mxu0 %v4159_v22  ;;  %v4224_v22 = vld [vmem:[%s5578_s1 + $0x10] ss:$20 sps:$4 sm:$0xff]  }
  0xf8   :  { %2669 = vmatpush2.bf16.msra.mxu1 %v4162_v23  ;;  %2715 = vmatprep.subr.bf16.mxu0 %v4167_v24  ;;  %v4226_v23 = vld [vmem:[%s5578_s1 + $0x290] ss:$20 sps:$4 sm:$0xff]   ;;  %v4227_v24 = vld [vmem:[%s5578_s1 + $0x768] ss:$20 sps:$4 sm:$0xff]  }
  0xf9   :  { %2670 = vmatprep.subr.bf16.mxu1 %v4170_v25  ;;  %v4229_v25 = vld [vmem:[%s5578_s1 + $0x9e8] ss:$20 sps:$4 sm:$0xff]  }
  0xfb   :  { %2716 = vmatpush2.bf16.msra.mxu0 %v4165_v28 }
  0xfc   :  { %2671 = vmatpush2.bf16.msra.mxu1 %v4168_v31  ;;  %2717 = vmatprep.subr.bf16.mxu0 %v4173_v32  ;;  %v4228_v32 = vld [vmem:[%s5578_s1 + $0x628] ss:$20 sps:$4 sm:$0xff]  }
  0xfd   :  { %2672 = vmatprep.subr.bf16.mxu1 %v4176_v33  ;;  %v4230_v33 = vld [vmem:[%s5578_s1 + $0x8a8] ss:$20 sps:$4 sm:$0xff]  }
  0xff   :  { %2718 = vmatpush2.bf16.msra.mxu0 %v4171_v34  ;;  %v4231_v34 = vld [vmem:[%s5578_s1 + $0x740] ss:$20 sps:$4 sm:$0xff]  }
 0x100   :  { %2673 = vmatpush2.bf16.msra.mxu1 %v4174_v36  ;;  %2719 = vmatprep.subr.bf16.mxu0 %v4179_v38  ;;  %v4233_v36 = vld [vmem:[%s5578_s1 + $0x9c0] ss:$20 sps:$4 sm:$0xff]  }
 0x101   :  { %2760 = vmatprep.subr.bf16.mxu1 %v4188_v39 }
 0x102   :  { %v5322_v13 = vpop.f32.mrf.mxu0 }
 0x103   :  { %2675 = vmatmul.mubr.bf16.vlgmr.msra.gmra.mxu1 %v5191_v44  ;;  %2720 = vmatpush2.bf16.msra.mxu0 %v4177_v49  ;;  %v5324_v14 = vpop.f32.mrf.mxu1  ;;  %v4269_v49 = vld [vmem:[%s5577_s0] ss:$36 sps:$4 sm:$0xff]  }
 0x104   :  { %2684 = vmatprep.mubr.bf16.mxu1 %v4762_v20  ;;  %2721 = vmatprep.subr.bf16.mxu0 %v4182_v4  ;;  %v4183_v20 = vld [vmem:[%s5578_s1 + $0x8f0] ss:$20 sps:$4 sm:$0xff]   ;;  %v5338_v19 = vpop.f32.mrf.mxu0  ;;  %v4232_v4 = vld [vmem:[%s5578_s1 + $0x600] ss:$20 sps:$4 sm:$0xff]  }
 0x105   :  { %2761 = vmatpush1.bf16.msra.mxu1 %v4186_v40  ;;  %v5340_v21 = vpop.f32.mrf.mxu1  ;;  %v4234_v40 = vld [vmem:[%s5578_s1 + $0x880] ss:$20 sps:$4 sm:$0xff]  }
 0x106   :  { %2762 = vmatprep.subr.bf16.mxu1 %v4194_v42  ;;  %v5354_v28 = vpop.f32.mrf.mxu0 }
 0x107   :  { %2722 = vmatpush2.bf16.msra.mxu0 %v4180_v26  ;;  %v5356_v31 = vpop.f32.mrf.mxu1 }
 0x108   :  { %2723 = vmatprep.subr.bf16.mxu0 %v4185_v45  ;;  %v5370_v38 = vpop.f32.mrf.mxu0  ;;  %v4237_v45 = vld [vmem:[%s5578_s1 + $0x998] ss:$20 sps:$4 sm:$0xff]  }
 0x109   :  { %2763 = vmatpush1.bf16.msra.mxu1 %v4192_v46  ;;  %v5372_v39 = vpop.f32.mrf.mxu1  ;;  %v4270_v46 = vld [vmem:[%s5577_s0 + $0x4c] ss:$36 sps:$4 sm:$0xff]  }
 0x10a   :  { %3676 = vmatprep.subr.bf16.mxu1 %v4197_v48  ;;  %v5384_v42 = vpop.f32.mrf.mxu0  ;;  %v4271_v48 = vld [vmem:[%s5577_s0 + $0x54] ss:$36 sps:$4 sm:$0xff]  }
 0x10b   :  { %2685 = vmatmul.mubr.bf16.gmra.mxu1 %v4786_v30  ;;  %2724 = vmatpush2.bf16.msra.mxu0 %v4183_v20  ;;  %v4198_v30 = vld [vmem:[%s5578_s1 + $0x3a8] ss:$20 sps:$4 sm:$0xff]   ;;  %v5386_v26 = vpop.f32.mrf.mxu1  ;;  %v433_v20 = vlaneseq }
 0x10c   :  { %2780 = vmatprep.mubr.bf16.mxu1 %v4279_v35  ;;  %2725 = vmatprep.subr.bf16.mxu0 %v4191_v51  ;;  %v4236_v51 = vld [vmem:[%s5578_s1 + $0x5d8] ss:$20 sps:$4 sm:$0xff]  }
 0x10f   :  { %2726 = vmatpush2.bf16.msra.mxu0 %v4189_v27  ;;  %v4238_v27 = vld [vmem:[%s5578_s1 + $0x858] ss:$20 sps:$4 sm:$0xff]  }
 0x110   :  { %3648 = vmatprep.subr.bf16.mxu0 %v4195_v52  ;;  %v5406_v52 = vpop.f32.mrf.mxu0 }
 0x112   :  { %2728 = vmatmul.mubr.bf16.vlgmr.msra.gmra.mxu0 %v5236_v56 }
 0x113   :  { %3616 = vmatmul.mubr.msk.bf16.vlgmr.msra.gmra.mxu1 %vm2264_vm0, %v4809_v37  ;;  %3649 = vmatpush3.bf16.msra.mxu0 %v4196_v53  ;;  %v4205_v37 = vld [vmem:[%s5578_s1 + $0x498] ss:$20 sps:$4 sm:$0xff]   ;;  %v5408_v53 = vpop.f32.mrf.mxu1 }
 0x114   :  { %3677 = vmatpush3.bf16.msra.mxu1 %v4198_v30  ;;  %3650 = vmatprep.subr.bf16.mxu0 %v4199_v41  ;;  %v4239_v30 = vld [vmem:[%s5578_s1 + $0x6f0] ss:$20 sps:$4 sm:$0xff]  }
 0x115   :  { %3678 = vmatprep.subr.bf16.mxu1 %v4201_v55  ;;  %2737 = vmatprep.mubr.bf16.mxu0 %v5256_v60  ;;  %v4241_v41 = vld [vmem:[%s5578_s1 + $0x970] ss:$20 sps:$4 sm:$0xff]   ;;  %v4272_v55 = vld [vmem:[%s5577_s0 + $0x48] ss:$36 sps:$4 sm:$0xff]  }
 0x116   :  { %2790 = vmatprep.mubr.bf16.mxu1 %v4279_v35  ;;  %v4209_v35 = vld [vmem:[%s5578_s1 + $0x470] ss:$20 sps:$4 sm:$0xff]  }
 0x117   :  { %3651 = vmatpush3.bf16.msra.mxu0 %v4200_v57  ;;  %v5420_v57 = vshrl.u32 %v433_v20, 7 }
 0x118   :  { %3679 = vmatpush3.bf16.msra.mxu1 %v4202_v58  ;;  %3652 = vmatprep.subr.bf16.mxu0 %v4203_v59  ;;  %v4240_v58 = vld [vmem:[%s5578_s1 + $0x5b0] ss:$20 sps:$4 sm:$0xff]  }
 0x119   :  { %3680 = vmatprep.subr.bf16.mxu1 %v4205_v37  ;;  %v4242_v59 = vld [vmem:[%s5578_s1 + $0x830] ss:$20 sps:$4 sm:$0xff]   ;;  %v2319_v37 = vpop.f32.mrf.mxu0 }
 0x11a   :  { %2738 = vmatmul.mubr.bf16.gmra.mxu0 %v5275_v63 }
 0x11b   :  { %3617 = vmatmul.mubr.msk.bf16.gmra.mxu1 %vm2264_vm0, %v4841_v47  ;;  %3653 = vmatpush3.bf16.msra.mxu0 %v4204_v50  ;;  %v4213_v47 = vld [vmem:[%s5578_s1 + $0x448] ss:$20 sps:$4 sm:$0xff]   ;;  %v2372_v50 = vpop.f32.mrf.mxu1 }
 0x11c   :  { %3681 = vmatpush3.bf16.msra.mxu1 %v4206_v29  ;;  %3654 = vmatprep.subr.bf16.mxu0 %v4207_v61  ;;  %v4245_v29 = vld [vmem:[%s5578_s1 + $0x948] ss:$20 sps:$4 sm:$0xff]   ;;  %v4273_v61 = vld [vmem:[%s5577_s0 + $0x14] ss:$36 sps:$4 sm:$0xff]  }
 0x11d   :  { %3682 = vmatprep.subr.bf16.mxu1 %v4209_v35  ;;  %2833 = vmatprep.mubr.bf16.mxu0 %v4267_v3  ;;  %v4274_v35 = vld [vmem:[%s5577_s0 + $0x1c] ss:$36 sps:$4 sm:$0xff]   ;;  %v2321_v3 = vpop.f32.mrf.mxu0 }
 0x11e   :  { %2882 = vmatprep.mubr.bf16.mxu1 %v4268_v5  ;;  %v2374_v5 = vpop.f32.mrf.mxu1 }
 0x11f   :  { %3655 = vmatpush3.bf16.msra.mxu0 %v4208_v0  ;;  %v5443_v0 = vld [vmem:[%s5579_s2] ss:$2 sm:$0x1f] }
 0x120   :  { %3683 = vmatpush3.bf16.msra.mxu1 %v4210_v1  ;;  %3656 = vmatprep.subr.bf16.mxu0 %v4211_v2  ;;  %v435_v1 = vsub.s32 0, %v5420_v57  ;;  %v4244_v2 = vld [vmem:[%s5578_s1 + $0x588] ss:$20 sps:$4 sm:$0xff]  }
 0x121   :  { %3684 = vmatprep.subr.bf16.mxu1 %v4213_v47  ;;  %v4246_v47 = vld [vmem:[%s5578_s1 + $0x808] ss:$20 sps:$4 sm:$0xff]  }
 0x123   :  { %3657 = vmatpush3.bf16.msra.mxu0 %v4212_v43  ;;  %v4247_v43 = vld [vmem:[%s5578_s1 + $0x6a0] ss:$20 sps:$4 sm:$0xff]  }
 0x124   :  { %3685 = vmatpush3.bf16.msra.mxu1 %v4214_v6  ;;  %3658 = vmatprep.subr.bf16.mxu0 %v4215_v7  ;;  %v4249_v6 = vld [vmem:[%s5578_s1 + $0x920] ss:$20 sps:$4 sm:$0xff]   ;;  %v439_v7 = vsub.s32 1, %v5420_v57 }
 0x125   :  { %3686 = vmatprep.subr.bf16.mxu1 %v4217_v8 }
 0x127   :  { %3659 = vmatpush3.bf16.msra.mxu0 %v4216_v9 }
 0x128   :  { %3687 = vmatpush3.bf16.msra.mxu1 %v4218_v10  ;;  %3660 = vmatprep.subr.bf16.mxu0 %v4219_v11  ;;  %v436_v10 = vrot.slane %v5443_v0, %v435_v1  ;;  %v4248_v11 = vld [vmem:[%s5578_s1 + $0x560] ss:$20 sps:$4 sm:$0xff]  }
 0x129   :  { %3688 = vmatprep.subr.bf16.mxu1 %v4221_v12  ;;  %v4250_v12 = vld [vmem:[%s5578_s1 + $0x7e0] ss:$20 sps:$4 sm:$0xff]  }
 0x12b   :  { %3661 = vmatpush3.bf16.msra.mxu0 %v4220_v15 }
 0x12c   :  { %3689 = vmatpush3.bf16.msra.mxu1 %v4222_v16  ;;  %3662 = vmatprep.subr.bf16.mxu0 %v4223_v17  ;;  %v4251_v17 = vld [vmem:[%s5578_s1 + $0x678] ss:$20 sps:$4 sm:$0xff]  }
 0x12d   :  { %3690 = vmatprep.subr.bf16.mxu1 %v4225_v18  ;;  %v4253_v18 = vld [vmem:[%s5578_s1 + $0x8f8] ss:$20 sps:$4 sm:$0xff]  }
 0x12f   :  { %3663 = vmatpush3.bf16.msra.mxu0 %v4224_v22  ;;  %v440_v22 = vrot.slane %v5443_v0, %v439_v7 }
 0x130   :  { %3691 = vmatpush3.bf16.msra.mxu1 %v4226_v23  ;;  %3704 = vmatprep.subr.bf16.mxu0 %v4227_v24  ;;  %v2306_v24 = vadd.f32 %v5322_v13, %v436_v10  ;;  %v4257_v13 = vld [vmem:[%s5578_s1 + $0x8d0] ss:$20 sps:$4 sm:$0xff]  }
 0x131   :  { %3732 = vmatprep.subr.bf16.mxu1 %v4229_v25  ;;  %v4252_v25 = vld [vmem:[%s5578_s1 + $0x538] ss:$20 sps:$4 sm:$0xff]  }
 0x132   :  { %2834 = vmatmul.mubr.bf16.vlgmr.msra.gmra.mxu0 %v4269_v49  ;;  %v2308_v49 = vadd.f32 %v5338_v19, %v440_v22 }
 0x133   :  { %2883 = vmatmul.mubr.bf16.vlgmr.msra.gmra.mxu1 %v5036_v54  ;;  %3705 = vmatpush3.bf16.msra.mxu0 %v4228_v32  ;;  %v4235_v54 = vld [vmem:[%s5578_s1 + $0x718] ss:$20 sps:$4 sm:$0xff]  }
 0x134   :  { %3733 = vmatpush3.bf16.msra.mxu1 %v4230_v33  ;;  %3706 = vmatprep.subr.bf16.mxu0 %v4231_v34  ;;  %v4254_v32 = vld [vmem:[%s5578_s1 + $0x7b8] ss:$20 sps:$4 sm:$0xff]   ;;  %v2361_v19 = vadd.f32 %v5340_v21, %v2308_v49 }
 0x135   :  { %3734 = vmatprep.subr.bf16.mxu1 %v4233_v36  ;;  %2841 = vmatprep.mubr.bf16.mxu0 %v4270_v46  ;;  %v4255_v36 = vld [vmem:[%s5578_s1 + $0x650] ss:$20 sps:$4 sm:$0xff]  }
 0x136   :  { %2890 = vmatprep.mubr.bf16.mxu1 %v4271_v48  ;;  %v4258_v46 = vld [vmem:[%s5578_s1 + $0x790] ss:$20 sps:$4 sm:$0xff]  }
 0x137   :  { %3707 = vmatpush3.bf16.msra.mxu0 %v4232_v4 }
 0x138   :  { %3735 = vmatpush3.bf16.msra.mxu1 %v4234_v40  ;;  %3708 = vmatprep.subr.bf16.mxu0 %v4235_v54  ;;  %v2359_v40 = vadd.f32 %v5324_v14, %v2306_v24  ;;  %v2310_v54 = vadd.f32 %v5354_v28, %v436_v10  ;;  %v4259_v14 = vld [vmem:[%s5578_s1 + $0xa38] ss:$20 sps:$4 sm:$0xff]   ;;  %v2312_v28 = vadd.f32 %v5370_v38, %v440_v22  ;;  %v4260_v38 = vld [vmem:[%s5578_s1 + $0xa10] ss:$20 sps:$4 sm:$0xff]  }
 0x139   :  { %3736 = vmatprep.subr.bf16.mxu1 %v4237_v45  ;;  %v4256_v45 = vld [vmem:[%s5578_s1 + $0x510] ss:$20 sps:$4 sm:$0xff]  }
 0x13a   :  { %2842 = vmatmul.mubr.bf16.gmra.mxu0 %v4272_v55  ;;  %v2363_v55 = vadd.f32 %v5356_v31, %v2310_v54 }
 0x13b   :  { %2891 = vmatmul.mubr.bf16.gmra.mxu1 %v5070_v62  ;;  %3709 = vmatpush3.bf16.msra.mxu0 %v4236_v51  ;;  %v4243_v62 = vld [vmem:[%s5578_s1 + $0x6c8] ss:$20 sps:$4 sm:$0xff]  }
 0x13c   :  { %3737 = vmatpush3.bf16.msra.mxu1 %v4238_v27  ;;  %3710 = vmatprep.subr.bf16.mxu0 %v4239_v30  ;;  %v5505_v27 = vld [vmem:[%s5579_s2 + $0x1] ss:$2 sm:$0x1f]  ;;  %v2316_v30 = vadd.f32 %v5384_v42, %v436_v10  ;;  %v2365_v42 = vadd.f32 %v5372_v39, %v2312_v28 }
 0x13d   :  { %3738 = vmatprep.subr.bf16.mxu1 %v4241_v41  ;;  %2931 = vmatprep.mubr.bf16.mxu0 %v4273_v61  ;;  %v3072_v50 = vrot.slane %v5505_v27, %v435_v1  ;;  %v4275_v1 = vld [vmem:[%s5577_s0 + $0x5c] ss:$36 sps:$4 sm:$0xff]  }
 0x13e   :  { %2980 = vmatprep.mubr.bf16.mxu1 %v4274_v35  ;;  %v2369_v61 = vadd.f32 %v5386_v26, %v2316_v30 }
 0x13f   :  { %3711 = vmatpush3.bf16.msra.mxu0 %v4240_v58 }
 0x140   :  { %3739 = vmatpush3.bf16.msra.mxu1 %v4242_v59  ;;  %3712 = vmatprep.subr.bf16.mxu0 %v4243_v62  ;;  %v2318_v59 = vadd.f32 %v5406_v52, %v440_v22 }
 0x141   :  { %3740 = vmatprep.subr.bf16.mxu1 %v4245_v29  ;;  %v3076_v29 = vrot.slane %v5505_v27, %v439_v7 }
 0x142   :  { %v2411_v8 = vpop.f32.mrf.mxu0  ;;  %v2371_v39 = vadd.f32 %v5408_v53, %v2318_v59 }
 0x143   :  { %v2464_v9 = vpop.f32.mrf.mxu1  ;;  %3713 = vmatpush3.bf16.msra.mxu0 %v4244_v2  ;;  %v2412_v51 = vadd.f32 %v2411_v8, %v2359_v40 }
 0x144   :  { %3741 = vmatpush3.bf16.msra.mxu1 %v4246_v47  ;;  %v2413_v15 = vpop.f32.mrf.mxu0  ;;  %3714 = vmatprep.subr.bf16.mxu0 %v4247_v43 }
 0x145   :  { %v2466_v16 = vpop.f32.mrf.mxu1  ;;  %3742 = vmatprep.subr.bf16.mxu1 %v4249_v6  ;;  %v2414_v58 = vadd.f32 %v2413_v15, %v2361_v19  ;;  %v2465_v62 = vadd.f32 %v2464_v9, %v2412_v51  ;;  %v4278_v19 = vld [vmem:[%s5577_s0 + $0x68] ss:$36 sps:$4 sm:$0xff]  }
 0x146   :  { %v2415_v23 = vpop.f32.mrf.mxu0 }
 0x147   :  { %3715 = vmatpush3.bf16.msra.mxu0 %v4248_v11  ;;  %v2468_v34 = vpop.f32.mrf.mxu1  ;;  %v2416_v31 = vadd.f32 %v2415_v23, %v2363_v55  ;;  %v2467_v35 = vadd.f32 %v2466_v16, %v2414_v58  ;;  %v4276_v23 = vld [vmem:[%s5577_s0 + $0x58] ss:$36 sps:$4 sm:$0xff]  }
 0x148   :  { %3743 = vmatpush3.bf16.msra.mxu1 %v4250_v12  ;;  %v2417_v33 = vpop.f32.mrf.mxu0  ;;  %3716 = vmatprep.subr.bf16.mxu0 %v4251_v17 }
 0x149   :  { %3744 = vmatprep.subr.bf16.mxu1 %v4253_v18  ;;  %v2470_v48 = vpop.f32.mrf.mxu1  ;;  %v2418_v2 = vadd.f32 %v2417_v33, %v2365_v42  ;;  %v4277_v33 = vld [vmem:[%s5577_s0 + $0x20] ss:$36 sps:$4 sm:$0xff]  }
 0x14a   :  { %v2421_v4 = vpop.f32.mrf.mxu0 }
 0x14b   :  { %3717 = vmatpush3.bf16.msra.mxu0 %v4252_v25  ;;  %v2474_v37 = vpop.f32.mrf.mxu1  ;;  %v2422_v3 = vadd.f32 %v2421_v4, %v2369_v61  ;;  %v2471_v8 = vadd.f32 %v2470_v48, %v2418_v2  ;;  %v443_v61 = vsub.s32 2, %v5420_v57 }
 0x14c   :  { %3745 = vmatpush3.bf16.msra.mxu1 %v4254_v32  ;;  %v2423_v20 = vpop.f32.mrf.mxu0  ;;  %3718 = vmatprep.subr.bf16.mxu0 %v4255_v36 }
 0x14d   :  { %3746 = vmatprep.subr.bf16.mxu1 %v4257_v13  ;;  %v2476_v5 = vpop.f32.mrf.mxu1  ;;  %v2424_v6 = vadd.f32 %v2423_v20, %v2371_v39  ;;  %v2475_v11 = vadd.f32 %v2474_v37, %v2422_v3 }
 0x14e   :  { %v2425_v41 = vpop.f32.mrf.mxu0 }
 0x14f   :  { %3719 = vmatpush3.bf16.msra.mxu0 %v4256_v45  ;;  %v2478_v12 = vpop.f32.mrf.mxu1  ;;  %v2477_v22 = vadd.f32 %v2476_v5, %v2424_v6 }
 0x150   :  { %3747 = vmatpush3.bf16.msra.mxu1 %v4258_v46  ;;  %v2427_v21 = vpop.f32.mrf.mxu0  ;;  %3764 = vmatprep.subr.bf16.mxu0 %v4259_v14  ;;  %v3080_v12 = vrot.slane %v5505_v27, %v443_v61 }
 0x152   :  { %2932 = vmatmul.mubr.bf16.vlgmr.msra.gmra.mxu0 %v5191_v44  ;;  %v2517_v52 = vpop.f32.mrf.mxu0  ;;  %v2469_v44 = vadd.f32 %v2468_v34, %v2416_v31  ;;  %v2480_v34 = vpop.f32.mrf.mxu1 }
 0x153   :  { %2981 = vmatmul.mubr.bf16.vlgmr.msra.gmra.mxu1 %v5236_v56  ;;  %v2518_v47 = vadd.f32 %v2517_v52, %v2465_v62  ;;  %3765 = vmatpush3.bf16.msra.mxu0 %v4259_v14 }
 0x154   :  { %2939 = vmatprep.mubr.bf16.mxu0 %v4275_v1  ;;  %v2519_v43 = vpop.f32.mrf.mxu0  ;;  %3766 = vmatprep.subr.bf16.mxu0 %v4260_v38  ;;  %v444_v1 = vrot.slane %v5443_v0, %v443_v61 }
 0x155   :  { %2988 = vmatprep.mubr.bf16.mxu1 %v5256_v60  ;;  %v3094_v26 = vmul.f32 %v3072_v50, %v2518_v47  ;;  %v2520_v56 = vadd.f32 %v2519_v43, %v2467_v35  ;;  %vm3046_vm1 = vcmp.gt.f32.partialorder %v2518_v47, 0.0  ;;  %v447_v35 = vsub.s32 3, %v5420_v57 }
 0x156   :  { %v2521_v7 = vpop.f32.mrf.mxu0 }
 0x157   :  { %vm3047_vm2 = vcmp.gt.f32.partialorder %v2520_v56, 0.0  ;;  %v3095_v9 = vmul.f32 %v3076_v29, %v2520_v56  ;;  %v2522_v10 = vadd.f32 %v2521_v7, %v2469_v44  ;;  %3767 = vmatpush3.bf16.msra.mxu0 %v4260_v38  ;;  %v3114_v15 = vsel %vm3046_vm1, %v2518_v47, %v3094_v26 }
 0x158   :  { %v2523_v53 = vpop.f32.mrf.mxu0  ;;  %v448_v3 = vrot.slane %v5443_v0, %v447_v35 }
 0x159   :  { %v3115_v16 = vsel %vm3047_vm2, %v2520_v56, %v3095_v9  ;;  %v3099_v17 = vmul.f32 %v3072_v50, %v2522_v10  ;;  %v2524_v18 = vadd.f32 %v2523_v53, %v2471_v8  ;;  %vm3051_vm3 = vcmp.gt.f32.partialorder %v2522_v10, 0.0 }
 0x15a   :  { %v3636_v60 = vpack.c.bf16 %v3115_v16, %v3114_v15  ;;  %2940 = vmatmul.mubr.bf16.gmra.mxu0 %v4276_v23  ;;  %v2527_v24 = vpop.f32.mrf.mxu0  ;;  %v3084_v23 = vrot.slane %v5505_v27, %v447_v35 }
 0x15b   :  { %2989 = vmatmul.mubr.bf16.gmra.mxu1 %v5275_v63  ;;  %vm3052_vm4 = vcmp.gt.f32.partialorder %v2524_v18, 0.0  ;;  %v3100_v25 = vmul.f32 %v3076_v29, %v2524_v18  ;;  %v2528_v32 = vadd.f32 %v2527_v24, %v2475_v11  ;;  %3768 = vmatprep.mubr.msk.bf16.mxu0 %vm2264_vm0, %v4277_v33  ;;  %v3119_v13 = vsel %vm3051_vm3, %v2522_v10, %v3099_v17 }
 0x15c   :  { %3228 = vst [vmem:[%s5580_s3] sm:$0xff] %v3636_v60  ;;  %v2529_v36 = vpop.f32.mrf.mxu0 }
 0x15d   :  { %v3120_v49 = vsel %vm3052_vm4, %v2524_v18, %v3100_v25  ;;  %v3104_v4 = vmul.f32 %v3072_v50, %v2528_v32  ;;  %v2530_v40 = vadd.f32 %v2529_v36, %v2477_v22  ;;  %vm3056_vm5 = vcmp.gt.f32.partialorder %v2528_v32, 0.0 }
 0x15e   :  { %v3639_v63 = vpack.c.bf16 %v3120_v49, %v3119_v13  ;;  %v2531_v54 = vpop.f32.mrf.mxu0 }
 0x15f   :  { %vm3057_vm6 = vcmp.gt.f32.partialorder %v2530_v40, 0.0  ;;  %v3105_v45 = vmul.f32 %v3076_v29, %v2530_v40  ;;  %v3124_v48 = vsel %vm3056_vm5, %v2528_v32, %v3104_v4 }
 0x160   :  { %3232 = vst [vmem:[%s5580_s3 + $0x14] sm:$0xff] %v3639_v63  ;;  %v2533_v46 = vpop.f32.mrf.mxu0 }
 0x161   :  { %v3125_v20 = vsel %vm3057_vm6, %v2530_v40, %v3105_v45 }
 0x162   :  { %v3642_v14 = vpack.c.bf16 %v3125_v20, %v3124_v48  ;;  %3769 = vmatmul.mubr.msk.bf16.vlgmr.msra.gmra.mxu0 %vm2264_vm0, %v4278_v19 }
 0x164   :  { %3236 = vst [vmem:[%s5580_s3 + $0x28] sm:$0xff] %v3642_v14 }
 0x183   :  { %v2570_v28 = vpop.f32.mrf.mxu1 }
 0x184   :  { %v2571_v44 = vadd.f32 %v2570_v28, %v444_v1 }
 0x185   :  { %v2572_v51 = vpop.f32.mrf.mxu1 }
 0x186   :  { %v2573_v56 = vadd.f32 %v2572_v51, %v448_v3 }
 0x187   :  { %v2574_v30 = vpop.f32.mrf.mxu1 }
 0x188   :  { %v2575_v9 = vadd.f32 %v2574_v30, %v444_v1 }
 0x189   :  { %v2576_v41 = vpop.f32.mrf.mxu1 }
 0x18a   :  { %v2577_v17 = vadd.f32 %v2576_v41, %v448_v3 }
 0x18b   :  { %v2580_v55 = vpop.f32.mrf.mxu1 }
 0x18c   :  { %v2581_v53 = vadd.f32 %v2580_v55, %v444_v1 }
 0x18d   :  { %v2582_v59 = vpop.f32.mrf.mxu1 }
 0x18e   :  { %v2583_v24 = vadd.f32 %v2582_v59, %v448_v3 }
 0x18f   :  { %v2584_v21 = vpop.f32.mrf.mxu1 }
 0x191   :  { %v2586_v50 = vpop.f32.mrf.mxu1 }
 0x192   :  { %v2623_v58 = vpop.f32.mrf.mxu0 }
 0x193   :  { %v2624_v6 = vadd.f32 %v2623_v58, %v2571_v44 }
 0x194   :  { %v2625_v37 = vpop.f32.mrf.mxu0 }
 0x195   :  { %v2626_v10 = vadd.f32 %v2625_v37, %v2573_v56 }
 0x196   :  { %v2627_v38 = vpop.f32.mrf.mxu0 }
 0x197   :  { %v2628_v18 = vadd.f32 %v2627_v38, %v2575_v9 }
 0x198   :  { %v2629_v42 = vpop.f32.mrf.mxu0 }
 0x199   :  { %v2630_v33 = vadd.f32 %v2629_v42, %v2577_v17 }
 0x19a   :  { %v2633_v31 = vpop.f32.mrf.mxu0 }
 0x19b   :  { %v2634_v49 = vadd.f32 %v2633_v31, %v2581_v53 }
 0x19c   :  { %v2635_v2 = vpop.f32.mrf.mxu0 }
 0x19d   :  { %v2636_v48 = vadd.f32 %v2635_v2, %v2583_v24 }
 0x19e   :  { %v2637_v5 = vpop.f32.mrf.mxu0 }
 0x1a0   :  { %v2639_v7 = vpop.f32.mrf.mxu0 }
 0x1c3   :  { %v2676_v62 = vpop.f32.mrf.mxu1 }
 0x1c4   :  { %v2677_v11 = vadd.f32 %v2676_v62, %v2624_v6 }
 0x1c5   :  { %v2678_v29 = vpop.f32.mrf.mxu1 }
 0x1c6   :  { %v2679_v22 = vadd.f32 %v2678_v29, %v2626_v10 }
 0x1c7   :  { %v2680_v52 = vpop.f32.mrf.mxu1 }
 0x1c8   :  { %v2681_v34 = vadd.f32 %v2680_v52, %v2628_v18 }
 0x1c9   :  { %v2682_v47 = vpop.f32.mrf.mxu1 }
 0x1ca   :  { %v2683_v63 = vadd.f32 %v2682_v47, %v2630_v33 }
 0x1cb   :  { %v2686_v39 = vpop.f32.mrf.mxu1 }
 0x1cc   :  { %v2687_v19 = vadd.f32 %v2686_v39, %v2634_v49 }
 0x1cd   :  { %v2688_v43 = vpop.f32.mrf.mxu1 }
 0x1ce   :  { %v2689_v30 = vadd.f32 %v2688_v43, %v2636_v48 }
 0x1cf   :  { %v2690_v26 = vpop.f32.mrf.mxu1 }
 0x1d1   :  { %v2692_v8 = vpop.f32.mrf.mxu1 }
 0x1d2   :  { %v2729_v15 = vpop.f32.mrf.mxu0 }
 0x1d3   :  { %v2782_v16 = vpop.f32.mrf.mxu1  ;;  %v2730_v60 = vadd.f32 %v2729_v15, %v2677_v11 }
 0x1d4   :  { %v2731_v25 = vpop.f32.mrf.mxu0 }
 0x1d5   :  { %v2784_v32 = vpop.f32.mrf.mxu1  ;;  %v2732_v36 = vadd.f32 %v2731_v25, %v2679_v22  ;;  %v2783_v13 = vadd.f32 %v2782_v16, %v2730_v60  ;;  %v451_v25 = vsub.s32 4, %v5420_v57 }
 0x1d6   :  { %v2733_v4 = vpop.f32.mrf.mxu0 }
 0x1d7   :  { %v2786_v40 = vpop.f32.mrf.mxu1  ;;  %v3096_v54 = vmul.f32 %v3080_v12, %v2783_v13  ;;  %v2734_v45 = vadd.f32 %v2733_v4, %v2681_v34  ;;  %v2785_v46 = vadd.f32 %v2784_v32, %v2732_v36  ;;  %vm3048_vm7 = vcmp.gt.f32.partialorder %v2783_v13, 0.0 }
 0x1d8   :  { %v2735_v20 = vpop.f32.mrf.mxu0 }
 0x1d9   :  { %v2788_v14 = vpop.f32.mrf.mxu1  ;;  %vm3049_vm8 = vcmp.gt.f32.partialorder %v2785_v46, 0.0  ;;  %v3097_v28 = vmul.f32 %v3084_v23, %v2785_v46  ;;  %v2736_v51 = vadd.f32 %v2735_v20, %v2683_v63  ;;  %v2787_v41 = vadd.f32 %v2786_v40, %v2734_v45 }
 0x1da   :  { %v2739_v55 = vpop.f32.mrf.mxu0  ;;  %v3116_v59 = vsel %vm3048_vm7, %v2783_v13, %v3096_v54  ;;  %v452_v13 = vrot.slane %v5443_v0, %v451_v25 }
 0x1db   :  { %v2792_v58 = vpop.f32.mrf.mxu1  ;;  %v3117_v37 = vsel %vm3049_vm8, %v2785_v46, %v3097_v28  ;;  %v2740_v21 = vadd.f32 %v2739_v55, %v2687_v19  ;;  %v2789_v38 = vadd.f32 %v2788_v14, %v2736_v51  ;;  %vm3053_vm9 = vcmp.gt.f32.partialorder %v2787_v41, 0.0 }
 0x1dc   :  { %v3637_v50 = vpack.c.bf16 %v3117_v37, %v3116_v59  ;;  %v3101_v42 = vmul.f32 %v3080_v12, %v2787_v41  ;;  %v2741_v62 = vpop.f32.mrf.mxu0 }
 0x1dd   :  { %v2794_v31 = vpop.f32.mrf.mxu1  ;;  %vm3054_vm10 = vcmp.gt.f32.partialorder %v2789_v38, 0.0  ;;  %v3102_v29 = vmul.f32 %v3084_v23, %v2789_v38  ;;  %v2742_v61 = vadd.f32 %v2741_v62, %v2689_v30  ;;  %v2793_v52 = vadd.f32 %v2792_v58, %v2740_v21 }
 0x1de   :  { %3230 = vst [vmem:[%s5580_s3 + $0x8] sm:$0xff] %v3637_v50  ;;  %v2743_v35 = vpop.f32.mrf.mxu0  ;;  %v3121_v47 = vsel %vm3053_vm9, %v2787_v41, %v3101_v42 }
 0x1df   :  { %v2796_v2 = vpop.f32.mrf.mxu1  ;;  %v3122_v1 = vsel %vm3054_vm10, %v2789_v38, %v3102_v29  ;;  %v3106_v3 = vmul.f32 %v3080_v12, %v2793_v52  ;;  %v2795_v5 = vadd.f32 %v2794_v31, %v2742_v61  ;;  %vm3058_vm11 = vcmp.gt.f32.partialorder %v2793_v52, 0.0 }
 0x1e0   :  { %v3640_v39 = vpack.c.bf16 %v3122_v1, %v3121_v47  ;;  %v2745_v43 = vpop.f32.mrf.mxu0  ;;  %v3088_v1 = vrot.slane %v5505_v27, %v451_v25 }
 0x1e1   :  { %v2798_v44 = vpop.f32.mrf.mxu1  ;;  %vm3059_vm12 = vcmp.gt.f32.partialorder %v2795_v5, 0.0  ;;  %v3107_v26 = vmul.f32 %v3084_v23, %v2795_v5  ;;  %v3126_v56 = vsel %vm3058_vm11, %v2793_v52, %v3106_v3 }
 0x1e2   :  { %3234 = vst [vmem:[%s5580_s3 + $0x1c] sm:$0xff] %v3640_v39 }
 0x1e3   :  { %v3127_v6 = vsel %vm3059_vm12, %v2795_v5, %v3107_v26 }
 0x1e4   :  { %v3643_v7 = vpack.c.bf16 %v3127_v6, %v3126_v56 }
 0x1e6   :  { %3238 = vst [vmem:[%s5580_s3 + $0x30] sm:$0xff] %v3643_v7 }
 0x1f2   :  { %v3664_v8 = vpop.f32.mrf.mxu0 }
 0x1f3   :  { %v3692_v9 = vpop.f32.mrf.mxu1 }
 0x1f4   :  { %v3665_v10 = vpop.f32.mrf.mxu0 }
 0x1f5   :  { %v3693_v11 = vpop.f32.mrf.mxu1  ;;  %v3666_v49 = vadd.f32 %v3665_v10, %v3664_v8 }
 0x1f6   :  { %v3667_v12 = vpop.f32.mrf.mxu0  ;;  %v3694_v46 = vadd.f32 %v3693_v11, %v3692_v9 }
 0x1f7   :  { %v3695_v53 = vpop.f32.mrf.mxu1  ;;  %v2836_v48 = vadd.f32 %v3666_v49, %v452_v13 }
 0x1f8   :  { %v3668_v15 = vpop.f32.mrf.mxu0 }
 0x1f9   :  { %v3696_v16 = vpop.f32.mrf.mxu1  ;;  %v3669_v20 = vadd.f32 %v3668_v15, %v3667_v12  ;;  %v2885_v55 = vadd.f32 %v3694_v46, %v2836_v48 }
 0x1fa   :  { %v3670_v17 = vpop.f32.mrf.mxu0  ;;  %v3697_v59 = vadd.f32 %v3696_v16, %v3695_v53 }
 0x1fb   :  { %v3698_v18 = vpop.f32.mrf.mxu1  ;;  %v2839_v58 = vadd.f32 %v3669_v20, %v452_v13 }
 0x1fc   :  { %v3671_v22 = vpop.f32.mrf.mxu0 }
 0x1fd   :  { %v3699_v60 = vpop.f32.mrf.mxu1  ;;  %v3672_v4 = vadd.f32 %v3671_v22, %v3670_v17  ;;  %v2888_v35 = vadd.f32 %v3697_v59, %v2839_v58 }
 0x1fe   :  { %v3673_v23 = vpop.f32.mrf.mxu0  ;;  %v3700_v19 = vadd.f32 %v3699_v60, %v3698_v18 }
 0x1ff   :  { %v3701_v24 = vpop.f32.mrf.mxu1  ;;  %v2844_v14 = vadd.f32 %v3672_v4, %v452_v13 }
 0x200   :  { %v3674_v32 = vpop.f32.mrf.mxu0 }
 0x201   :  { %v3702_v33 = vpop.f32.mrf.mxu1  ;;  %v2893_v0 = vadd.f32 %v3700_v19, %v2844_v14 }
 0x212   :  { %v3720_v34 = vpop.f32.mrf.mxu0 }
 0x213   :  { %v3748_v36 = vpop.f32.mrf.mxu1 }
 0x214   :  { %v3721_v40 = vpop.f32.mrf.mxu0 }
 0x215   :  { %v3749_v63 = vpop.f32.mrf.mxu1  ;;  %v3722_v41 = vadd.f32 %v3721_v40, %v3720_v34 }
 0x216   :  { %v3723_v54 = vpop.f32.mrf.mxu0  ;;  %v3750_v61 = vadd.f32 %v3749_v63, %v3748_v36 }
 0x217   :  { %v3751_v45 = vpop.f32.mrf.mxu1  ;;  %v2934_v29 = vadd.f32 %v3722_v41, %v2885_v55 }
 0x218   :  { %v3724_v28 = vpop.f32.mrf.mxu0 }
 0x219   :  { %v3752_v51 = vpop.f32.mrf.mxu1  ;;  %v3725_v42 = vadd.f32 %v3724_v28, %v3723_v54  ;;  %v2983_v26 = vadd.f32 %v3750_v61, %v2934_v29 }
 0x21a   :  { %v3726_v57 = vpop.f32.mrf.mxu0  ;;  %v3753_v5 = vadd.f32 %v3752_v51, %v3751_v45 }
 0x21b   :  { %v3754_v30 = vpop.f32.mrf.mxu1  ;;  %v2937_v3 = vadd.f32 %v3725_v42, %v2888_v35 }
 0x21c   :  { %v3727_v37 = vpop.f32.mrf.mxu0 }
 0x21d   :  { %v3755_v21 = vpop.f32.mrf.mxu1  ;;  %v3728_v38 = vadd.f32 %v3727_v37, %v3726_v57  ;;  %v2986_v9 = vadd.f32 %v3753_v5, %v2937_v3 }
 0x21e   :  { %v3756_v50 = vadd.f32 %v3755_v21, %v3754_v30  ;;  %v3729_v62 = vpop.f32.mrf.mxu0 }
 0x21f   :  { %v3757_v31 = vpop.f32.mrf.mxu1  ;;  %v2942_v52 = vadd.f32 %v3728_v38, %v2893_v0 }
 0x220   :  { %v3730_v2 = vpop.f32.mrf.mxu0 }
 0x221   :  { %v3758_v47 = vpop.f32.mrf.mxu1  ;;  %v2991_v39 = vadd.f32 %v3756_v50, %v2942_v52 }
 0x222   :  { %v3770_v43 = vpop.f32.mrf.mxu0 }
 0x223   :  { %v3040_v44 = vadd.f32 %v3770_v43, %v2991_v39 }
 0x224   :  { %v3031_v56 = vpop.f32.mrf.mxu0 }
 0x225   :  { %vm3060_vm13 = vcmp.gt.f32.partialorder %v3040_v44, 0.0  ;;  %v3108_v6 = vmul.f32 %v3088_v1, %v3040_v44  ;;  %v3032_v7 = vadd.f32 %v3031_v56, %v2983_v26 }
 0x226   :  { %v3771_v8 = vpop.f32.mrf.mxu0 }
 0x227   :  { %v3128_v10 = vsel %vm3060_vm13, %v3040_v44, %v3108_v6  ;;  %vm3050_vm15 = vcmp.gt.f32.partialorder %v3032_v7, 0.0  ;;  %v3098_v11 = vmul.f32 %v3088_v1, %v3032_v7 }
 0x228   :  { %v3644_v12 = vpack.c.bf16 %v3128_v10, %v3128_v10  ;;  %v3034_v53 = vpop.f32.mrf.mxu0 }
 0x229   :  { %v3118_v15 = vsel %vm3050_vm15, %v3032_v7, %v3098_v11  ;;  %v3035_v27 = vadd.f32 %v3034_v53, %v2986_v9 }
 0x22a   :  { %3207 = vst.msk [vmem:[#allocation2 + $0x38] sm:$0xf] %vm3200_vm14, %v3644_v12  ;;  %v3638_v16 = vpack.c.bf16 %v3118_v15, %v3118_v15 }
 0x22b   :  { %vm3055_vm0 = vcmp.gt.f32.partialorder %v3035_v27, 0.0  ;;  %v3103_v17 = vmul.f32 %v3088_v1, %v3035_v27 }
 0x22c   :  { %3201 = vst.msk [vmem:[#allocation2 + $0x10] sm:$0xf] %vm3200_vm14, %v3638_v16 }
 0x22d   :  { %v3123_v18 = vsel %vm3055_vm0, %v3035_v27, %v3103_v17 }
 0x22e   :  { %v3641_v22 = vpack.c.bf16 %v3123_v18, %v3123_v18 }
 0x230   :  { %3204 = vst.msk [vmem:[#allocation2 + $0x24] sm:$0xf] %vm3200_vm14, %v3641_v22 }
 0x231   :  { %v3253_v60 = vld [vmem:[#allocation2 + $0x38] sm:$0xf] }
 0x232   :  { %3635 = vst [vmem:[%s5580_s3 + $0x38] sm:$0xf] %v3253_v60 }
 0x233   :  { %v3249_v23 = vld [vmem:[#allocation2 + $0x10] sm:$0xf] }
 0x234   :  { %3633 = vst [vmem:[%s5580_s3 + $0x10] sm:$0xf] %v3249_v23 }
 0x237   :  { %v3251_v24 = vld [vmem:[#allocation2 + $0x24] sm:$0xf] }
 0x238   :  { %3634 = vst [vmem:[%s5580_s3 + $0x24] sm:$0xf] %v3251_v24 }

// kernel: tile.53
= control target key start
LH: loop header
LB: loop body
LE: loop exit
PB: predicated region body
PF: predicated region fallthrough
CT: control target
= control target key end

     0   :  { %s22_s0 = inlined_call_operand.vmem [shape: f32[64], index: 0, kind: input, shape index: {}]   ;;  %s23_s1 = inlined_call_operand.vmem [shape: f32[2,64], index: 1, kind: output, shape index: {}]  }
   0x1   :  { %v4_v0 = vld [vmem:[%s22_s0] ss:$0 sm:$0xff] }
   0x2   :  { %5 = vst [vmem:[%s23_s1] sm:$0x3] %v4_v0 }

// kernel: tile.58
= control target key start
LH: loop header
LB: loop body
LE: loop exit
PB: predicated region body
PF: predicated region fallthrough
CT: control target
= control target key end

     0   :  { %vm8_vm0 = vcmask 523264   ;;  %vm14_vm1 = vcmask 1048064   ;;  %s42_s0 = inlined_call_operand.vmem [shape: f32[2,64], index: 0, kind: input, shape index: {}]   ;;  %s43_s1 = inlined_call_operand.vmem [shape: f32[1,128], index: 1, kind: output, shape index: {}]  }
   0x1   :  { %v5_v0 = vld [vmem:[%s42_s0] sm:$0x3]  ;;  %s25_s0 = smov 64  }
   0x2   :  { %6 = vst [vmem:[#allocation1] sm:$0x3] %v5_v0 }
   0x9   :  { %v11_v1 = vld [vmem:[#allocation1 + $0x1] sm:$0x1]   ;;  %v7_v2 = vld [vmem:[#allocation1] sm:$0x1]  }
   0xa   :  { %12 = vrot.lane.b32.xlu0 %v11_v1, %s25_s0  ;;  %9 = vst.msk [vmem:[#allocation0] sm:$0x1] %vm8_vm0, %v7_v2  }
  0x7c   :  { %v13_v3 = vpop.permute.xlu0 %12  }
  0x7d   :  { %15 = vst.msk [vmem:[#allocation0] sm:$0x1] %vm14_vm1, %v13_v3  }
  0x84   :  { %v20_v4 = vld [vmem:[#allocation0] sm:$0x1] }
  0x85   :  { %23 = vst [vmem:[%s43_s1] sm:$0x1] %v20_v4 }

// kernel: onet_forward.6
= control target key start
LH: loop header
LB: loop body
LE: loop exit
PB: predicated region body
PF: predicated region fallthrough
CT: control target
= control target key end

     0   :  { %v139_v29 = vlaneseq  ;;  %v858_v34 = vmov 1983009808   ;;  %s1050_s0 = inlined_call_operand.vmem [shape: bf16[4,768], index: 0, kind: input, shape index: {}]   ;;  %s1051_s1 = inlined_call_operand.vmem [shape: bf16[768,128], index: 1, kind: input, shape index: {}]   ;;  %s1052_s2 = inlined_call_operand.vmem [shape: f32[2,128], index: 2, kind: input, shape index: {}]   ;;  %s1053_s3 = inlined_call_operand.vmem [shape: bf16[4,128], index: 3, kind: output, shape index: {}]  }
   0x1   :  { %v802_v0 = vld [vmem:[%s1051_s1 + $0x78] sm:$0xff]   ;;  %v806_v4 = vld [vmem:[%s1051_s1 + $0x70] sm:$0xff]   ;;  %v810_v8 = vld [vmem:[%s1051_s1 + $0x68] sm:$0xff]   ;;  %v137_v35 = vunpack.c.l.s4 %v858_v34 }
   0x2   :  { %v803_v1 = vld [vmem:[%s1051_s1 + $0x38] sm:$0xff]   ;;  %735 = vmatprep.subr.bf16.mxu0 %v802_v0  ;;  %v807_v5 = vld [vmem:[%s1051_s1 + $0x30] sm:$0xff]   ;;  %v811_v9 = vld [vmem:[%s1051_s1 + $0x28] sm:$0xff]   ;;  %v140_v36 = vshrl.u32 %v139_v29, 7 }
   0x3   :  { %v804_v2 = vld [vmem:[%s1051_s1 + $0xf8] sm:$0xff]   ;;  %736 = vmatpush3.bf16.msra.mxu0 %v803_v1  ;;  %v808_v6 = vld [vmem:[%s1051_s1 + $0xf0] sm:$0xff]   ;;  %v812_v10 = vld [vmem:[%s1051_s1 + $0xe8] sm:$0xff]   ;;  %v138_v38 = vunpack.c.0.s8 %v137_v35 }
   0x4   :  { %v805_v3 = vld [vmem:[%s1051_s1 + $0xb8] sm:$0xff]   ;;  %757 = vmatprep.subr.bf16.mxu1 %v804_v2  ;;  %737 = vmatprep.subr.bf16.mxu0 %v806_v4  ;;  %v809_v7 = vld [vmem:[%s1051_s1 + $0xb0] sm:$0xff]   ;;  %v813_v11 = vld [vmem:[%s1051_s1 + $0xa8] sm:$0xff]  }
   0x5   :  { %758 = vmatpush3.bf16.msra.mxu1 %v805_v3  ;;  %v814_v12 = vld [vmem:[%s1051_s1 + $0x60] sm:$0xff]   ;;  %v818_v16 = vld [vmem:[%s1051_s1 + $0x58] sm:$0xff]   ;;  %v822_v20 = vld [vmem:[%s1051_s1 + $0x50] sm:$0xff]   ;;  %v141_v42 = vsub.s32 %v138_v38, %v140_v36 }
   0x6   :  { %759 = vmatprep.subr.bf16.mxu1 %v808_v6  ;;  %v815_v13 = vld [vmem:[%s1051_s1 + $0x20] sm:$0xff]   ;;  %v819_v17 = vld [vmem:[%s1051_s1 + $0x18] sm:$0xff]   ;;  %v823_v21 = vld [vmem:[%s1051_s1 + $0x10] sm:$0xff]  }
   0x7   :  { %738 = vmatpush3.bf16.msra.mxu0 %v807_v5  ;;  %v816_v14 = vld [vmem:[%s1051_s1 + $0xe0] sm:$0xff]   ;;  %v820_v18 = vld [vmem:[%s1051_s1 + $0xd8] sm:$0xff]   ;;  %v824_v22 = vld [vmem:[%s1051_s1 + $0xd0] sm:$0xff]  }
   0x8   :  { %739 = vmatprep.subr.bf16.mxu0 %v810_v8  ;;  %v817_v15 = vld [vmem:[%s1051_s1 + $0xa0] sm:$0xff]   ;;  %v821_v19 = vld [vmem:[%s1051_s1 + $0x98] sm:$0xff]   ;;  %v825_v23 = vld [vmem:[%s1051_s1 + $0x90] sm:$0xff]  }
   0x9   :  { %760 = vmatpush3.bf16.msra.mxu1 %v809_v7  ;;  %v826_v24 = vld [vmem:[%s1051_s1 + $0x48] sm:$0xff]   ;;  %v830_v28 = vld [vmem:[%s1051_s1 + $0x40] sm:$0xff]   ;;  %v838_v39 = vld [vmem:[%s1051_s1 + $0x178] sm:$0xff]  }
   0xa   :  { %761 = vmatprep.subr.bf16.mxu1 %v812_v10  ;;  %v827_v25 = vld [vmem:[%s1051_s1 + $0x8] sm:$0xff]   ;;  %v831_v30 = vld [vmem:[%s1051_s1] sm:$0xff]   ;;  %v841_v50 = vld [vmem:[%s1051_s1 + $0x138] sm:$0xff]  }
   0xb   :  { %740 = vmatpush3.bf16.msra.mxu0 %v811_v9  ;;  %v828_v26 = vld [vmem:[%s1051_s1 + $0xc8] sm:$0xff]   ;;  %v832_v31 = vld [vmem:[%s1051_s1 + $0xc0] sm:$0xff]   ;;  %v842_v52 = vld [vmem:[%s1051_s1 + $0x170] sm:$0xff]  }
   0xc   :  { %741 = vmatprep.subr.bf16.mxu0 %v814_v12  ;;  %v829_v27 = vld [vmem:[%s1051_s1 + $0x88] sm:$0xff]   ;;  %v835_v33 = vld [vmem:[%s1050_s0 + $0x18] ss:$12 sps:$4 sm:$0xff]   ;;  %v843_v53 = vld [vmem:[%s1051_s1 + $0x130] sm:$0xff]  }
   0xd   :  { %762 = vmatpush3.bf16.msra.mxu1 %v813_v11  ;;  %v833_v32 = vld [vmem:[%s1050_s0] ss:$12 sps:$4 sm:$0xff]   ;;  %v839_v40 = vld [vmem:[%s1050_s0 + $0x4] ss:$12 sps:$4 sm:$0xff]   ;;  %v840_v41 = vld [vmem:[%s1050_s0 + $0x1c] ss:$12 sps:$4 sm:$0xff]   ;;  %v156_v44 = vrot.slane %v835_v33, %v141_v42 }
   0xe   :  { %763 = vmatprep.subr.bf16.mxu1 %v816_v14  ;;  %v837_v37 = vld [vmem:[%s1051_s1 + $0x80] sm:$0xff]   ;;  %v142_v43 = vrot.slane %v833_v32, %v141_v42  ;;  %v149_v45 = vrot.slane %v839_v40, %v141_v42  ;;  %v163_v46 = vrot.slane %v840_v41, %v141_v42  ;;  %v844_v54 = vld [vmem:[%s1051_s1 + $0x168] sm:$0xff]   ;;  %v848_v60 = vld [vmem:[%s1051_s1 + $0x158] sm:$0xff]  }
   0xf   :  { %742 = vmatpush3.bf16.msra.mxu0 %v815_v13  ;;  %v845_v55 = vld [vmem:[%s1051_s1 + $0x128] sm:$0xff]   ;;  %v846_v56 = vld [vmem:[%s1051_s1 + $0x160] sm:$0xff]   ;;  %v849_v63 = vld [vmem:[%s1051_s1 + $0x118] sm:$0xff]  }
  0x10   :  { %743 = vmatprep.subr.bf16.mxu0 %v818_v16  ;;  %v165_v47 = vcombine.high %v142_v43, %v156_v44  ;;  %v164_v48 = vcombine.low %v142_v43, %v156_v44  ;;  %v167_v49 = vcombine.high %v149_v45, %v163_v46  ;;  %v166_v51 = vcombine.low %v149_v45, %v163_v46  ;;  %v847_v57 = vld [vmem:[%s1051_s1 + $0x120] sm:$0xff]   ;;  %v856_v58 = vld [vmem:[%s1050_s0 + $0x8] ss:$12 sps:$4 sm:$0xff]  }
  0x11   :  { %764 = vmatpush3.bf16.msra.mxu1 %v817_v15  ;;  %v857_v59 = vld [vmem:[%s1050_s0 + $0x20] ss:$12 sps:$4 sm:$0xff]   ;;  %v176_v61 = vrot.slane %v856_v58, %v141_v42  ;;  %v850_v1 = vld [vmem:[%s1051_s1 + $0x150] sm:$0xff]  }
  0x12   :  { %765 = vmatprep.subr.bf16.mxu1 %v820_v18  ;;  %512 = vmatprep.mubr.bf16.mxu0 %v165_v47  ;;  %v183_v62 = vrot.slane %v857_v59, %v141_v42  ;;  %v851_v2 = vld [vmem:[%s1051_s1 + $0x110] sm:$0xff]   ;;  %v852_v3 = vld [vmem:[%s1051_s1 + $0x148] sm:$0xff]   ;;  %v854_v5 = vld [vmem:[%s1051_s1 + $0x140] sm:$0xff]  }
  0x13   :  { %744 = vmatpush3.bf16.msra.mxu0 %v819_v17  ;;  %553 = vmatprep.mubr.bf16.mxu1 %v167_v49  ;;  %v853_v4 = vld [vmem:[%s1051_s1 + $0x108] sm:$0xff]   ;;  %v855_v6 = vld [vmem:[%s1051_s1 + $0x100] sm:$0xff]  }
  0x14   :  { %745 = vmatprep.subr.bf16.mxu0 %v822_v20  ;;  %v185_v0 = vcombine.high %v176_v61, %v183_v62  ;;  %v184_v7 = vcombine.low %v176_v61, %v183_v62  ;;  %v682_v14 = vld [vmem:[%s1052_s2] ss:$0 sm:$0xff]  ;;  %v731_v29 = vld [vmem:[%s1052_s2 + $0x1] ss:$0 sm:$0xff] }
  0x15   :  { %766 = vmatpush3.bf16.msra.mxu1 %v821_v19 }
  0x16   :  { %767 = vmatprep.subr.bf16.mxu1 %v824_v22 }
  0x17   :  { %746 = vmatpush3.bf16.msra.mxu0 %v823_v21 }
  0x18   :  { %747 = vmatprep.subr.bf16.mxu0 %v826_v24 }
  0x19   :  { %768 = vmatpush3.bf16.msra.mxu1 %v825_v23 }
  0x1a   :  { %769 = vmatprep.subr.bf16.mxu1 %v828_v26 }
  0x1b   :  { %748 = vmatpush3.bf16.msra.mxu0 %v827_v25 }
  0x1c   :  { %749 = vmatprep.subr.bf16.mxu0 %v830_v28 }
  0x1d   :  { %770 = vmatpush3.bf16.msra.mxu1 %v829_v27 }
  0x1e   :  { %771 = vmatprep.subr.bf16.mxu1 %v832_v31 }
  0x1f   :  { %750 = vmatpush3.bf16.msra.mxu0 %v831_v30 }
  0x20   :  { %779 = vmatprep.subr.bf16.mxu0 %v838_v39 }
  0x21   :  { %772 = vmatpush3.bf16.msra.mxu1 %v837_v37 }
  0x22   :  { %513 = vmatmul.mubr.bf16.vlgmr.msra.gmra.mxu0 %v164_v48 }
  0x23   :  { %780 = vmatpush3.bf16.msra.mxu0 %v841_v50  ;;  %594 = vmatprep.mubr.bf16.mxu0 %v185_v0 }
  0x24   :  { %554 = vmatmul.mubr.bf16.vlgmr.msra.gmra.mxu1 %v166_v51  ;;  %781 = vmatprep.subr.bf16.mxu0 %v842_v52 }
  0x27   :  { %782 = vmatpush3.bf16.msra.mxu0 %v843_v53 }
  0x28   :  { %783 = vmatprep.subr.bf16.mxu0 %v844_v54 }
  0x2b   :  { %784 = vmatpush3.bf16.msra.mxu0 %v845_v55 }
  0x2c   :  { %785 = vmatprep.subr.bf16.mxu0 %v846_v56 }
  0x2f   :  { %786 = vmatpush3.bf16.msra.mxu0 %v847_v57 }
  0x30   :  { %787 = vmatprep.subr.bf16.mxu0 %v848_v60 }
  0x33   :  { %788 = vmatpush3.bf16.msra.mxu0 %v849_v63 }
  0x34   :  { %789 = vmatprep.subr.bf16.mxu0 %v850_v1 }
  0x37   :  { %790 = vmatpush3.bf16.msra.mxu0 %v851_v2 }
  0x38   :  { %791 = vmatprep.subr.bf16.mxu0 %v852_v3 }
  0x3b   :  { %792 = vmatpush3.bf16.msra.mxu0 %v853_v4 }
  0x3c   :  { %793 = vmatprep.subr.bf16.mxu0 %v854_v5 }
  0x3f   :  { %794 = vmatpush3.bf16.msra.mxu0 %v855_v6 }
  0x42   :  { %595 = vmatmul.mubr.bf16.vlgmr.msra.gmra.mxu0 %v184_v7 }
  0xe2   :  { %v751_v8 = vpop.f32.mrf.mxu0 }
  0xe4   :  { %v752_v9 = vpop.f32.mrf.mxu0  ;;  %v773_v10 = vpop.f32.mrf.mxu1 }
  0xe5   :  { %v753_v13 = vadd.f32 %v752_v9, %v751_v8 }
  0xe6   :  { %v754_v11 = vpop.f32.mrf.mxu0  ;;  %v774_v12 = vpop.f32.mrf.mxu1 }
  0xe7   :  { %v515_v17 = vadd.f32 %v753_v13, %v682_v14  ;;  %v775_v18 = vadd.f32 %v774_v12, %v773_v10 }
  0xe8   :  { %v755_v15 = vpop.f32.mrf.mxu0  ;;  %v776_v16 = vpop.f32.mrf.mxu1 }
  0xe9   :  { %v756_v19 = vadd.f32 %v755_v15, %v754_v11  ;;  %v556_v23 = vadd.f32 %v775_v18, %v515_v17 }
  0xea   :  { %v777_v20 = vpop.f32.mrf.mxu1 }
  0xeb   :  { %v518_v24 = vadd.f32 %v756_v19, %v682_v14  ;;  %v778_v25 = vadd.f32 %v777_v20, %v776_v16 }
  0xed   :  { %v559_v31 = vadd.f32 %v778_v25, %v518_v24 }
 0x102   :  { %v795_v21 = vpop.f32.mrf.mxu0 }
 0x104   :  { %v796_v22 = vpop.f32.mrf.mxu0 }
 0x105   :  { %v797_v26 = vadd.f32 %v796_v22, %v795_v21 }
 0x106   :  { %v798_v27 = vpop.f32.mrf.mxu0 }
 0x107   :  { %v597_v28 = vadd.f32 %v797_v26, %v556_v23 }
 0x108   :  { %v799_v30 = vpop.f32.mrf.mxu0 }
 0x109   :  { %v800_v32 = vadd.f32 %v799_v30, %v798_v27  ;;  %v610_v33 = vmul.f32 %v731_v29, %v597_v28  ;;  %vm603_vm0 = vcmp.gt.f32.partialorder %v597_v28, 0.0 }
 0x10b   :  { %v600_v34 = vadd.f32 %v800_v32, %v559_v31  ;;  %v612_v36 = vsel %vm603_vm0, %v597_v28, %v610_v33 }
 0x10d   :  { %vm604_vm1 = vcmp.gt.f32.partialorder %v600_v34, 0.0  ;;  %v611_v35 = vmul.f32 %v731_v29, %v600_v34 }
 0x10f   :  { %v613_v37 = vsel %vm604_vm1, %v600_v34, %v611_v35 }
 0x110   :  { %v614_v38 = vpack.c.bf16 %v613_v37, %v612_v36 }
 0x112   :  { %733 = vst.sshfl [vmem:[#allocation2] sm:$0x3 pattern:$0x76325410] %v614_v38 }
 0x119   :  { %v659_v39 = vld [vmem:[#allocation2] sm:$0x3] }
 0x11a   :  { %660 = vst [vmem:[%s1053_s3] sm:$0x3] %v659_v39 }

// kernel: onet_forward.7
= control target key start
LH: loop header
LB: loop body
LE: loop exit
PB: predicated region body
PF: predicated region fallthrough
CT: control target
= control target key end

     0   :  { %v751_v1 = vmov 0.0   ;;  %vm752_vm0 = vmmov 0   ;;  %v63_v3 = vlaneseq  ;;  %v753_v13 = vmov 1966171168   ;;  %s962_s0 = inlined_call_operand.vmem [shape: bf16[2,64], index: 0, kind: input, shape index: {}]   ;;  %s963_s1 = inlined_call_operand.vmem [shape: bf16[64,128], index: 1, kind: input, shape index: {}]   ;;  %s964_s2 = inlined_call_operand.vmem [shape: f32[2,128], index: 2, kind: input, shape index: {}]   ;;  %s965_s3 = inlined_call_operand.vmem [shape: bf16[128,256], index: 3, kind: input, shape index: {}]   ;;  %s966_s4 = inlined_call_operand.vmem [shape: f32[2,256], index: 4, kind: input, shape index: {}]   ;;  %s967_s5 = inlined_call_operand.vmem [shape: bf16[256,6], index: 5, kind: input, shape index: {}]   ;;  %s968_s6 = inlined_call_operand.vmem [shape: f32[1,6], index: 6, kind: input, shape index: {}]   ;;  %s969_s7 = inlined_call_operand.vmem [shape: f32[2,6], index: 7, kind: output, shape index: {}]  }
   0x1   :  { %v699_v0 = vld [vmem:[%s963_s1 + $0x18] sm:$0xff]   ;;  %683 = vmatprep.subr.bf16.mxu0 %v751_v1  ;;  %v700_v2 = vld [vmem:[%s963_s1 + $0x10] sm:$0xff]   ;;  %691 = vmatprep.mubr.msk.bf16.mxu0 %vm752_vm0, %v751_v1  ;;  %v701_v4 = vld [vmem:[%s963_s1 + $0x8] sm:$0xff]   ;;  %v61_v14 = vunpack.c.l.s4 %v753_v13  ;;  %vm129_vm1 = vcmask 523264   ;;  %v754_v48 = vmov 0   ;;  %vm545_vm9 = vcmask 48128  }
   0x2   :  { %684 = vmatpush3.bf16.msra.mxu0 %v699_v0  ;;  %v27_v5 = vld [vmem:[%s962_s0] sm:$0x1]  ;;  %v28_v6 = vld [vmem:[%s962_s0 + $0x1] sm:$0x1]  ;;  %v29_v7 = vld [vmem:[%s962_s0 + $0x2] sm:$0x1]  ;;  %326 = vmatprep.mubr.bf16.mxu1 %v754_v48 }
   0x3   :  { %685 = vmatprep.subr.bf16.mxu0 %v751_v1  ;;  %v30_v8 = vld [vmem:[%s962_s0 + $0x3] sm:$0x1]  ;;  %v31_v9 = vld [vmem:[%s962_s0 + $0x4] sm:$0x1]  ;;  %v32_v10 = vld [vmem:[%s962_s0 + $0x5] sm:$0x1]  ;;  %v56_v17 = vcombine.low %v27_v5, %v28_v6  ;;  %v62_v22 = vunpack.c.0.s8 %v61_v14 }
   0x4   :  { %v33_v11 = vld [vmem:[%s962_s0 + $0x6] sm:$0x1]  ;;  %v34_v12 = vld [vmem:[%s962_s0 + $0x7] sm:$0x1]  ;;  %v829_v15 = vshrl.u32 %v63_v3, 7  ;;  %v57_v19 = vcombine.low %v29_v7, %v30_v8  ;;  %v58_v20 = vcombine.low %v31_v9, %v32_v10  ;;  %v727_v49 = vld [vmem:[%s967_s5 + $0x78] sm:$0xff]  }
   0x5   :  { %v703_v16 = vld [vmem:[%s965_s3 + $0x74] ss:$8 sps:$4 sm:$0xff]   ;;  %v705_v18 = vld [vmem:[%s965_s3 + $0x70] ss:$8 sps:$4 sm:$0xff]   ;;  %v59_v21 = vcombine.low %v33_v11, %v34_v12  ;;  %v706_v23 = vld [vmem:[%s965_s3 + $0x64] ss:$8 sps:$4 sm:$0xff]  }
   0x6   :  { %686 = vmatpush3.bf16.msra.mxu0 %v700_v2  ;;  %294 = vmatprep.subr.bf16.mxu1 %v703_v16  ;;  %v702_v24 = vld [vmem:[%s963_s1] sm:$0xff]   ;;  %v65_v26 = vsub.s32 %v62_v22, %v829_v15  ;;  %v709_v27 = vld [vmem:[%s965_s3 + $0x54] ss:$8 sps:$4 sm:$0xff]   ;;  %v711_v32 = vld [vmem:[%s965_s3 + $0x50] ss:$8 sps:$4 sm:$0xff]   ;;  %v210_v16 = vsub.s32 1, %v829_v15 }
   0x7   :  { %687 = vmatprep.subr.bf16.mxu0 %v751_v1  ;;  %295 = vmatpush1.bf16.msra.mxu1 %v705_v18  ;;  %v708_v25 = vld [vmem:[%s965_s3 + $0x60] ss:$8 sps:$4 sm:$0xff]   ;;  %v712_v33 = vld [vmem:[%s965_s3 + $0x44] ss:$8 sps:$4 sm:$0xff]   ;;  %v715_v39 = vld [vmem:[%s965_s3 + $0x34] ss:$8 sps:$4 sm:$0xff]  }
   0x8   :  { %296 = vmatprep.subr.bf16.mxu1 %v706_v23  ;;  %v66_v28 = vrot.slane %v56_v17, %v65_v26  ;;  %v73_v29 = vrot.slane %v57_v19, %v65_v26  ;;  %v80_v30 = vrot.slane %v58_v20, %v65_v26  ;;  %v87_v31 = vrot.slane %v59_v21, %v65_v26  ;;  %v714_v36 = vld [vmem:[%s965_s3 + $0x40] ss:$8 sps:$4 sm:$0xff]   ;;  %v717_v41 = vld [vmem:[%s965_s3 + $0x30] ss:$8 sps:$4 sm:$0xff]   ;;  %v718_v42 = vld [vmem:[%s965_s3 + $0x24] ss:$8 sps:$4 sm:$0xff]  }
   0x9   :  { %v720_v43 = vld [vmem:[%s965_s3 + $0x20] ss:$8 sps:$4 sm:$0xff]   ;;  %v721_v44 = vld [vmem:[%s965_s3 + $0x14] ss:$8 sps:$4 sm:$0xff]   ;;  %v723_v45 = vld [vmem:[%s965_s3 + $0x10] ss:$8 sps:$4 sm:$0xff]  }
   0xa   :  { %688 = vmatpush3.bf16.msra.mxu0 %v701_v4  ;;  %v88_v34 = vcombine.low %v66_v28, %v73_v29  ;;  %v89_v35 = vcombine.low %v80_v30, %v87_v31  ;;  %v724_v46 = vld [vmem:[%s965_s3 + $0x4] ss:$8 sps:$4 sm:$0xff]   ;;  %v726_v47 = vld [vmem:[%s965_s3] ss:$8 sps:$4 sm:$0xff]   ;;  %v728_v50 = vld [vmem:[%s967_s5 + $0x38] sm:$0xff]   ;;  %v206_v17 = vsub.s32 0, %v829_v15 }
   0xb   :  { %689 = vmatprep.subr.bf16.mxu0 %v751_v1  ;;  %297 = vmatpush1.bf16.msra.mxu1 %v708_v25  ;;  %v729_v51 = vld [vmem:[%s967_s5 + $0x70] sm:$0xff]   ;;  %v731_v53 = vld [vmem:[%s967_s5 + $0x68] sm:$0xff]   ;;  %v733_v55 = vld [vmem:[%s967_s5 + $0x60] sm:$0xff]  }
   0xc   :  { %298 = vmatprep.subr.bf16.mxu1 %v709_v27  ;;  %v96_v37 = vrot.slane %v88_v34, %v65_v26  ;;  %v103_v38 = vrot.slane %v89_v35, %v65_v26  ;;  %v730_v52 = vld [vmem:[%s967_s5 + $0x30] sm:$0xff]   ;;  %v732_v54 = vld [vmem:[%s967_s5 + $0x28] sm:$0xff]   ;;  %v734_v56 = vld [vmem:[%s967_s5 + $0x20] sm:$0xff]  }
   0xd   :  { %v735_v57 = vld [vmem:[%s967_s5 + $0x58] sm:$0xff]   ;;  %v615_v58 = vld [vmem:[%s964_s2] ss:$0 sm:$0xff]  ;;  %v621_v61 = vld [vmem:[%s964_s2 + $0x1] ss:$0 sm:$0xff] }
   0xe   :  { %690 = vmatpush3.bf16.msra.mxu0 %v702_v24  ;;  %v104_v40 = vcombine.low %v96_v37, %v103_v38  ;;  %v736_v8 = vld [vmem:[%s967_s5 + $0x18] sm:$0xff]   ;;  %v737_v9 = vld [vmem:[%s967_s5 + $0x50] sm:$0xff]   ;;  %v739_v11 = vld [vmem:[%s967_s5 + $0x48] sm:$0xff]  }
   0xf   :  { %299 = vmatpush1.bf16.msra.mxu1 %v711_v32  ;;  %661 = vmatprep.subr.bf16.mxu0 %v727_v49  ;;  %v738_v10 = vld [vmem:[%s967_s5 + $0x10] sm:$0xff]   ;;  %v740_v12 = vld [vmem:[%s967_s5 + $0x8] sm:$0xff]   ;;  %v741_v13 = vld [vmem:[%s967_s5 + $0x40] sm:$0xff]  }
  0x10   :  { %300 = vmatprep.subr.bf16.mxu1 %v712_v33  ;;  %v742_v14 = vld [vmem:[%s967_s5] sm:$0xff]  }
  0x11   :  { %692 = vmatmul.mubr.msk.bf16.vlgmr.msra.gmra.mxu0 %vm129_vm1, %v104_v40  ;;  %v202_v18 = vld [vmem:[%s966_s4] ss:$2 sm:$0x3]  ;;  %v638_v22 = vld [vmem:[%s966_s4 + $0x1] ss:$2 sm:$0x3] }
  0x12   :  { %662 = vmatpush3.bf16.msra.mxu0 %v728_v50  ;;  %v211_v19 = vrot.slane %v202_v18, %v210_v16  ;;  %v207_v20 = vrot.slane %v202_v18, %v206_v17  ;;  %v351_v25 = vrot.slane %v638_v22, %v210_v16  ;;  %v347_v27 = vrot.slane %v638_v22, %v206_v17 }
  0x13   :  { %301 = vmatpush1.bf16.msra.mxu1 %v714_v36  ;;  %663 = vmatprep.subr.bf16.mxu0 %v729_v51 }
  0x14   :  { %302 = vmatprep.subr.bf16.mxu1 %v715_v39 }
  0x16   :  { %664 = vmatpush3.bf16.msra.mxu0 %v730_v52 }
  0x17   :  { %303 = vmatpush1.bf16.msra.mxu1 %v717_v41  ;;  %665 = vmatprep.subr.bf16.mxu0 %v731_v53 }
  0x18   :  { %304 = vmatprep.subr.bf16.mxu1 %v718_v42  ;;  %v541_v42 = vand.u32 127, %v63_v3 }
  0x1a   :  { %666 = vmatpush3.bf16.msra.mxu0 %v732_v54  ;;  %vm542_vm8 = vcmp.lt.s32.totalorder %v541_v42, 2 }
  0x1b   :  { %305 = vmatpush1.bf16.msra.mxu1 %v720_v43  ;;  %667 = vmatprep.subr.bf16.mxu0 %v733_v55  ;;  %v639_v43 = vld [vmem:[%s968_s6] ss:$0 sm:$0xff] }
  0x1c   :  { %306 = vmatprep.subr.bf16.mxu1 %v721_v44 }
  0x1e   :  { %668 = vmatpush3.bf16.msra.mxu0 %v734_v56 }
  0x1f   :  { %307 = vmatpush1.bf16.msra.mxu1 %v723_v45  ;;  %669 = vmatprep.subr.bf16.mxu0 %v735_v57 }
  0x20   :  { %308 = vmatprep.subr.bf16.mxu1 %v724_v46 }
  0x22   :  { %670 = vmatpush3.bf16.msra.mxu0 %v736_v8 }
  0x23   :  { %309 = vmatpush1.bf16.msra.mxu1 %v726_v47  ;;  %671 = vmatprep.subr.bf16.mxu0 %v737_v9 }
  0x26   :  { %672 = vmatpush3.bf16.msra.mxu0 %v738_v10 }
  0x27   :  { %673 = vmatprep.subr.bf16.mxu0 %v739_v11 }
  0x2a   :  { %674 = vmatpush3.bf16.msra.mxu0 %v740_v12 }
  0x2b   :  { %675 = vmatprep.subr.bf16.mxu0 %v741_v13 }
  0x2e   :  { %676 = vmatpush3.bf16.msra.mxu0 %v742_v14 }
  0xd1   :  { %v167_v59 = vpop.f32.mrf.mxu0 }
  0xd2   :  { %v168_v60 = vadd.f32 %v615_v58, %v167_v59 }
  0xd3   :  { %v693_v62 = vpop.f32.mrf.mxu0 }
  0xd4   :  { %v181_v0 = vmul.f32 %v621_v61, %v168_v60  ;;  %vm174_vm2 = vcmp.gt.f32.partialorder %v168_v60, 0.0 }
  0xd5   :  { %v170_v63 = vpop.f32.mrf.mxu0 }
  0xd6   :  { %v171_v1 = vadd.f32 %v615_v58, %v170_v63  ;;  %v183_v5 = vsel %vm174_vm2, %v168_v60, %v181_v0 }
  0xd7   :  { %v694_v2 = vpop.f32.mrf.mxu0 }
  0xd8   :  { %vm175_vm3 = vcmp.gt.f32.partialorder %v171_v1, 0.0  ;;  %v182_v4 = vmul.f32 %v621_v61, %v171_v1 }
  0xda   :  { %v184_v6 = vsel %vm175_vm3, %v171_v1, %v182_v4 }
  0xdb   :  { %v185_v7 = vpack.c.bf16 %v184_v6, %v183_v5 }
  0xdd   :  { %327 = vmatmul.mubr.bf16.vlgmr.msra.gmra.mxu1 %v185_v7 }
 0x19d   :  { %v328_v21 = vpop.f32.mrf.mxu1 }
 0x19e   :  { %v329_v26 = vadd.f32 %v328_v21, %v207_v20 }
 0x19f   :  { %v330_v23 = vpop.f32.mrf.mxu1 }
 0x1a0   :  { %v331_v24 = vadd.f32 %v330_v23, %v211_v19  ;;  %v354_v33 = vmul.f32 %v347_v27, %v329_v26  ;;  %vm337_vm6 = vcmp.gt.f32.partialorder %v329_v26, 0.0 }
 0x1a1   :  { %v332_v28 = vpop.f32.mrf.mxu1 }
 0x1a2   :  { %v333_v29 = vadd.f32 %v332_v28, %v207_v20  ;;  %v355_v15 = vmul.f32 %v351_v25, %v331_v24  ;;  %vm338_vm5 = vcmp.gt.f32.partialorder %v331_v24, 0.0  ;;  %v358_v38 = vsel %vm337_vm6, %v329_v26, %v354_v33 }
 0x1a3   :  { %v334_v30 = vpop.f32.mrf.mxu1 }
 0x1a4   :  { %vm339_vm4 = vcmp.gt.f32.partialorder %v333_v29, 0.0  ;;  %v356_v31 = vmul.f32 %v347_v27, %v333_v29  ;;  %v335_v32 = vadd.f32 %v334_v30, %v211_v19  ;;  %v359_v36 = vsel %vm338_vm5, %v331_v24, %v355_v15 }
 0x1a6   :  { %vm340_vm7 = vcmp.gt.f32.partialorder %v335_v32, 0.0  ;;  %v357_v34 = vmul.f32 %v351_v25, %v335_v32  ;;  %v360_v35 = vsel %vm339_vm4, %v333_v29, %v356_v31 }
 0x1a7   :  { %v362_v40 = vpack.c.bf16 %v360_v35, %v358_v38 }
 0x1a8   :  { %v361_v37 = vsel %vm340_vm7, %v335_v32, %v357_v34 }
 0x1a9   :  { %v363_v39 = vpack.c.bf16 %v361_v37, %v359_v36 }
 0x1ab   :  { %531 = vmatprep.mubr.bf16.mxu0 %v363_v39 }
 0x1ac   :  { %532 = vmatmul.mubr.bf16.vlgmr.msra.gmra.mxu0 %v362_v40 }
 0x26c   :  { %v677_v41 = vpop.f32.mrf.mxu0 }
 0x26e   :  { %v678_v44 = vpop.f32.mrf.mxu0 }
 0x26f   :  { %v679_v45 = vadd.f32 %v678_v44, %v677_v41 }
 0x270   :  { %v680_v46 = vpop.f32.mrf.mxu0 }
 0x271   :  { %v534_v47 = vadd.f32 %v679_v45, %v639_v43 }
 0x272   :  { %v681_v48 = vpop.f32.mrf.mxu0 }
 0x273   :  { %v682_v49 = vadd.f32 %v681_v48, %v680_v46  ;;  %v543_v50 = vsel %vm542_vm8, %v534_v47, -inf }
 0x274   :  { %v546_v51 = vsel %vm545_vm9, %v543_v50, -inf }
 0x275   :  { %v537_v52 = vadd.f32 %v682_v49, %v639_v43  ;;  %547 = vmax.xlane.f32.xlu0 %v546_v51 }
 0x277   :  { %v544_v3 = vsel %vm542_vm8, %v537_v52, -inf }
 0x278   :  { %v549_v53 = vsel %vm545_vm9, %v544_v3, -inf }
 0x279   :  { %550 = vmax.xlane.f32.xlu0 %v549_v53 }
 0x2fe   :  { %v548_v54 = vpop.xlane.xlu0 %547 }
 0x2ff   :  { %v552_v55 = vsub.f32 %v534_v47, %v548_v54 }
 0x301   :  { %v554_v56 = vmul.f32 1.442695, %v552_v55 }
 0x302   :  { %v551_v57 = vpop.xlane.xlu0 %550 }
 0x303   :  { %743 = vpow2.f32 %v554_v56  ;;  %v553_v58 = vsub.f32 %v537_v52, %v551_v57 }
 0x305   :  { %v556_v59 = vmul.f32 1.442695, %v553_v58 }
 0x307   :  { %745 = vpow2.f32 %v556_v59 }
 0x310   :  { %v744_v60 = vpop.eup %743 }
 0x311   :  { %v558_v61 = vsel %vm542_vm8, %v744_v60, 0.0 }
 0x312   :  { %v560_v62 = vsel %vm545_vm9, %v558_v61, 0.0 }
 0x313   :  { %561 = vadd.xlane.f32.xlu1 %v560_v62 }
 0x314   :  { %v746_v63 = vpop.eup %745 }
 0x315   :  { %v559_v0 = vsel %vm542_vm8, %v746_v63, 0.0 }
 0x316   :  { %v563_v1 = vsel %vm545_vm9, %v559_v0, 0.0 }
 0x317   :  { %564 = vadd.xlane.f32.xlu1 %v563_v1 }
 0x39c   :  { %v562_v2 = vpop.xlane.xlu1 %561 }
 0x39d   :  { %747 = vrcp.f32 %v562_v2 }
 0x3a0   :  { %v565_v4 = vpop.xlane.xlu1 %564 }
 0x3a1   :  { %749 = vrcp.f32 %v565_v4 }
 0x3aa   :  { %v748_v5 = vpop.eup %747 }
 0x3ab   :  { %v567_v6 = vmul.f32 %v748_v5, %v558_v61 }
 0x3ad   :  { %v570_v7 = vsel %vm542_vm8, %v567_v6, %v534_v47 }
 0x3ae   :  { %v750_v8 = vpop.eup %749  ;;  %572 = vst.msk [vmem:[#allocation2] sm:$0xff] %vm545_vm9, %v570_v7 }
 0x3b5   :  { %v592_v9 = vld [vmem:[#allocation2] sm:$0x3] }
 0x3b6   :  { %593 = vst [vmem:[%s969_s7] sm:$0x3] %v592_v9 }

</bundles_post_ra>
